<compile_context>
chip_gen: v6e
topology: v6e:2x2x1
jax: 0.10.0
libtpu: 0.0.40
codegen_flags: <defaults>
</compile_context>

<pallas_src>
import jax
import jax.numpy as jnp
from jax import lax
from jax.experimental import pallas as pl
from jax.experimental.pallas import tpu as pltpu


def _zero_halo(ref, H, W, C):
    """Zero the 1-pixel border of a (H+2, W+2, C) VMEM buffer (interior untouched)."""
    z_row = jnp.zeros((1, W + 2, C), ref.dtype)
    z_col = jnp.zeros((H, 1, C), ref.dtype)
    ref[0:1, :, :] = z_row
    ref[H + 1:H + 2, :, :] = z_row
    ref[1:H + 1, 0:1, :] = z_col
    ref[1:H + 1, W + 1:W + 2, :] = z_col


def _resblock_kernel(x_ref, w1_ref, b1_ref, w2_ref, b2_ref, out_ref,
                     xpad_ref, hpad_ref):
    # x_ref    : (1, H, W, C)   bf16 input tile (one batch element, unpadded)
    # w1_ref   : (9*C, C)       bf16 conv1 weights, rows ordered (dy, dx, ci)
    # b1_ref   : (1, C)         f32 conv1 bias
    # w2_ref   : (9*C, C)       bf16 conv2 weights
    # b2_ref   : (1, C)         f32 conv2 bias
    # out_ref  : (1, H, W, C)   f32 output tile
    # xpad_ref : (H+2, W+2, C)  bf16 VMEM halo buffer for the input
    # hpad_ref : (H+2, W+2, C)  bf16 VMEM halo buffer for the intermediate activation
    _, H, W, C = out_ref.shape

    # Zero only the 1-px halo (interior is fully overwritten below).
    _zero_halo(xpad_ref, H, W, C)
    _zero_halo(hpad_ref, H, W, C)

    x = x_ref[0]                                   # (H, W, C) bf16
    xpad_ref[1:H + 1, 1:W + 1, :] = x              # in-kernel zero padding

    def conv3x3(src_ref, w_ref, b_ref):
        src = src_ref[...]                          # (H+2, W+2, C) bf16
        # im2col-lite: fold the 9 taps into the contraction dim (K = 9*C).
        cols = jnp.concatenate(
            [src[dy:dy + H, dx:dx + W, :] for dy in range(3) for dx in range(3)],
            axis=-1)                                # (H, W, 9*C) bf16
        # Contiguous leading-dim merge; single MXU matmul with f32 accumulation.
        acc = jnp.dot(cols.reshape(H * W, 9 * C), w_ref[...],
                      preferred_element_type=jnp.float32)   # (H*W, C) f32
        acc = acc + b_ref[...]                      # broadcast (1, C)
        return acc.reshape(H, W, C)                 # contiguous leading-dim split

    # conv1 + ReLU
    h = jnp.maximum(conv3x3(xpad_ref, w1_ref, b1_ref), 0.0)     # (H, W, C) f32
    hpad_ref[1:H + 1, 1:W + 1, :] = h.astype(hpad_ref.dtype)    # bf16 for the MXU

    # conv2 + residual
    h2 = conv3x3(hpad_ref, w2_ref, b2_ref)                      # (H, W, C) f32
    out_ref[0] = (h2 + x.astype(jnp.float32)).astype(out_ref.dtype)


def resnet_block_light(x_nchw, w1, b1, w2, b2):
    """Forward pass of ResnetBlock_light.

    x_nchw : (N, C, H, W) float32, PyTorch NCHW convention.
    w1, w2 : (C, C, 3, 3)  OIHW conv weights.
    b1, b2 : (C,)          biases.
    Returns (N, C, H, W) float32.
    """
    N, C, H, W = x_nchw.shape

    # Layout plumbing in plain JAX (no padded HBM copy of the input anymore).
    x_nhwc = jnp.transpose(x_nchw, (0, 2, 3, 1)).astype(jnp.bfloat16)   # (N,H,W,C)
    # OIHW -> (kh, kw, ci, co) -> (9*C, C): row index = (dy*3 + dx)*C + ci.
    w1k = jnp.transpose(w1, (2, 3, 1, 0)).reshape(9 * C, C).astype(jnp.bfloat16)
    w2k = jnp.transpose(w2, (2, 3, 1, 0)).reshape(9 * C, C).astype(jnp.bfloat16)
    b1k = b1.reshape(1, C).astype(jnp.float32)
    b2k = b2.reshape(1, C).astype(jnp.float32)

    out_nhwc = pl.pallas_call(
        _resblock_kernel,
        out_shape=jax.ShapeDtypeStruct((N, H, W, C), jnp.float32),
        grid_spec=pltpu.PrefetchScalarGridSpec(
            num_scalar_prefetch=0,
            grid=(N,),
            in_specs=[
                pl.BlockSpec((1, H, W, C), lambda n: (n, 0, 0, 0)),
                pl.BlockSpec((9 * C, C), lambda n: (0, 0)),
                pl.BlockSpec((1, C), lambda n: (0, 0)),
                pl.BlockSpec((9 * C, C), lambda n: (0, 0)),
                pl.BlockSpec((1, C), lambda n: (0, 0)),
            ],
            out_specs=pl.BlockSpec((1, H, W, C), lambda n: (n, 0, 0, 0)),
            scratch_shapes=[
                pltpu.VMEM((H + 2, W + 2, C), jnp.bfloat16),   # padded input
                pltpu.VMEM((H + 2, W + 2, C), jnp.bfloat16),   # padded activation
            ],
        ),
        compiler_params=pltpu.CompilerParams(
            dimension_semantics=("parallel",),
            vmem_limit_bytes=64 * 1024 * 1024,
        ),
    )(x_nhwc, w1k, b1k, w2k, b2k)

    return jnp.transpose(out_nhwc, (0, 3, 1, 2))                 # back to NCHW


def _reference(x_nchw, w1, b1, w2, b2):
    """Pure-JAX f32 reference using lax.conv_general_dilated (matches PyTorch Conv2d)."""
    dn = ("NCHW", "OIHW", "NCHW")
    h = lax.conv_general_dilated(x_nchw, w1, (1, 1), ((1, 1), (1, 1)),
                                 dimension_numbers=dn)
    h = h + b1.reshape(1, -1, 1, 1)
    h = jnp.maximum(h, 0.0)
    h = lax.conv_general_dilated(h, w2, (1, 1), ((1, 1), (1, 1)),
                                 dimension_numbers=dn)
    h = h + b2.reshape(1, -1, 1, 1)
    return h + x_nchw


if __name__ == "__main__":
    # Deterministic synthetic parameters & input (no checkpoint loading).
    N, C, H, W = 2, 4, 16, 16
    key = jax.random.PRNGKey(0)
    kx, kw1, kb1, kw2, kb2 = jax.random.split(key, 5)

    x = jax.random.normal(kx, (N, C, H, W), jnp.float32)
    fan_in = C * 3 * 3
    bound = 1.0 / (fan_in ** 0.5)
    w1 = jax.random.uniform(kw1, (C, C, 3, 3), jnp.float32, -bound, bound)
    b1 = jax.random.uniform(kb1, (C,), jnp.float32, -bound, bound)
    w2 = jax.random.uniform(kw2, (C, C, 3, 3), jnp.float32, -bound, bound)
    b2 = jax.random.uniform(kb2, (C,), jnp.float32, -bound, bound)

    out = resnet_block_light(x, w1, b1, w2, b2)
    out = jax.block_until_ready(out)

    ref = jax.block_until_ready(_reference(x, w1, b1, w2, b2))
    assert out.shape == (N, C, H, W)
    # bf16 MXU path -> loosened tolerance vs the f32 reference.
    assert jnp.allclose(out, ref, atol=5e-2, rtol=5e-2), \
        f"max abs err {jnp.max(jnp.abs(out - ref))}"

    print("KERNEL_OK")
</pallas_src>

<mosaic_0001>
module attributes {stable_mosaic.version = 11 : i64} {
  func.func @_resblock_kernel(%arg0: i32, %arg1: memref<1x16x16x4xbf16, #tpu.memory_space<vmem>>, %arg2: memref<36x4xbf16, #tpu.memory_space<vmem>>, %arg3: memref<1x4xf32, #tpu.memory_space<vmem>>, %arg4: memref<36x4xbf16, #tpu.memory_space<vmem>>, %arg5: memref<1x4xf32, #tpu.memory_space<vmem>>, %arg6: memref<1x16x16x4xf32, #tpu.memory_space<vmem>>, %arg7: memref<18x18x4xbf16, #tpu.memory_space<vmem>>, %arg8: memref<18x18x4xbf16, #tpu.memory_space<vmem>>) attributes {dimension_semantics = [#tpu.dimension_semantics<parallel>], iteration_bounds = array<i64: 2>, scalar_prefetch = 0 : i64, scratch_operands = 2 : i64, tpu.core_type = #tpu.core_type<tc>, window_params = [{transform_indices = @transform_0, window_bounds = array<i64: 1, 16, 16, 4>}, {pipeline_mode = #tpu.pipeline_mode<synchronous>, transform_indices = @transform_1, window_bounds = array<i64: 36, 4>}, {pipeline_mode = #tpu.pipeline_mode<synchronous>, transform_indices = @transform_2, window_bounds = array<i64: 1, 4>}, {pipeline_mode = #tpu.pipeline_mode<synchronous>, transform_indices = @transform_3, window_bounds = array<i64: 36, 4>}, {pipeline_mode = #tpu.pipeline_mode<synchronous>, transform_indices = @transform_4, window_bounds = array<i64: 1, 4>}, {transform_indices = @transform_5, window_bounds = array<i64: 1, 16, 16, 4>}]} {
    %cst = arith.constant 0.000000e+00 : bf16
    %0 = vector.broadcast %cst : bf16 to vector<1x18x4xbf16>
    %cst_0 = arith.constant 0.000000e+00 : bf16
    %1 = vector.broadcast %cst_0 : bf16 to vector<16x1x4xbf16>
    %c0 = arith.constant 0 : index
    %c0_1 = arith.constant 0 : index
    %c0_2 = arith.constant 0 : index
    %2 = vector.load %arg7[%c0, %c0_1, %c0_2] : memref<18x18x4xbf16, #tpu.memory_space<vmem>>, vector<1x18x4xbf16>
    tpu.vector_store %arg7[%c0, %c0_1, %c0_2], %0 {strides = array<i32>} : memref<18x18x4xbf16, #tpu.memory_space<vmem>>, vector<1x18x4xbf16>,
    %c17 = arith.constant 17 : index
    %c0_3 = arith.constant 0 : index
    %c0_4 = arith.constant 0 : index
    %3 = vector.load %arg7[%c17, %c0_3, %c0_4] : memref<18x18x4xbf16, #tpu.memory_space<vmem>>, vector<1x18x4xbf16>
    tpu.vector_store %arg7[%c17, %c0_3, %c0_4], %0 {strides = array<i32>} : memref<18x18x4xbf16, #tpu.memory_space<vmem>>, vector<1x18x4xbf16>,
    %c1 = arith.constant 1 : index
    %c0_5 = arith.constant 0 : index
    %c0_6 = arith.constant 0 : index
    %4 = vector.load %arg7[%c1, %c0_5, %c0_6] : memref<18x18x4xbf16, #tpu.memory_space<vmem>>, vector<16x1x4xbf16>
    tpu.vector_store %arg7[%c1, %c0_5, %c0_6], %1 {strides = array<i32>} : memref<18x18x4xbf16, #tpu.memory_space<vmem>>, vector<16x1x4xbf16>,
    %c1_7 = arith.constant 1 : index
    %c17_8 = arith.constant 17 : index
    %c0_9 = arith.constant 0 : index
    %5 = vector.load %arg7[%c1_7, %c17_8, %c0_9] : memref<18x18x4xbf16, #tpu.memory_space<vmem>>, vector<16x1x4xbf16>
    tpu.vector_store %arg7[%c1_7, %c17_8, %c0_9], %1 {strides = array<i32>} : memref<18x18x4xbf16, #tpu.memory_space<vmem>>, vector<16x1x4xbf16>,
    %cst_10 = arith.constant 0.000000e+00 : bf16
    %6 = vector.broadcast %cst_10 : bf16 to vector<1x18x4xbf16>
    %cst_11 = arith.constant 0.000000e+00 : bf16
    %7 = vector.broadcast %cst_11 : bf16 to vector<16x1x4xbf16>
    %c0_12 = arith.constant 0 : index
    %c0_13 = arith.constant 0 : index
    %c0_14 = arith.constant 0 : index
    %8 = vector.load %arg8[%c0_12, %c0_13, %c0_14] : memref<18x18x4xbf16, #tpu.memory_space<vmem>>, vector<1x18x4xbf16>
    tpu.vector_store %arg8[%c0_12, %c0_13, %c0_14], %6 {strides = array<i32>} : memref<18x18x4xbf16, #tpu.memory_space<vmem>>, vector<1x18x4xbf16>,
    %c17_15 = arith.constant 17 : index
    %c0_16 = arith.constant 0 : index
    %c0_17 = arith.constant 0 : index
    %9 = vector.load %arg8[%c17_15, %c0_16, %c0_17] : memref<18x18x4xbf16, #tpu.memory_space<vmem>>, vector<1x18x4xbf16>
    tpu.vector_store %arg8[%c17_15, %c0_16, %c0_17], %6 {strides = array<i32>} : memref<18x18x4xbf16, #tpu.memory_space<vmem>>, vector<1x18x4xbf16>,
    %c1_18 = arith.constant 1 : index
    %c0_19 = arith.constant 0 : index
    %c0_20 = arith.constant 0 : index
    %10 = vector.load %arg8[%c1_18, %c0_19, %c0_20] : memref<18x18x4xbf16, #tpu.memory_space<vmem>>, vector<16x1x4xbf16>
    tpu.vector_store %arg8[%c1_18, %c0_19, %c0_20], %7 {strides = array<i32>} : memref<18x18x4xbf16, #tpu.memory_space<vmem>>, vector<16x1x4xbf16>,
    %c1_21 = arith.constant 1 : index
    %c17_22 = arith.constant 17 : index
    %c0_23 = arith.constant 0 : index
    %11 = vector.load %arg8[%c1_21, %c17_22, %c0_23] : memref<18x18x4xbf16, #tpu.memory_space<vmem>>, vector<16x1x4xbf16>
    tpu.vector_store %arg8[%c1_21, %c17_22, %c0_23], %7 {strides = array<i32>} : memref<18x18x4xbf16, #tpu.memory_space<vmem>>, vector<16x1x4xbf16>,
    %c0_24 = arith.constant 0 : index
    %c0_25 = arith.constant 0 : index
    %c0_26 = arith.constant 0 : index
    %c0_27 = arith.constant 0 : index
    %12 = vector.load %arg1[%c0_24, %c0_25, %c0_26, %c0_27] : memref<1x16x16x4xbf16, #tpu.memory_space<vmem>>, vector<1x16x16x4xbf16>
    %13 = vector.shape_cast %12 : vector<1x16x16x4xbf16> to vector<16x16x4xbf16>
    %c1_28 = arith.constant 1 : index
    %c1_29 = arith.constant 1 : index
    %c0_30 = arith.constant 0 : index
    %14 = vector.load %arg7[%c1_28, %c1_29, %c0_30] : memref<18x18x4xbf16, #tpu.memory_space<vmem>>, vector<16x16x4xbf16>
    tpu.vector_store %arg7[%c1_28, %c1_29, %c0_30], %13 {strides = array<i32>} : memref<18x18x4xbf16, #tpu.memory_space<vmem>>, vector<16x16x4xbf16>,
    %c0_31 = arith.constant 0 : index
    %c0_32 = arith.constant 0 : index
    %c0_33 = arith.constant 0 : index
    %15 = vector.load %arg7[%c0_31, %c0_32, %c0_33] : memref<18x18x4xbf16, #tpu.memory_space<vmem>>, vector<18x18x4xbf16>
    %16 = vector.extract_strided_slice %15 {offsets = [0, 0, 0], sizes = [16, 16, 4], strides = [1, 1, 1]} : vector<18x18x4xbf16> to vector<16x16x4xbf16>
    %17 = vector.extract_strided_slice %15 {offsets = [0, 1, 0], sizes = [16, 16, 4], strides = [1, 1, 1]} : vector<18x18x4xbf16> to vector<16x16x4xbf16>
    %18 = vector.extract_strided_slice %15 {offsets = [0, 2, 0], sizes = [16, 16, 4], strides = [1, 1, 1]} : vector<18x18x4xbf16> to vector<16x16x4xbf16>
    %19 = vector.extract_strided_slice %15 {offsets = [1, 0, 0], sizes = [16, 16, 4], strides = [1, 1, 1]} : vector<18x18x4xbf16> to vector<16x16x4xbf16>
    %20 = vector.extract_strided_slice %15 {offsets = [1, 1, 0], sizes = [16, 16, 4], strides = [1, 1, 1]} : vector<18x18x4xbf16> to vector<16x16x4xbf16>
    %21 = vector.extract_strided_slice %15 {offsets = [1, 2, 0], sizes = [16, 16, 4], strides = [1, 1, 1]} : vector<18x18x4xbf16> to vector<16x16x4xbf16>
    %22 = vector.extract_strided_slice %15 {offsets = [2, 0, 0], sizes = [16, 16, 4], strides = [1, 1, 1]} : vector<18x18x4xbf16> to vector<16x16x4xbf16>
    %23 = vector.extract_strided_slice %15 {offsets = [2, 1, 0], sizes = [16, 16, 4], strides = [1, 1, 1]} : vector<18x18x4xbf16> to vector<16x16x4xbf16>
    %24 = vector.extract_strided_slice %15 {offsets = [2, 2, 0], sizes = [16, 16, 4], strides = [1, 1, 1]} : vector<18x18x4xbf16> to vector<16x16x4xbf16>
    %25 = tpu.concatenate %16, %17, %18, %19, %20, %21, %22, %23, %24 in 2 : vector<16x16x4xbf16>, vector<16x16x4xbf16>, vector<16x16x4xbf16>, vector<16x16x4xbf16>, vector<16x16x4xbf16>, vector<16x16x4xbf16>, vector<16x16x4xbf16>, vector<16x16x4xbf16>, vector<16x16x4xbf16> -> vector<16x16x36xbf16>
    %26 = vector.shape_cast %25 : vector<16x16x36xbf16> to vector<256x36xbf16>
    %c0_34 = arith.constant 0 : index
    %c0_35 = arith.constant 0 : index
    %27 = vector.load %arg2[%c0_34, %c0_35] : memref<36x4xbf16, #tpu.memory_space<vmem>>, vector<36x4xbf16>
    %cst_36 = arith.constant dense<0.000000e+00> : vector<256x4xf32>
    %28 = tpu.matmul %26, %27, %cst_36 {dimension_numbers = #tpu.dot_dimension_numbers<[1], [0], [0], [1], [0, 0, 1, 1], [], []>} : vector<256x36xbf16>, vector<36x4xbf16>, vector<256x4xf32> -> vector<256x4xf32>
    %c0_37 = arith.constant 0 : index
    %c0_38 = arith.constant 0 : index
    %29 = vector.load %arg3[%c0_37, %c0_38] : memref<1x4xf32, #tpu.memory_space<vmem>>, vector<1x4xf32>
    %30 = vector.broadcast %29 : vector<1x4xf32> to vector<256x4xf32>
    %31 = arith.addf %28, %30 : vector<256x4xf32>
    %32 = vector.shape_cast %31 : vector<256x4xf32> to vector<16x16x4xf32>
    %cst_39 = arith.constant 0.000000e+00 : f32
    %33 = vector.broadcast %cst_39 : f32 to vector<16x16x4xf32>
    %34 = arith.maximumf %32, %33 : vector<16x16x4xf32>
    %35 = arith.truncf %34 : vector<16x16x4xf32> to vector<16x16x4xbf16>
    %c1_40 = arith.constant 1 : index
    %c1_41 = arith.constant 1 : index
    %c0_42 = arith.constant 0 : index
    %36 = vector.load %arg8[%c1_40, %c1_41, %c0_42] : memref<18x18x4xbf16, #tpu.memory_space<vmem>>, vector<16x16x4xbf16>
    tpu.vector_store %arg8[%c1_40, %c1_41, %c0_42], %35 {strides = array<i32>} : memref<18x18x4xbf16, #tpu.memory_space<vmem>>, vector<16x16x4xbf16>,
    %c0_43 = arith.constant 0 : index
    %c0_44 = arith.constant 0 : index
    %c0_45 = arith.constant 0 : index
    %37 = vector.load %arg8[%c0_43, %c0_44, %c0_45] : memref<18x18x4xbf16, #tpu.memory_space<vmem>>, vector<18x18x4xbf16>
    %38 = vector.extract_strided_slice %37 {offsets = [0, 0, 0], sizes = [16, 16, 4], strides = [1, 1, 1]} : vector<18x18x4xbf16> to vector<16x16x4xbf16>
    %39 = vector.extract_strided_slice %37 {offsets = [0, 1, 0], sizes = [16, 16, 4], strides = [1, 1, 1]} : vector<18x18x4xbf16> to vector<16x16x4xbf16>
    %40 = vector.extract_strided_slice %37 {offsets = [0, 2, 0], sizes = [16, 16, 4], strides = [1, 1, 1]} : vector<18x18x4xbf16> to vector<16x16x4xbf16>
    %41 = vector.extract_strided_slice %37 {offsets = [1, 0, 0], sizes = [16, 16, 4], strides = [1, 1, 1]} : vector<18x18x4xbf16> to vector<16x16x4xbf16>
    %42 = vector.extract_strided_slice %37 {offsets = [1, 1, 0], sizes = [16, 16, 4], strides = [1, 1, 1]} : vector<18x18x4xbf16> to vector<16x16x4xbf16>
    %43 = vector.extract_strided_slice %37 {offsets = [1, 2, 0], sizes = [16, 16, 4], strides = [1, 1, 1]} : vector<18x18x4xbf16> to vector<16x16x4xbf16>
    %44 = vector.extract_strided_slice %37 {offsets = [2, 0, 0], sizes = [16, 16, 4], strides = [1, 1, 1]} : vector<18x18x4xbf16> to vector<16x16x4xbf16>
    %45 = vector.extract_strided_slice %37 {offsets = [2, 1, 0], sizes = [16, 16, 4], strides = [1, 1, 1]} : vector<18x18x4xbf16> to vector<16x16x4xbf16>
    %46 = vector.extract_strided_slice %37 {offsets = [2, 2, 0], sizes = [16, 16, 4], strides = [1, 1, 1]} : vector<18x18x4xbf16> to vector<16x16x4xbf16>
    %47 = tpu.concatenate %38, %39, %40, %41, %42, %43, %44, %45, %46 in 2 : vector<16x16x4xbf16>, vector<16x16x4xbf16>, vector<16x16x4xbf16>, vector<16x16x4xbf16>, vector<16x16x4xbf16>, vector<16x16x4xbf16>, vector<16x16x4xbf16>, vector<16x16x4xbf16>, vector<16x16x4xbf16> -> vector<16x16x36xbf16>
    %48 = vector.shape_cast %47 : vector<16x16x36xbf16> to vector<256x36xbf16>
    %c0_46 = arith.constant 0 : index
    %c0_47 = arith.constant 0 : index
    %49 = vector.load %arg4[%c0_46, %c0_47] : memref<36x4xbf16, #tpu.memory_space<vmem>>, vector<36x4xbf16>
    %cst_48 = arith.constant dense<0.000000e+00> : vector<256x4xf32>
    %50 = tpu.matmul %48, %49, %cst_48 {dimension_numbers = #tpu.dot_dimension_numbers<[1], [0], [0], [1], [0, 0, 1, 1], [], []>} : vector<256x36xbf16>, vector<36x4xbf16>, vector<256x4xf32> -> vector<256x4xf32>
    %c0_49 = arith.constant 0 : index
    %c0_50 = arith.constant 0 : index
    %51 = vector.load %arg5[%c0_49, %c0_50] : memref<1x4xf32, #tpu.memory_space<vmem>>, vector<1x4xf32>
    %52 = vector.broadcast %51 : vector<1x4xf32> to vector<256x4xf32>
    %53 = arith.addf %50, %52 : vector<256x4xf32>
    %54 = vector.shape_cast %53 : vector<256x4xf32> to vector<16x16x4xf32>
    %55 = arith.extf %13 : vector<16x16x4xbf16> to vector<16x16x4xf32>
    %56 = arith.addf %54, %55 : vector<16x16x4xf32>
    %c0_51 = arith.constant 0 : index
    %c0_52 = arith.constant 0 : index
    %c0_53 = arith.constant 0 : index
    %c0_54 = arith.constant 0 : index
    %57 = vector.load %arg6[%c0_51, %c0_52, %c0_53, %c0_54] : memref<1x16x16x4xf32, #tpu.memory_space<vmem>>, vector<1x16x16x4xf32>
    %58 = vector.shape_cast %57 : vector<1x16x16x4xf32> to vector<16x16x4xf32>
    %59 = vector.shape_cast %56 : vector<16x16x4xf32> to vector<1x16x16x4xf32>
    tpu.vector_store %arg6[%c0_51, %c0_52, %c0_53, %c0_54], %59 {strides = array<i32>} : memref<1x16x16x4xf32, #tpu.memory_space<vmem>>, vector<1x16x16x4xf32>,
    return
  }
  func.func @transform_0(%arg0: i32) -> (i32, i32, i32, i32) {
    %c0_i32 = arith.constant 0 : i32
    %c0_i32_0 = arith.constant 0 : i32
    %c0_i32_1 = arith.constant 0 : i32
    %c0_i32_2 = arith.constant 0 : i32
    return %arg0, %c0_i32, %c0_i32_0, %c0_i32_1 : i32, i32, i32, i32
  }
  func.func @transform_1(%arg0: i32) -> (i32, i32) {
    %c0_i32 = arith.constant 0 : i32
    %c0_i32_0 = arith.constant 0 : i32
    %c0_i32_1 = arith.constant 0 : i32
    return %c0_i32, %c0_i32_0 : i32, i32
  }
  func.func @transform_2(%arg0: i32) -> (i32, i32) {
    %c0_i32 = arith.constant 0 : i32
    %c0_i32_0 = arith.constant 0 : i32
    %c0_i32_1 = arith.constant 0 : i32
    return %c0_i32, %c0_i32_0 : i32, i32
  }
  func.func @transform_3(%arg0: i32) -> (i32, i32) {
    %c0_i32 = arith.constant 0 : i32
    %c0_i32_0 = arith.constant 0 : i32
    %c0_i32_1 = arith.constant 0 : i32
    return %c0_i32, %c0_i32_0 : i32, i32
  }
  func.func @transform_4(%arg0: i32) -> (i32, i32) {
    %c0_i32 = arith.constant 0 : i32
    %c0_i32_0 = arith.constant 0 : i32
    %c0_i32_1 = arith.constant 0 : i32
    return %c0_i32, %c0_i32_0 : i32, i32
  }
  func.func @transform_5(%arg0: i32) -> (i32, i32, i32, i32) {
    %c0_i32 = arith.constant 0 : i32
    %c0_i32_0 = arith.constant 0 : i32
    %c0_i32_1 = arith.constant 0 : i32
    %c0_i32_2 = arith.constant 0 : i32
    return %arg0, %c0_i32, %c0_i32_0, %c0_i32_1 : i32, i32, i32, i32
  }
}

</mosaic_0001>

<bundles_post_ra>
// kernel: tpu_custom_call.1
= control target key start
LH: loop header
LB: loop body
LE: loop exit
PB: predicated region body
PF: predicated region fallthrough
CT: control target
= control target key end

     0   :  { %s4535_s18 = smov 0   ;;  %s6335_s0 = inlined_call_operand.vmem [shape: bf16[2,16,16,4], index: 0, kind: input, shape index: {}]   ;;  %s6336_s1 = inlined_call_operand.vmem [shape: bf16[36,4], index: 1, kind: input, shape index: {}]   ;;  %s6337_s2 = inlined_call_operand.vmem [shape: f32[1,4], index: 2, kind: input, shape index: {}]   ;;  %s6338_s3 = inlined_call_operand.vmem [shape: bf16[36,4], index: 3, kind: input, shape index: {}]   ;;  %s6339_s4 = inlined_call_operand.vmem [shape: f32[1,4], index: 4, kind: input, shape index: {}]   ;;  %s6340_s5 = inlined_call_operand.vmem [shape: f32[2,16,16,4], index: 5, kind: output, shape index: {}]  }
   0x1 LB: > { %s4038_s19 = sadd.s32 4294967295, %s4494_s18   ;;  %p4042_p0 = scmp.ge.s32.totalorder %s4494_s18, 1  ;;  %s4494_s18 = sphi %s4535_s18, %s15_s18  }
   0x2   : > { %p187_p1 = scmp.lt.s32.totalorder %s4494_s18, 3 }
   0x4   : > { %p188_p2 = pnand %p4042_p0, %p187_p1 }
   0x5   : > { %p215_p3 = scmp.lt.s32.totalorder (!%p188_p2), %s4038_s19, 1  ;;  %s4497_s24 = smov (!%p188_p2), 8  }
   0x6   : > { %191 = sbr.rel (%p188_p2) target bundleno = 995 (0x3e3), region = 40  ;;  %s4498_s25 = smov (!%p188_p2), 4  }
   0x7   : > { %s4499_s26 = smov (!%p188_p2), 12   ;;  %s4500_s27 = smov (!%p188_p2), 24  }
   0x8   : > { %s4501_s28 = smov (!%p188_p2), 20   ;;  %s4502_s29 = smov (!%p188_p2), 32  }
   0x9   : > { %s4503_s30 = smov (!%p188_p2), 16   ;;  %s4504_s6 = smov (!%p188_p2), 28  }
   0xb   : > { %vm226_vm0 = vcmask 27648   ;;  %vm229_vm1 = vcmask 24576   ;;  %vm237_vm2 = vsmask.f32 256  ;;  %v4496_v0 = vmov 0   ;;  %s6387_s19 = smov (!%p215_p3, %s4038_s19), 1 }
   0xc   : > { %227 = vst.msk [vmem:[#allocation2] sm:$0xf] %vm226_vm0, %v4496_v0  ;;  %228 = vst.msk [vmem:[#allocation2 + $0x4] sm:$0xf] %vm226_vm0, %v4496_v0  ;;  %vm287_vm4 = vsmask.f32 7938 }
   0xd   : > { %230 = vst.msk [vmem:[#allocation2 + $0x8] sm:$0x1] %vm229_vm1, %v4496_v0  ;;  %vm4548_vm3 = vmand %vm229_vm1, %vm237_vm2  ;;  %v242_v3 = vld [vmem:[#allocation2 + $0x18] sm:$0x1]  ;;  %v239_v5 = vld [vmem:[#allocation2 + $0xc] sm:$0x1] }
   0xe   : > { %232 = vst.msk [vmem:[#allocation2 + $0xcc] sm:$0xf] %vm226_vm0, %v4496_v0  ;;  %233 = vst.msk [vmem:[#allocation2 + $0xd0] sm:$0xf] %vm226_vm0, %v4496_v0  ;;  %v243_v4 = vsel %vm4548_vm3, 0, %v242_v3  ;;  %v240_v7 = vsel %vm4548_vm3, 0, %v239_v5 }
   0xf   : > { %234 = vst.msk [vmem:[#allocation2 + $0xd4] sm:$0x1] %vm229_vm1, %v4496_v0  ;;  %339 = vst.msk [vmem:[#allocation3 + $0x8] sm:$0x1] %vm229_vm1, %v4496_v0  ;;  %v245_v6 = vld [vmem:[#allocation2 + $0x24] sm:$0x1] }
  0x10   : > { %337 = vst.msk [vmem:[#allocation3] sm:$0xf] %vm226_vm0, %v4496_v0  ;;  %338 = vst.msk [vmem:[#allocation3 + $0x4] sm:$0xf] %vm226_vm0, %v4496_v0  ;;  %v246_v8 = vsel %vm4548_vm3, 0, %v245_v6  ;;  %s4193_s20 = sshll.u32 %s6387_s19, 7 }
  0x11   : > { %341 = vst.msk [vmem:[#allocation3 + $0xcc] sm:$0xf] %vm226_vm0, %v4496_v0  ;;  %342 = vst.msk [vmem:[#allocation3 + $0xd0] sm:$0xf] %vm226_vm0, %v4496_v0  ;;  %v289_v9 = vld [vmem:[#allocation2 + $0x14] sm:$0x1]  ;;  %s4583_s23 = scalar_lea.vmem %s6335_s0, %s4193_s20 }
  0x12   : > { %343 = vst.msk [vmem:[#allocation3 + $0xd4] sm:$0x1] %vm229_vm1, %v4496_v0  ;;  %vm4563_vm5 = vmand %vm229_vm1, %vm287_vm4  ;;  %v292_v11 = vld [vmem:[#allocation2 + $0x20] sm:$0x1]  ;;  %v295_v13 = vld [vmem:[#allocation2 + $0x2c] sm:$0x1] }
  0x13   : > { %244 = vst [vmem:[#allocation2 + $0x18] sm:$0x1] %v243_v4  ;;  %241 = vst [vmem:[#allocation2 + $0xc] sm:$0x1] %v240_v7  ;;  %v290_v10 = vsel %vm4563_vm5, 0, %v289_v9  ;;  %v293_v12 = vsel %vm4563_vm5, 0, %v292_v11 }
  0x14   : > { %247 = vst [vmem:[#allocation2 + $0x24] sm:$0x1] %v246_v8  ;;  %291 = vst [vmem:[#allocation2 + $0x14] sm:$0x1] %v290_v10  ;;  %vm1316_vm6 = vcmask 1046528   ;;  %v296_v14 = vsel %vm4563_vm5, 0, %v295_v13 }
  0x15   : > { %vm1091_vm7 = vsmask.f32 7424  ;;  %vm473_vm8 = vsmask.f32 4368  ;;  %294 = vst [vmem:[#allocation2 + $0x20] sm:$0x1] %v293_v12  ;;  %vm4594_vm9 = vmand %vm226_vm0, %vm287_vm4 }
  0x16   : > { %297 = vst [vmem:[#allocation2 + $0x2c] sm:$0x1] %v296_v14  ;;  %v4360_v15 = vld [vmem:[#allocation2] sm:$0xff]   ;;  %v4361_v16 = vld [vmem:[#allocation2 + $0x8] ss:$0 sps:$4 sm:$0x11]   ;;  %vm4602_vm10 = vmor %vm237_vm2, %vm473_vm8 }
  0x17   : > { %v443_v17 = vld [vmem:[%s4583_s23 + $0x8] sm:$0xf]  ;;  %v444_v18 = vld [vmem:[%s4583_s23 + $0xc] sm:$0xf]  ;;  %v441_v21 = vld [vmem:[%s4583_s23] sm:$0xf] }
  0x18   : > { %v493_v19 = vshrl.u32 %v443_v17, 16  ;;  %v496_v20 = vshll.u32 %v443_v17, 16  ;;  %v1317_v22 = vrot.slane %v4360_v15, 1  ;;  %v1318_v23 = vrot.slane %v4361_v16, 1  ;;  %v442_v30 = vld [vmem:[%s4583_s23 + $0x4] sm:$0xf] }
  0x19   : > { %v1093_v24 = vshrl.u32 %v4360_v15, 16  ;;  %v1095_v25 = vshll.u32 %v4360_v15, 16  ;;  %v1100_v26 = vshll.u32 %v4361_v16, 16  ;;  %v501_v28 = vshrl.u32 %v444_v18, 16  ;;  %v445_v41 = vld [vmem:[%s4583_s23 + $0x10] sm:$0xf] }
  0x1a   : > { %v495_v27 = vrot.slane %v493_v19, 7  ;;  %v504_v29 = vshll.u32 %v444_v18, 16  ;;  %v1319_v31 = vsel %vm1316_vm6, %v1317_v22, %v1318_v23  ;;  %v804_v34 = vld [vmem:[#allocation2 + $0x18] sm:$0xf]  ;;  %v476_v35 = vshrl.u32 %v441_v21, 16 }
  0x1b   : > { %v1097_v32 = vrot.slane %v1095_v25, 1  ;;  %v479_v36 = vshll.u32 %v441_v21, 16  ;;  %1365 = vrot.lane.b32.xlu1 %v1319_v31, %s4497_s24  ;;  %v1102_v37 = vrot.slane %v1100_v26, 1  ;;  %v503_v40 = vrot.slane %v501_v28, 7  ;;  %v446_v47 = vld [vmem:[%s4583_s23 + $0x14] sm:$0xf] }
  0x1c   : > { %v498_v38 = vor.u32 %v496_v20, %v495_v27  ;;  %v499_v39 = vrot.slane %v495_v27, 4  ;;  %v478_v44 = vrot.slane %v476_v35, 7  ;;  %v484_v45 = vshrl.u32 %v442_v30, 16  ;;  %v797_v50 = vld [vmem:[#allocation2 + $0xc] sm:$0xf] }
  0x1d   : > { %v1098_v42 = vor.u32 %v1097_v32, %v1093_v24  ;;  %v487_v46 = vshll.u32 %v442_v30, 16  ;;  %v506_v48 = vor.u32 %v504_v29, %v503_v40  ;;  %v510_v51 = vshrl.u32 %v445_v41, 16  ;;  %v248_v53 = vld [vmem:[#allocation2 + $0x30] sm:$0x1]  ;;  %v801_v58 = vld [vmem:[#allocation2 + $0x14] sm:$0x1] }
  0x1e   : > { %v805_v49 = vsel %vm4594_vm9, %v498_v38, %v804_v34  ;;  %v513_v52 = vshll.u32 %v445_v41, 16  ;;  %v481_v55 = vor.u32 %v479_v36, %v478_v44  ;;  %v482_v56 = vrot.slane %v478_v44, 4  ;;  %v808_v59 = vld [vmem:[#allocation2 + $0x20] sm:$0x1]  ;;  %v447_v0 = vld [vmem:[%s4583_s23 + $0x18] sm:$0xf] }
  0x1f   : > { %v1103_v54 = vsel %vm1091_vm7, %v1098_v42, %v1102_v37  ;;  %806 = vst [vmem:[#allocation2 + $0x18] sm:$0xf] %v805_v49  ;;  %v486_v57 = vrot.slane %v484_v45, 7  ;;  %v507_v60 = vsel %vm4602_vm10, %v499_v39, %v506_v48  ;;  %v512_v61 = vrot.slane %v510_v51, 7  ;;  %v298_v3 = vld [vmem:[#allocation2 + $0x38] sm:$0x1] }
  0x20   : > { %1284 = vrot.lane.b32.xlu0 %v1103_v54, %s4498_s25  ;;  %v518_v62 = vshrl.u32 %v446_v47, 16  ;;  %v521_v63 = vshll.u32 %v446_v47, 16  ;;  %807 = vst.msk [vmem:[#allocation2 + $0x1c] sm:$0xf] %vm226_vm0, %v507_v60  ;;  %v798_v5 = vsel %vm4594_vm9, %v481_v55, %v797_v50  ;;  %v811_v6 = vld [vmem:[#allocation2 + $0x24] sm:$0xf] }
  0x21   : > { %v489_v4 = vor.u32 %v487_v46, %v486_v57  ;;  %v491_v7 = vrot.slane %v486_v57, 4  ;;  %v508_v8 = vrot.slane %v503_v40, 4  ;;  %v815_v9 = vld [vmem:[#allocation2 + $0x2c] sm:$0x1]  ;;  %799 = vst [vmem:[#allocation2 + $0xc] sm:$0xf] %v798_v5  ;;  %v515_v10 = vor.u32 %v513_v52, %v512_v61 }
  0x22   : > { %v516_v11 = vrot.slane %v512_v61, 4  ;;  %v520_v12 = vrot.slane %v518_v62, 7  ;;  %v249_v13 = vsel %vm4548_vm3, 0, %v248_v53  ;;  %v448_v14 = vld [vmem:[%s4583_s23 + $0x1c] sm:$0xf]  ;;  %v527_v18 = vshrl.u32 %v447_v0, 16 }
  0x23   : > { %v490_v15 = vsel %vm4602_vm10, %v482_v56, %v489_v4  ;;  %v802_v16 = vsel %vm4548_vm3, %v491_v7, %v801_v58  ;;  %v809_v17 = vsel %vm4548_vm3, %v508_v8, %v808_v59  ;;  %250 = vst [vmem:[#allocation2 + $0x30] sm:$0x1] %v249_v13  ;;  %v251_v19 = vld [vmem:[#allocation2 + $0x3c] sm:$0x1]  ;;  %v449_v20 = vld [vmem:[%s4583_s23 + $0x20] sm:$0xf]  ;;  %v812_v22 = vsel %vm4594_vm9, %v515_v10, %v811_v6 }
  0x24   : > { %800 = vst.msk [vmem:[#allocation2 + $0x10] sm:$0xf] %vm226_vm0, %v490_v15  ;;  %v523_v21 = vor.u32 %v521_v63, %v520_v12  ;;  %803 = vst [vmem:[#allocation2 + $0x14] sm:$0x1] %v802_v16  ;;  %v525_v23 = vrot.slane %v520_v12, 4  ;;  %v530_v24 = vshll.u32 %v447_v0, 16 }
  0x25   : > { %810 = vst [vmem:[#allocation2 + $0x20] sm:$0x1] %v809_v17  ;;  %v4631_v25 = vld [vmem:[%s4583_s23 + $0x24] sm:$0xf]  ;;  %813 = vst [vmem:[#allocation2 + $0x24] sm:$0xf] %v812_v22 }
  0x26   : > { %v529_v26 = vrot.slane %v527_v18, 7  ;;  %v535_v27 = vshrl.u32 %v448_v14, 16  ;;  %v538_v28 = vshll.u32 %v448_v14, 16  ;;  %v299_v29 = vsel %vm4563_vm5, 0, %v298_v3  ;;  %v301_v30 = vld [vmem:[#allocation2 + $0x44] sm:$0x1] }
  0x27   : > { %v524_v31 = vsel %vm4602_vm10, %v516_v11, %v523_v21  ;;  %v816_v32 = vsel %vm4548_vm3, %v525_v23, %v815_v9  ;;  %300 = vst [vmem:[#allocation2 + $0x38] sm:$0x1] %v299_v29  ;;  %v252_v34 = vsel %vm4548_vm3, 0, %v251_v19  ;;  %v544_v35 = vshrl.u32 %v449_v20, 16  ;;  %v254_v36 = vld [vmem:[#allocation2 + $0x48] sm:$0x1] }
  0x28   : > { %814 = vst.msk [vmem:[#allocation2 + $0x28] sm:$0xf] %vm226_vm0, %v524_v31  ;;  %817 = vst [vmem:[#allocation2 + $0x2c] sm:$0x1] %v816_v32  ;;  %v532_v37 = vor.u32 %v530_v24, %v529_v26  ;;  %v533_v38 = vrot.slane %v529_v26, 4  ;;  %v537_v39 = vrot.slane %v535_v27, 7 }
  0x29   : > { %253 = vst [vmem:[#allocation2 + $0x3c] sm:$0x1] %v252_v34  ;;  %v4642_v40 = vld [vmem:[#allocation2 + $0x18] sm:$0xff]   ;;  %v4644_v41 = vrot.slane %v544_v35, 7  ;;  %v547_v42 = vshll.u32 %v449_v20, 16  ;;  %v552_v45 = vshrl.u32 %v4631_v25, 16 }
  0x2a   : > { %v540_v44 = vor.u32 %v538_v28, %v537_v39  ;;  %v302_v46 = vsel %vm4563_vm5, 0, %v301_v30  ;;  %v255_v47 = vsel %vm4548_vm3, 0, %v254_v36  ;;  %1404 = vrot.lane.b32.xlu1 %v4642_v40, %s4499_s26  ;;  %v1323_v48 = vrot.slane %v4642_v40, 1  ;;  %v818_v50 = vld [vmem:[#allocation2 + $0x30] sm:$0xf] }
  0x2b   : > { %v1119_v49 = vshll.u32 %v4642_v40, 16  ;;  %v542_v51 = vrot.slane %v537_v39, 4  ;;  %v555_v52 = vshll.u32 %v4631_v25, 16  ;;  %303 = vst [vmem:[#allocation2 + $0x44] sm:$0x1] %v302_v46  ;;  %v4363_v53 = vld [vmem:[#allocation2 + $0xc] sm:$0xff]   ;;  %v819_v56 = vsel %vm4594_vm9, %v532_v37, %v818_v50 }
  0x2c   : > { %256 = vst [vmem:[#allocation2 + $0x48] sm:$0x1] %v255_v47  ;;  %v1117_v54 = vshrl.u32 %v4642_v40, 16  ;;  %v541_v55 = vsel %vm4602_vm10, %v533_v38, %v540_v44  ;;  %v4365_v57 = vld [vmem:[#allocation2 + $0x14] ss:$0 sps:$4 sm:$0x11]   ;;  %1402 = vrot.lane.b32.xlu0 %v4363_v53, %s4499_s26  ;;  %v549_v5 = vor.u32 %v547_v42, %v4644_v41 }
  0x2d   : > { %v1121_v58 = vrot.slane %v1119_v49, 1  ;;  %820 = vst [vmem:[#allocation2 + $0x30] sm:$0xf] %v819_v56  ;;  %821 = vst.msk [vmem:[#allocation2 + $0x34] sm:$0xf] %vm226_vm0, %v541_v55  ;;  %v1320_v59 = vrot.slane %v4363_v53, 1 }
  0x2e   : > { %v4366_v60 = vld [vmem:[#allocation2 + $0x20] ss:$0 sps:$4 sm:$0x11]   ;;  %v1321_v62 = vrot.slane %v4365_v57, 1  ;;  %v1105_v63 = vshrl.u32 %v4363_v53, 16  ;;  %v1107_v0 = vshll.u32 %v4363_v53, 16 }
  0x2f   : > { %v4663_v61 = vld [vmem:[#allocation2 + $0x24] sm:$0xff]   ;;  %v1124_v3 = vshll.u32 %v4366_v60, 16  ;;  %v1112_v4 = vshll.u32 %v4365_v57, 16  ;;  %v554_v6 = vrot.slane %v552_v45, 7  ;;  %v1324_v7 = vrot.slane %v4366_v60, 1 }
  0x30   : > { %1523 = vrot.lane.b32.xlu1 %v4663_v61, %s4500_s27  ;;  %v1109_v8 = vrot.slane %v1107_v0, 1  ;;  %v1131_v9 = vshll.u32 %v4663_v61, 16  ;;  %v550_v10 = vrot.slane %v4644_v41, 4  ;;  %1521 = vrot.lane.b32.xlu0 %v4642_v40, %s4500_s27  ;;  %v1322_v11 = vsel %vm1316_vm6, %v1320_v59, %v1321_v62  ;;  %v4673_v14 = vld [vmem:[#allocation2 + $0x2c] ss:$0 sps:$4 sm:$0x11]  }
  0x31   : > { %v1122_v12 = vor.u32 %v1121_v58, %v1117_v54  ;;  %v1126_v13 = vrot.slane %v1124_v3, 1  ;;  %v822_v15 = vld [vmem:[#allocation2 + $0x38] sm:$0x1]  ;;  %v1114_v17 = vrot.slane %v1112_v4, 1  ;;  %v1129_v18 = vshrl.u32 %v4663_v61, 16 }
  0x32   : > { %v1110_v16 = vor.u32 %v1109_v8, %v1105_v63  ;;  %v825_v19 = vld [vmem:[#allocation2 + $0x3c] sm:$0xf]  ;;  %v451_v20 = vld [vmem:[%s4583_s23 + $0x28] sm:$0xf]  ;;  %v1133_v21 = vrot.slane %v1131_v9, 1  ;;  %v823_v22 = vsel %vm4548_vm3, %v542_v51, %v822_v15  ;;  %v557_v23 = vor.u32 %v555_v52, %v554_v6 }
  0x33   : > { %v826_v24 = vsel %vm4594_vm9, %v549_v5, %v825_v19  ;;  %824 = vst [vmem:[#allocation2 + $0x38] sm:$0x1] %v823_v22  ;;  %v452_v25 = vld [vmem:[%s4583_s23 + $0x2c] sm:$0xf]  ;;  %v304_v26 = vld [vmem:[#allocation2 + $0x50] sm:$0x1]  ;;  %v4685_v28 = vsel %vm1316_vm6, %v1323_v48, %v1324_v7  ;;  %v4688_v29 = vsel %vm1091_vm7, %v1122_v12, %v1126_v13 }
  0x34   : > { %1367 = vrot.lane.b32.xlu1 %v1322_v11, %s4497_s24  ;;  %827 = vst [vmem:[#allocation2 + $0x3c] sm:$0xf] %v826_v24  ;;  %v257_v27 = vld [vmem:[#allocation2 + $0x54] sm:$0x1]  ;;  %1484 = vrot.lane.b32.xlu0 %v1322_v11, %s4501_s28  ;;  %v1136_v30 = vshll.u32 %v4673_v14, 16  ;;  %v558_v31 = vsel %vm4602_vm10, %v550_v10, %v557_v23  ;;  %v1115_v35 = vsel %vm1091_vm7, %v1110_v16, %v1114_v17  ;;  %v559_v36 = vrot.slane %v554_v6, 4 }
  0x35   : > { %v829_v32 = vld [vmem:[#allocation2 + $0x44] sm:$0x1]  ;;  %v453_v34 = vld [vmem:[%s4583_s23 + $0x30] sm:$0xf]  ;;  %828 = vst.msk [vmem:[#allocation2 + $0x40] sm:$0xf] %vm226_vm0, %v558_v31  ;;  %v1134_v40 = vor.u32 %v1133_v21, %v1129_v18 }
  0x36   : > { %v561_v37 = vshrl.u32 %v451_v20, 16  ;;  %v564_v38 = vshll.u32 %v451_v20, 16  ;;  %v454_v39 = vld [vmem:[%s4583_s23 + $0x34] sm:$0xf]  ;;  %v569_v41 = vshrl.u32 %v452_v25, 16  ;;  %v572_v42 = vshll.u32 %v452_v25, 16 }
  0x37   : > { %v305_v44 = vsel %vm4563_vm5, 0, %v304_v26  ;;  %v830_v45 = vsel %vm4548_vm3, %v559_v36, %v829_v32  ;;  %v258_v47 = vsel %vm4548_vm3, 0, %v257_v27  ;;  %v578_v48 = vshrl.u32 %v453_v34, 16  ;;  %v832_v51 = vld [vmem:[#allocation2 + $0x48] sm:$0xf]  ;;  %v4727_v16 = vld [vmem:[#allocation2 + $0x30] sm:$0xff]  }
  0x38   : > { %1486 = vrot.lane.b32.xlu1 %v4685_v28, %s4501_s28  ;;  %v563_v46 = vrot.slane %v561_v37, 7  ;;  %306 = vst [vmem:[#allocation2 + $0x50] sm:$0x1] %v305_v44  ;;  %1603 = vrot.lane.b32.xlu0 %v4685_v28, %s4502_s29  ;;  %v1138_v49 = vrot.slane %v1136_v30, 1  ;;  %831 = vst [vmem:[#allocation2 + $0x44] sm:$0x1] %v830_v45 }
  0x39   : > { %v571_v50 = vrot.slane %v569_v41, 7  ;;  %259 = vst [vmem:[#allocation2 + $0x54] sm:$0x1] %v258_v47  ;;  %v581_v52 = vshll.u32 %v453_v34, 16  ;;  %v586_v53 = vshrl.u32 %v454_v39, 16  ;;  %v580_v56 = vrot.slane %v578_v48, 7 }
  0x3a   : > { %v566_v54 = vor.u32 %v564_v38, %v563_v46  ;;  %v567_v55 = vrot.slane %v563_v46, 4  ;;  %v589_v57 = vshll.u32 %v454_v39, 16  ;;  %v307_v58 = vld [vmem:[#allocation2 + $0x5c] sm:$0x1]  ;;  %v260_v60 = vld [vmem:[#allocation2 + $0x60] sm:$0x1]  ;;  %v4714_v5 = vsel %vm1091_vm7, %v1134_v40, %v1138_v49 }
  0x3b   : > { %v574_v59 = vor.u32 %v572_v42, %v571_v50  ;;  %v455_v62 = vld [vmem:[%s4583_s23 + $0x38] sm:$0xf]  ;;  %v576_v0 = vrot.slane %v571_v50, 4  ;;  %v584_v3 = vrot.slane %v580_v56, 4  ;;  %v588_v4 = vrot.slane %v586_v53, 7 }
  0x3c   : > { %1451 = vrot.lane.b32.xlu1 %v4688_v29, %s4503_s30  ;;  %v833_v63 = vsel %vm4594_vm9, %v566_v54, %v832_v51  ;;  %1286 = vrot.lane.b32.xlu0 %v1115_v35, %s4498_s25  ;;  %v308_v7 = vsel %vm4563_vm5, 0, %v307_v58  ;;  %v583_v8 = vor.u32 %v581_v52, %v580_v56  ;;  %v261_v10 = vsel %vm4548_vm3, 0, %v260_v60  ;;  %v456_v13 = vld [vmem:[%s4583_s23 + $0x3c] sm:$0xf]  ;;  %v310_v22 = vld [vmem:[#allocation2 + $0x68] sm:$0x1] }
  0x3d   : > { %v575_v6 = vsel %vm4602_vm10, %v567_v55, %v574_v59  ;;  %834 = vst [vmem:[#allocation2 + $0x48] sm:$0xf] %v833_v63  ;;  %v591_v9 = vor.u32 %v589_v57, %v588_v4  ;;  %309 = vst [vmem:[#allocation2 + $0x5c] sm:$0x1] %v308_v7  ;;  %v595_v11 = vshrl.u32 %v455_v62, 16  ;;  %v1326_v15 = vrot.slane %v4663_v61, 1 }
  0x3e   : > { %835 = vst.msk [vmem:[#allocation2 + $0x4c] sm:$0xf] %vm226_vm0, %v575_v6  ;;  %262 = vst [vmem:[#allocation2 + $0x60] sm:$0x1] %v261_v10  ;;  %v598_v21 = vshll.u32 %v455_v62, 16  ;;  %v1327_v23 = vrot.slane %v4673_v14, 1 }
  0x3f   : > { %v836_v12 = vld [vmem:[#allocation2 + $0x50] sm:$0x1]  ;;  %v592_v18 = vsel %vm4602_vm10, %v584_v3, %v591_v9  ;;  %v597_v20 = vrot.slane %v595_v11, 7  ;;  %v593_v25 = vrot.slane %v588_v4, 4  ;;  %v603_v26 = vshrl.u32 %v456_v13, 16  ;;  %v4770_v59 = vld [vmem:[#allocation2 + $0x3c] sm:$0xff]  }
  0x40   : > { %1570 = vrot.lane.b32.xlu1 %v4714_v5, %s4504_s6  ;;  %v837_v17 = vsel %vm4548_vm3, %v576_v0, %v836_v12  ;;  %1449 = vrot.lane.b32.xlu0 %v1115_v35, %s4503_s30  ;;  %v839_v19 = vld [vmem:[#allocation2 + $0x54] sm:$0xf]  ;;  %842 = vst.msk [vmem:[#allocation2 + $0x58] sm:$0xf] %vm226_vm0, %v592_v18  ;;  %v606_v31 = vshll.u32 %v456_v13, 16  ;;  %v1143_v34 = vshll.u32 %v4727_v16, 16  ;;  %v4749_v39 = vsel %vm1316_vm6, %v1326_v15, %v1327_v23 }
  0x41   : > { %838 = vst [vmem:[#allocation2 + $0x50] sm:$0x1] %v837_v17  ;;  %v840_v24 = vsel %vm4594_vm9, %v583_v8, %v839_v19  ;;  %v4738_v27 = vld [vmem:[#allocation2 + $0x38] ss:$0 sps:$4 sm:$0x11]   ;;  %v600_v30 = vor.u32 %v598_v21, %v597_v20  ;;  %v601_v35 = vrot.slane %v597_v20, 4 }
  0x42   : > { %841 = vst [vmem:[#allocation2 + $0x54] sm:$0xf] %v840_v24  ;;  %v263_v32 = vld [vmem:[#allocation2 + $0x6c] sm:$0x1]  ;;  %v605_v14 = vrot.slane %v603_v26, 7  ;;  %v311_v36 = vsel %vm4563_vm5, 0, %v310_v22 }
  0x43   : > { %312 = vst [vmem:[#allocation2 + $0x68] sm:$0x1] %v311_v36  ;;  %v457_v38 = vld [vmem:[%s4583_s23 + $0x40] sm:$0xf]  ;;  %v458_v44 = vld [vmem:[%s4583_s23 + $0x44] sm:$0xf] }
  0x44   : > { %1288 = vrot.lane.b32.xlu1 %v4688_v29, %s4498_s25  ;;  %1568 = vrot.lane.b32.xlu0 %v4688_v29, %s4504_s6  ;;  %v843_v37 = vld [vmem:[#allocation2 + $0x5c] sm:$0x1]  ;;  %v608_v41 = vor.u32 %v606_v31, %v605_v14  ;;  %v1141_v29 = vshrl.u32 %v4727_v16, 16  ;;  %v1145_v46 = vrot.slane %v1143_v34, 1  ;;  %v264_v48 = vsel %vm4548_vm3, 0, %v263_v32  ;;  %v4382_v23 = vld [vmem:[%s6336_s1 + $0x8] sm:$0xff]  }
  0x45   : > { %v844_v40 = vsel %vm4548_vm3, %v593_v25, %v843_v37  ;;  %v846_v42 = vld [vmem:[#allocation2 + $0x60] sm:$0xf]  ;;  %v1148_v49 = vshll.u32 %v4738_v27, 16  ;;  %v610_v50 = vrot.slane %v605_v14, 4  ;;  %265 = vst [vmem:[#allocation2 + $0x6c] sm:$0x1] %v264_v48 }
  0x46   : > { %845 = vst [vmem:[#allocation2 + $0x5c] sm:$0x1] %v844_v40  ;;  %v847_v45 = vsel %vm4594_vm9, %v600_v30, %v846_v42  ;;  %v609_v47 = vsel %vm4602_vm10, %v601_v35, %v608_v41  ;;  %v612_v51 = vshrl.u32 %v457_v38, 16  ;;  %v620_v52 = vshrl.u32 %v458_v44, 16  ;;  %v313_v58 = vld [vmem:[#allocation2 + $0x74] sm:$0x1] }
  0x47   : > { %848 = vst [vmem:[#allocation2 + $0x60] sm:$0xf] %v847_v45  ;;  %849 = vst.msk [vmem:[#allocation2 + $0x64] sm:$0xf] %vm226_vm0, %v609_v47  ;;  %v623_v53 = vshll.u32 %v458_v44, 16  ;;  %v1329_v54 = vrot.slane %v4727_v16, 1  ;;  %v1146_v63 = vor.u32 %v1145_v46, %v1141_v29 }
  0x48   : > { %1290 = vrot.lane.b32.xlu1 %v4714_v5, %s4498_s25  ;;  %1605 = vrot.lane.b32.xlu0 %v4749_v39, %s4502_s29  ;;  %v614_v55 = vrot.slane %v612_v51, 7  ;;  %v615_v56 = vshll.u32 %v457_v38, 16  ;;  %v622_v57 = vrot.slane %v620_v52, 7  ;;  %v4380_v62 = vld [vmem:[%s6336_s1 + $0x10] ss:$0 sps:$4 sm:$0x33]  }
  0x49   : > { %v1150_v0 = vrot.slane %v1148_v49, 1  ;;  %v266_v6 = vld [vmem:[#allocation2 + $0x78] sm:$0x1]  ;;  %v459_v8 = vld [vmem:[%s4583_s23 + $0x48] sm:$0xf]  ;;  %v1330_v10 = vrot.slane %v4738_v27, 1 }
  0x4a   : > { %v850_v60 = vld [vmem:[#allocation2 + $0x68] sm:$0x1]  ;;  %v618_v4 = vrot.slane %v614_v55, 4  ;;  %v625_v7 = vor.u32 %v623_v53, %v622_v57  ;;  %v460_v9 = vld [vmem:[%s4583_s23 + $0x4c] sm:$0xf]  ;;  %v617_v11 = vor.u32 %v615_v56, %v614_v55  ;;  %v314_v12 = vsel %vm4563_vm5, 0, %v313_v58 }
  0x4b   : > { %v851_v3 = vsel %vm4548_vm3, %v610_v50, %v850_v60  ;;  %vm6341_vm11 = vcmask 1041408   ;;  %v1155_v13 = vshll.u32 %v4770_v59, 16  ;;  %315 = vst [vmem:[#allocation2 + $0x74] sm:$0x1] %v314_v12  ;;  %v4795_v17 = vsel %vm1091_vm7, %v1146_v63, %v1150_v0  ;;  %v316_v36 = vld [vmem:[#allocation2 + $0x80] sm:$0x1] }
  0x4c   : > { %1371 = vrot.lane.b32.xlu1 %v4749_v39, %s4497_s24  ;;  %1369 = vrot.lane.b32.xlu0 %v4685_v28, %s4497_s24  ;;  %852 = vst [vmem:[#allocation2 + $0x68] sm:$0x1] %v851_v3  ;;  %v4786_v28 = vld [vmem:[#allocation2 + $0x44] ss:$0 sps:$4 sm:$0x11]   ;;  %v626_v15 = vsel %vm4602_vm10, %v618_v4, %v625_v7  ;;  %v267_v19 = vsel %vm4548_vm3, 0, %v266_v6  ;;  %v4814_v34 = vsel %vm1316_vm6, %v1329_v54, %v1330_v10 }
  0x4d   : > { %4341 = vmatprep.subr.msk.bf16.mxu0 %vm6341_vm11, %v4380_v62  ;;  %v853_v18 = vld [vmem:[#allocation2 + $0x6c] sm:$0xf]  ;;  %856 = vst.msk [vmem:[#allocation2 + $0x70] sm:$0xf] %vm226_vm0, %v626_v15  ;;  %v629_v20 = vshrl.u32 %v459_v8, 16  ;;  %v637_v21 = vshrl.u32 %v460_v9, 16 }
  0x4e   : > { %268 = vst [vmem:[#allocation2 + $0x78] sm:$0x1] %v267_v19  ;;  %v632_v22 = vshll.u32 %v459_v8, 16  ;;  %v1153_v24 = vshrl.u32 %v4770_v59, 16  ;;  %v1157_v27 = vrot.slane %v1155_v13, 1  ;;  %v627_v30 = vrot.slane %v622_v57, 4 }
  0x4f   : > { %v631_v25 = vrot.slane %v629_v20, 7  ;;  %v4806_v26 = vrot.slane %v637_v21, 7  ;;  %v640_v31 = vshll.u32 %v460_v9, 16  ;;  %v1961_v32 = vsel %vm6341_vm11, %v4380_v62, 0  ;;  %v4384_v40 = vld [vmem:[%s6336_s1] sm:$0xff]   ;;  %v4845_v57 = vld [vmem:[#allocation2 + $0x48] sm:$0xff]  }
  0x50   : > { %1408 = vrot.lane.b32.xlu1 %v4727_v16, %s4499_s26  ;;  %1406 = vrot.lane.b32.xlu0 %v4663_v61, %s4499_s26  ;;  %v854_v61 = vsel %vm4594_vm9, %v617_v11, %v853_v18  ;;  %v1160_v35 = vshll.u32 %v4786_v28, 16  ;;  %v317_v44 = vsel %vm4563_vm5, 0, %v316_v36  ;;  %v269_v45 = vld [vmem:[#allocation2 + $0x84] sm:$0x1]  ;;  %v1158_v29 = vor.u32 %v1157_v27, %v1153_v24  ;;  %v461_v50 = vld [vmem:[%s4583_s23 + $0x50] sm:$0xf] }
  0x51   : > { %855 = vst [vmem:[#allocation2 + $0x6c] sm:$0xf] %v854_v61  ;;  %v635_v14 = vrot.slane %v631_v25, 4  ;;  %4266 = vmatpush3.bf16.msra.mxu0 %v1961_v32  ;;  %v634_v37 = vor.u32 %v632_v22, %v631_v25  ;;  %v642_v38 = vor.u32 %v640_v31, %v4806_v26  ;;  %318 = vst [vmem:[#allocation2 + $0x80] sm:$0x1] %v317_v44  ;;  %v270_v49 = vsel %vm4548_vm3, 0, %v269_v45 }
  0x52   : > { %4267 = vmatprep.subr.bf16.mxu0 %v4382_v23  ;;  %v857_v41 = vld [vmem:[#allocation2 + $0x74] sm:$0x1]  ;;  %v1162_v46 = vrot.slane %v1160_v35, 1  ;;  %271 = vst [vmem:[#allocation2 + $0x84] sm:$0x1] %v270_v49  ;;  %v644_v58 = vrot.slane %v4806_v26, 4 }
  0x53   : > { %v643_v42 = vsel %vm4602_vm10, %v635_v14, %v642_v38  ;;  %v462_v51 = vld [vmem:[%s4583_s23 + $0x54] sm:$0xf]  ;;  %v319_v54 = vld [vmem:[#allocation2 + $0x8c] sm:$0x1]  ;;  %v272_v55 = vld [vmem:[#allocation2 + $0x90] sm:$0x1] }
  0x54   : > { %1455 = vrot.lane.b32.xlu1 %v4795_v17, %s4503_s30  ;;  %1453 = vrot.lane.b32.xlu0 %v4714_v5, %s4503_s30  ;;  %v858_v5 = vsel %vm4548_vm3, %v627_v30, %v857_v41  ;;  %863 = vst.msk [vmem:[#allocation2 + $0x7c] sm:$0xf] %vm226_vm0, %v643_v42  ;;  %v654_v52 = vshrl.u32 %v462_v51, 16  ;;  %v657_v53 = vshll.u32 %v462_v51, 16  ;;  %v4843_v56 = vsel %vm1091_vm7, %v1158_v29, %v1162_v46  ;;  %v463_v63 = vld [vmem:[%s4583_s23 + $0x58] sm:$0xf] }
  0x55   : > { %859 = vst [vmem:[#allocation2 + $0x74] sm:$0x1] %v858_v5  ;;  %v860_v47 = vld [vmem:[#allocation2 + $0x78] sm:$0xf]  ;;  %4268 = vmatpush3.bf16.msra.mxu0 %v4382_v23  ;;  %v649_v62 = vshll.u32 %v461_v50, 16  ;;  %v320_v3 = vsel %vm4563_vm5, 0, %v319_v54 }
  0x56   : > { %v861_v48 = vsel %vm4594_vm9, %v634_v37, %v860_v47  ;;  %4269 = vmatprep.subr.bf16.mxu0 %v4384_v40  ;;  %v656_v0 = vrot.slane %v654_v52, 7  ;;  %v273_v4 = vsel %vm4548_vm3, 0, %v272_v55  ;;  %v464_v6 = vld [vmem:[%s4583_s23 + $0x5c] sm:$0xf]  ;;  %321 = vst [vmem:[#allocation2 + $0x8c] sm:$0x1] %v320_v3 }
  0x57   : > { %862 = vst [vmem:[#allocation2 + $0x78] sm:$0xf] %v861_v48  ;;  %274 = vst [vmem:[#allocation2 + $0x90] sm:$0x1] %v273_v4  ;;  %v666_v8 = vshll.u32 %v463_v63, 16  ;;  %v1332_v9 = vrot.slane %v4770_v59, 1 }
  0x58   : > { %1490 = vrot.lane.b32.xlu1 %v4814_v34, %s4501_s28  ;;  %1488 = vrot.lane.b32.xlu0 %v4749_v39, %s4501_s28  ;;  %v646_v39 = vshrl.u32 %v461_v50, 16  ;;  %v1333_v10 = vrot.slane %v4786_v28, 1  ;;  %v659_v11 = vor.u32 %v657_v53, %v656_v0  ;;  %v864_v12 = vld [vmem:[#allocation2 + $0x80] sm:$0x1]  ;;  %v671_v18 = vshrl.u32 %v464_v6, 16 }
  0x59   : > { %4270 = vmatpush3.bf16.msra.mxu0 %v4384_v40  ;;  %v1167_v19 = vshll.u32 %v4845_v57, 16  ;;  %v865_v20 = vsel %vm4548_vm3, %v644_v58, %v864_v12  ;;  %v661_v22 = vrot.slane %v656_v0, 4  ;;  %v322_v23 = vld [vmem:[#allocation2 + $0x98] sm:$0x1]  ;;  %v867_v28 = vld [vmem:[#allocation2 + $0x84] sm:$0xf] }
  0x5a   : > { %v648_v60 = vrot.slane %v646_v39, 7  ;;  %866 = vst [vmem:[#allocation2 + $0x80] sm:$0x1] %v865_v20  ;;  %v673_v25 = vrot.slane %v671_v18, 7  ;;  %v674_v26 = vshll.u32 %v464_v6, 16  ;;  %v323_v35 = vsel %vm4563_vm5, 0, %v322_v23 }
  0x5b   : > { %v4868_v27 = vld [vmem:[#allocation2 + $0x50] ss:$0 sps:$4 sm:$0x11]   ;;  %v275_v30 = vld [vmem:[#allocation2 + $0x9c] sm:$0x1]  ;;  %v4879_v37 = vsel %vm1316_vm6, %v1332_v9, %v1333_v10  ;;  %v1169_v38 = vrot.slane %v1167_v19, 1 }
  0x5c   : > { %1527 = vrot.lane.b32.xlu1 %v4770_v59, %s4500_s27  ;;  %1525 = vrot.lane.b32.xlu0 %v4727_v16, %s4500_s27  ;;  %v663_v16 = vshrl.u32 %v463_v63, 16  ;;  %v652_v7 = vrot.slane %v648_v60, 4  ;;  %v651_v13 = vor.u32 %v649_v62, %v648_v60  ;;  %v676_v32 = vor.u32 %v674_v26, %v673_v25  ;;  %v465_v14 = vld [vmem:[%s4583_s23 + $0x60] sm:$0xf]  ;;  %v466_v36 = vld [vmem:[%s4583_s23 + $0x64] sm:$0xf] }
  0x5d   : > { %v871_v40 = vld [vmem:[#allocation2 + $0x8c] sm:$0x1]  ;;  %324 = vst [vmem:[#allocation2 + $0x98] sm:$0x1] %v323_v35  ;;  %v276_v45 = vsel %vm4548_vm3, 0, %v275_v30  ;;  %v1172_v47 = vshll.u32 %v4868_v27, 16 }
  0x5e   : > { %v665_v15 = vrot.slane %v663_v16, 7  ;;  %v660_v21 = vsel %vm4602_vm10, %v652_v7, %v659_v11  ;;  %v868_v31 = vsel %vm4594_vm9, %v651_v13, %v867_v28  ;;  %v874_v41 = vld [vmem:[#allocation2 + $0x90] sm:$0xf]  ;;  %v872_v5 = vsel %vm4548_vm3, %v661_v22, %v871_v40  ;;  %v325_v29 = vld [vmem:[#allocation2 + $0xa4] sm:$0x1]  ;;  %v4904_v0 = vld [vmem:[#allocation2 + $0x54] sm:$0xff]  }
  0x5f   : > { %870 = vst.msk [vmem:[#allocation2 + $0x88] sm:$0xf] %vm226_vm0, %v660_v21  ;;  %869 = vst [vmem:[#allocation2 + $0x84] sm:$0xf] %v868_v31  ;;  %v278_v46 = vld [vmem:[#allocation2 + $0xa8] sm:$0x1] }
  0x60   : > { %1574 = vrot.lane.b32.xlu1 %v4843_v56, %s4504_s6  ;;  %1572 = vrot.lane.b32.xlu0 %v4795_v17, %s4504_s6  ;;  %v668_v24 = vor.u32 %v666_v8, %v665_v15  ;;  %v669_v61 = vrot.slane %v665_v15, 4  ;;  %873 = vst [vmem:[#allocation2 + $0x8c] sm:$0x1] %v872_v5  ;;  %v678_v48 = vrot.slane %v673_v25, 4  ;;  %277 = vst [vmem:[#allocation2 + $0x9c] sm:$0x1] %v276_v45 }
  0x61   : > { %v680_v49 = vshrl.u32 %v465_v14, 16  ;;  %v688_v50 = vshrl.u32 %v466_v36, 16  ;;  %v467_v51 = vld [vmem:[%s4583_s23 + $0x68] sm:$0xf]  ;;  %v691_v39 = vshll.u32 %v466_v36, 16  ;;  %v326_v52 = vsel %vm4563_vm5, 0, %v325_v29 }
  0x62   : > { %v677_v42 = vsel %vm4602_vm10, %v669_v61, %v676_v32  ;;  %v875_v44 = vsel %vm4594_vm9, %v668_v24, %v874_v41  ;;  %v279_v53 = vsel %vm4548_vm3, 0, %v278_v46  ;;  %v697_v54 = vshrl.u32 %v467_v51, 16  ;;  %327 = vst [vmem:[#allocation2 + $0xa4] sm:$0x1] %v326_v52  ;;  %v468_v60 = vld [vmem:[%s4583_s23 + $0x6c] sm:$0xf] }
  0x63   : > { %876 = vst [vmem:[#allocation2 + $0x90] sm:$0xf] %v875_v44  ;;  %877 = vst.msk [vmem:[#allocation2 + $0x94] sm:$0xf] %vm226_vm0, %v677_v42  ;;  %v682_v55 = vrot.slane %v680_v49, 7  ;;  %v683_v58 = vshll.u32 %v465_v14, 16 }
  0x64   : > { %1292 = vrot.lane.b32.xlu1 %v4795_v17, %s4498_s25  ;;  %1607 = vrot.lane.b32.xlu0 %v4814_v34, %s4502_s29  ;;  %v1165_v17 = vshrl.u32 %v4845_v57, 16  ;;  %280 = vst [vmem:[#allocation2 + $0xa8] sm:$0x1] %v279_v53  ;;  %v690_v62 = vrot.slane %v688_v50, 7  ;;  %v1174_v63 = vrot.slane %v1172_v47, 1  ;;  %v699_v4 = vrot.slane %v697_v54, 7 }
  0x65   : > { %v686_v3 = vrot.slane %v682_v55, 4  ;;  %v878_v16 = vld [vmem:[#allocation2 + $0x98] sm:$0x1]  ;;  %v700_v8 = vshll.u32 %v467_v51, 16  ;;  %v705_v9 = vshrl.u32 %v468_v60, 16  ;;  %v685_v11 = vor.u32 %v683_v58, %v682_v55 }
  0x66   : > { %v1170_v6 = vor.u32 %v1169_v38, %v1165_v17  ;;  %v693_v7 = vor.u32 %v691_v39, %v690_v62  ;;  %v879_v10 = vsel %vm4548_vm3, %v678_v48, %v878_v16  ;;  %v1335_v12 = vrot.slane %v4845_v57, 1  ;;  %v4911_v13 = vld [vmem:[#allocation2 + $0x5c] ss:$0 sps:$4 sm:$0x11]   ;;  %v328_v28 = vld [vmem:[#allocation2 + $0xb0] sm:$0x1] }
  0x67   : > { %880 = vst [vmem:[#allocation2 + $0x98] sm:$0x1] %v879_v10  ;;  %v695_v18 = vrot.slane %v690_v62, 4  ;;  %v1179_v20 = vshll.u32 %v4904_v0, 16  ;;  %v881_v21 = vld [vmem:[#allocation2 + $0x9c] sm:$0xf]  ;;  %v702_v22 = vor.u32 %v700_v8, %v699_v4 }
  0x68   : > { %1294 = vrot.lane.b32.xlu1 %v4843_v56, %s4498_s25  ;;  %1609 = vrot.lane.b32.xlu0 %v4879_v37, %s4502_s29  ;;  %v694_v15 = vsel %vm4602_vm10, %v686_v3, %v693_v7  ;;  %v4922_v19 = vsel %vm1091_vm7, %v1170_v6, %v1174_v63  ;;  %v707_v23 = vrot.slane %v705_v9, 7  ;;  %v882_v24 = vsel %vm4594_vm9, %v685_v11, %v881_v21  ;;  %v281_v31 = vld [vmem:[#allocation2 + $0xb4] sm:$0x1]  ;;  %v469_v14 = vld [vmem:[%s4583_s23 + $0x70] sm:$0xf]  ;;  %v4964_v63 = vld [vmem:[#allocation2 + $0x60] sm:$0xff]  }
  0x69   : > { %884 = vst.msk [vmem:[#allocation2 + $0xa0] sm:$0xf] %vm226_vm0, %v694_v15  ;;  %v885_v61 = vld [vmem:[#allocation2 + $0xa4] sm:$0x1]  ;;  %v703_v25 = vrot.slane %v699_v4, 4  ;;  %v708_v26 = vshll.u32 %v468_v60, 16 }
  0x6a   : > { %v1184_v30 = vshll.u32 %v4911_v13, 16  ;;  %883 = vst [vmem:[#allocation2 + $0x9c] sm:$0xf] %v882_v24  ;;  %v886_v32 = vsel %vm4548_vm3, %v695_v18, %v885_v61  ;;  %v470_v36 = vld [vmem:[%s4583_s23 + $0x74] sm:$0xf]  ;;  %v1181_v38 = vrot.slane %v1179_v20, 1 }
  0x6b   : > { %v710_v35 = vor.u32 %v708_v26, %v707_v23  ;;  %887 = vst [vmem:[#allocation2 + $0xa4] sm:$0x1] %v886_v32  ;;  %v329_v41 = vsel %vm4563_vm5, 0, %v328_v28  ;;  %v331_v5 = vld [vmem:[#allocation2 + $0xbc] sm:$0x1]  ;;  %v714_v44 = vshrl.u32 %v469_v14, 16 }
  0x6c   : > { %1375 = vrot.lane.b32.xlu1 %v4879_v37, %s4497_s24  ;;  %1373 = vrot.lane.b32.xlu0 %v4814_v34, %s4497_s24  ;;  %v1336_v34 = vrot.slane %v4868_v27, 1  ;;  %v888_v27 = vld [vmem:[#allocation2 + $0xa8] sm:$0xf]  ;;  %330 = vst [vmem:[#allocation2 + $0xb0] sm:$0x1] %v329_v41  ;;  %v722_v45 = vshrl.u32 %v470_v36, 16 }
  0x6d   : > { %v889_v40 = vsel %vm4594_vm9, %v702_v22, %v888_v27  ;;  %v711_v42 = vsel %vm4602_vm10, %v703_v25, %v710_v35  ;;  %v1186_v29 = vrot.slane %v1184_v30, 1  ;;  %v717_v46 = vshll.u32 %v469_v14, 16  ;;  %v284_v52 = vld [vmem:[#allocation2 + $0xc0] sm:$0x1]  ;;  %v471_v6 = vld [vmem:[%s4583_s23 + $0x78] sm:$0xf] }
  0x6e   : > { %v4938_v17 = vsel %vm1316_vm6, %v1335_v12, %v1336_v34  ;;  %890 = vst [vmem:[#allocation2 + $0xa8] sm:$0xf] %v889_v40  ;;  %891 = vst.msk [vmem:[#allocation2 + $0xac] sm:$0xf] %vm226_vm0, %v711_v42  ;;  %v725_v47 = vshll.u32 %v470_v36, 16  ;;  %v332_v48 = vsel %vm4563_vm5, 0, %v331_v5 }
  0x6f   : > { %v716_v50 = vrot.slane %v714_v44, 7  ;;  %v724_v51 = vrot.slane %v722_v45, 7  ;;  %333 = vst [vmem:[#allocation2 + $0xbc] sm:$0x1] %v332_v48  ;;  %v712_v39 = vrot.slane %v707_v23, 4  ;;  %v1338_v7 = vrot.slane %v4904_v0, 1 }
  0x70   : > { %1412 = vrot.lane.b32.xlu1 %v4845_v57, %s4499_s26  ;;  %1410 = vrot.lane.b32.xlu0 %v4770_v59, %s4499_s26  ;;  %v1177_v59 = vshrl.u32 %v4904_v0, 16  ;;  %v1339_v8 = vrot.slane %v4911_v13, 1  ;;  %v472_v11 = vld [vmem:[%s4583_s23 + $0x7c] sm:$0xf]  ;;  %v334_v12 = vld [vmem:[#allocation2 + $0xc8] sm:$0x1] }
  0x71   : > { %v720_v53 = vrot.slane %v716_v50, 4  ;;  %v727_v54 = vor.u32 %v725_v47, %v724_v51  ;;  %v729_v62 = vrot.slane %v724_v51, 4  ;;  %v1191_v15 = vshll.u32 %v4964_v63, 16  ;;  %v4377_v21 = vld [vmem:[#allocation2 + $0x68] ss:$0 sps:$4 sm:$0x11]  }
  0x72   : > { %v1182_v49 = vor.u32 %v1181_v38, %v1177_v59  ;;  %v731_v34 = vshrl.u32 %v471_v6, 16  ;;  %v734_v18 = vshll.u32 %v471_v6, 16  ;;  %v739_v20 = vshrl.u32 %v472_v11, 16  ;;  %v5005_v41 = vld [vmem:[#allocation2 + $0x6c] sm:$0xff]  }
  0x73   : > { %v892_v58 = vld [vmem:[#allocation2 + $0xb0] sm:$0x1]  ;;  %v728_v60 = vsel %vm4602_vm10, %v720_v53, %v727_v54  ;;  %v742_v22 = vshll.u32 %v472_v11, 16  ;;  %v335_v13 = vsel %vm4563_vm5, 0, %v334_v12  ;;  %v1340_v24 = vsel %vm1316_vm6, %v1338_v7, %v1339_v8  ;;  %v5028_v54 = vld [vmem:[#allocation2 + $0x78] sm:$0xff]  }
  0x74   : > { %1459 = vrot.lane.b32.xlu1 %v4922_v19, %s4503_s30  ;;  %1457 = vrot.lane.b32.xlu0 %v4843_v56, %s4503_s30  ;;  %v282_v56 = vsel %vm4548_vm3, 0, %v281_v31  ;;  %v4960_v55 = vsel %vm1091_vm7, %v1182_v49, %v1186_v29  ;;  %v893_v3 = vsel %vm4548_vm3, %v712_v39, %v892_v58  ;;  %898 = vst.msk [vmem:[#allocation2 + $0xb8] sm:$0xf] %vm226_vm0, %v728_v60  ;;  %v733_v23 = vrot.slane %v731_v34, 7 }
  0x75   : > { %283 = vst [vmem:[#allocation2 + $0xb4] sm:$0x1] %v282_v56  ;;  %894 = vst [vmem:[#allocation2 + $0xb0] sm:$0x1] %v893_v3  ;;  %v741_v28 = vrot.slane %v739_v20, 7  ;;  %v1189_v59 = vshrl.u32 %v4964_v63, 16 }
  0x76   : > { %v899_v16 = vld [vmem:[#allocation2 + $0xbc] sm:$0x1]  ;;  %336 = vst [vmem:[#allocation2 + $0xc8] sm:$0x1] %v335_v13  ;;  %v736_v61 = vor.u32 %v734_v18, %v733_v23  ;;  %v737_v25 = vrot.slane %v733_v23, 4  ;;  %v1193_v32 = vrot.slane %v1191_v15, 1 }
  0x77   : > { %v900_v10 = vsel %vm4548_vm3, %v729_v62, %v899_v16  ;;  %v744_v26 = vor.u32 %v742_v22, %v741_v28  ;;  %v746_v31 = vrot.slane %v741_v28, 4  ;;  %v1196_v35 = vshll.u32 %v4377_v21, 16  ;;  %v4379_v44 = vld [vmem:[#allocation2 + $0x74] ss:$0 sps:$4 sm:$0x11]   ;;  %v5042_v15 = vld [vmem:[#allocation2 + $0x84] sm:$0xff]  }
  0x78   : > { %1494 = vrot.lane.b32.xlu1 %v4938_v17, %s4501_s28  ;;  %1492 = vrot.lane.b32.xlu0 %v4879_v37, %s4501_s28  ;;  %v719_v37 = vor.u32 %v717_v46, %v716_v50  ;;  %901 = vst [vmem:[#allocation2 + $0xbc] sm:$0x1] %v900_v10  ;;  %v1194_v38 = vor.u32 %v1193_v32, %v1189_v59  ;;  %v1341_v42 = vrot.slane %v4964_v63, 1  ;;  %v1342_v56 = vrot.slane %v4377_v21, 1  ;;  %v4438_v18 = vld [vmem:[#allocation2] sm:$0xff]   ;;  %v4439_v22 = vld [vmem:[#allocation2 + $0xc] sm:$0xff]  }
  0x79   : > { %v1198_v40 = vrot.slane %v1196_v35, 1  ;;  %v1203_v45 = vshll.u32 %v5005_v41, 16  ;;  %v1201_v29 = vshrl.u32 %v5005_v41, 16  ;;  %v1208_v47 = vshll.u32 %v4379_v44, 16 }
  0x7a   : > { %v1344_v58 = vrot.slane %v5005_v41, 1  ;;  %v4383_v62 = vld [vmem:[#allocation2 + $0x80] ss:$0 sps:$4 sm:$0x11]   ;;  %v1215_v3 = vshll.u32 %v5028_v54, 16  ;;  %v1213_v16 = vshrl.u32 %v5028_v54, 16 }
  0x7b   : > { %v1199_v5 = vsel %vm1091_vm7, %v1194_v38, %v1198_v40  ;;  %v1205_v46 = vrot.slane %v1203_v45, 1  ;;  %v1210_v51 = vrot.slane %v1208_v47, 1  ;;  %v1220_v8 = vshll.u32 %v4383_v62, 16 }
  0x7c   : > { %1531 = vrot.lane.b32.xlu1 %v4904_v0, %s4500_s27  ;;  %1529 = vrot.lane.b32.xlu0 %v4845_v57, %s4500_s27  ;;  %v285_v57 = vsel %vm4548_vm3, 0, %v284_v52  ;;  %v895_v4 = vld [vmem:[#allocation2 + $0xb4] sm:$0xf]  ;;  %v1217_v7 = vrot.slane %v1215_v3, 1  ;;  %vm1635_vm12 = vcmask 31744   ;;  %vm1668_vm13 = vcmask 64512  }
  0x7d   : > { %286 = vst [vmem:[#allocation2 + $0xc0] sm:$0x1] %v285_v57  ;;  %v896_v9 = vsel %vm4594_vm9, %v719_v37, %v895_v4  ;;  %v906_v14 = vld [vmem:[#allocation2 + $0xc8] sm:$0x1]  ;;  %v1206_v50 = vor.u32 %v1205_v46, %v1201_v29  ;;  %v1345_v37 = vrot.slane %v4379_v44, 1  ;;  %v1222_v12 = vrot.slane %v1220_v8, 1 }
  0x7e   : > { %897 = vst [vmem:[#allocation2 + $0xb4] sm:$0xf] %v896_v9  ;;  %v907_v36 = vsel %vm4548_vm3, %v746_v31, %v906_v14  ;;  %v1218_v11 = vor.u32 %v1217_v7, %v1213_v16  ;;  %vm1701_vm14 = vcmask 97280   ;;  %vm1734_vm15 = vcmask 130048  }
  0x7f   : > { %908 = vst [vmem:[#allocation2 + $0xc8] sm:$0x1] %v907_v36  ;;  %v1211_v52 = vsel %vm1091_vm7, %v1206_v50, %v1210_v51  ;;  %v1346_v4 = vsel %vm1316_vm6, %v1344_v58, %v1345_v37  ;;  %v1347_v23 = vrot.slane %v5028_v54, 1  ;;  %v1348_v28 = vrot.slane %v4383_v62, 1  ;;  %v5083_v58 = vld [vmem:[#allocation2 + $0x90] sm:$0xff]  }
  0x80   : > { %1578 = vrot.lane.b32.xlu1 %v4960_v55, %s4504_s6  ;;  %1576 = vrot.lane.b32.xlu0 %v4922_v19, %s4504_s6  ;;  %vm1767_vm1 = vcmask 162816   ;;  %vm1800_vm2 = vcmask 195584   ;;  %v1225_v36 = vshrl.u32 %v5042_v15, 16  ;;  %vm6343_vm4 = vcmask 261120  }
  0x81   : > { %v1349_v14 = vsel %vm1316_vm6, %v1347_v23, %v1348_v28  ;;  %vm1833_vm8 = vcmask 228352   ;;  %vm6342_vm11 = vcmask 293888   ;;  %v1237_v8 = vshrl.u32 %v5083_v58, 16  ;;  %v4440_v28 = vld [vmem:[#allocation2 + $0x18] sm:$0xff]  }
  0x84   : > { %1296 = vrot.lane.b32.xlu1 %v4922_v19, %s4498_s25  ;;  %1611 = vrot.lane.b32.xlu0 %v4938_v17, %s4502_s29  ;;  %v902_v27 = vld [vmem:[#allocation2 + $0xc0] sm:$0xf]  ;;  %v745_v19 = vsel %vm4602_vm10, %v737_v25, %v744_v26  ;;  %v4386_v25 = vld [vmem:[#allocation2 + $0x8c] ss:$0 sps:$4 sm:$0x11]   ;;  %v1227_v26 = vshll.u32 %v5042_v15, 16 }
  0x85   : > { %v903_v30 = vsel %vm4594_vm9, %v736_v61, %v902_v27  ;;  %905 = vst.msk [vmem:[#allocation2 + $0xc4] sm:$0xf] %vm226_vm0, %v745_v19  ;;  %v1223_v61 = vsel %vm1091_vm7, %v1218_v11, %v1222_v12  ;;  %v1351_v62 = vrot.slane %v4386_v25, 1 }
  0x86   : > { %904 = vst [vmem:[#allocation2 + $0xc0] sm:$0xf] %v903_v30 }
  0x88   : > { %1298 = vrot.lane.b32.xlu1 %v4960_v55, %s4498_s25  ;;  %1613 = vrot.lane.b32.xlu0 %v1340_v24, %s4502_s29 }
  0x8c   : > { %1379 = vrot.lane.b32.xlu1 %v1340_v24, %s4497_s24  ;;  %1377 = vrot.lane.b32.xlu0 %v4938_v17, %s4497_s24  ;;  %v1343_v17 = vsel %vm1316_vm6, %v1341_v42, %v1342_v56  ;;  %v1232_v42 = vshll.u32 %v4386_v25, 16  ;;  %v4390_v25 = vld [vmem:[#allocation2 + $0xa4] ss:$0 sps:$4 sm:$0x11]  }
  0x8d   : > { %v1366_v48 = vpop.permute.xlu1 %1365 }
  0x90   : > { %1416 = vrot.lane.b32.xlu1 %v4964_v63, %s4499_s26  ;;  %1414 = vrot.lane.b32.xlu0 %v4904_v0, %s4499_s26 }
  0x92   : > { %v1285_v49 = vpop.permute.xlu0 %1284 }
  0x93   : > { %v1637_v20 = vsel %vm1635_vm12, %v4438_v18, %v1285_v49 }
  0x94   : > { %1463 = vrot.lane.b32.xlu1 %v1199_v5, %s4503_s30  ;;  %1461 = vrot.lane.b32.xlu0 %v4960_v55, %s4503_s30  ;;  %v1670_v27 = vsel %vm1668_vm13, %v1637_v20, %v1366_v48  ;;  %v1234_v48 = vrot.slane %v1232_v42, 1  ;;  %v5095_v20 = vld [vmem:[#allocation2 + $0x9c] sm:$0xff]  }
  0x98   : > { %1498 = vrot.lane.b32.xlu1 %v1343_v17, %s4501_s28  ;;  %1496 = vrot.lane.b32.xlu0 %v1340_v24, %s4501_s28 }
  0x9c   : > { %1535 = vrot.lane.b32.xlu1 %v5005_v41, %s4500_s27  ;;  %v1405_v39 = vpop.permute.xlu1 %1404  ;;  %1533 = vrot.lane.b32.xlu0 %v4964_v63, %s4500_s27 }
  0x9e   : > { %v1403_v53 = vpop.permute.xlu0 %1402 }
  0x9f   : > { %v1703_v30 = vsel %vm1701_vm14, %v1670_v27, %v1403_v53 }
  0xa0   : > { %1582 = vrot.lane.b32.xlu1 %v1211_v52, %s4504_s6  ;;  %1580 = vrot.lane.b32.xlu0 %v1199_v5, %s4504_s6 }
  0xa2   : > { %v5030_v55 = vpop.permute.xlu1 %1523  ;;  %v1522_v60 = vpop.permute.xlu0 %1521 }
  0xa4   : > { %1300 = vrot.lane.b32.xlu1 %v1199_v5, %s4498_s25  ;;  %1615 = vrot.lane.b32.xlu0 %v1343_v17, %s4502_s29  ;;  %v1229_v5 = vrot.slane %v1227_v26, 1  ;;  %v1251_v26 = vshll.u32 %v5095_v20, 16 }
  0xa6   : > { %v1368_v57 = vpop.permute.xlu1 %1367  ;;  %v1485_v6 = vpop.permute.xlu0 %1484  ;;  %v1230_v47 = vor.u32 %v1229_v5, %v1225_v36  ;;  %v1256_v5 = vshll.u32 %v4390_v25, 16 }
  0xa8   : > { %1302 = vrot.lane.b32.xlu1 %v1211_v52, %s4498_s25  ;;  %1617 = vrot.lane.b32.xlu0 %v1346_v4, %s4502_s29 }
  0xaa   : > { %v1487_v9 = vpop.permute.xlu1 %1486  ;;  %v1604_v10 = vpop.permute.xlu0 %1603 }
  0xac   : > { %1383 = vrot.lane.b32.xlu1 %v1346_v4, %s4497_s24  ;;  %1381 = vrot.lane.b32.xlu0 %v1343_v17, %s4497_s24 }
  0xae   : > { %v1452_v34 = vpop.permute.xlu1 %1451  ;;  %v1287_v21 = vpop.permute.xlu0 %1286 }
  0xaf   : > { %v1639_v13 = vsel %vm1635_vm12, %v4439_v22, %v1287_v21 }
  0xb0   : > { %1420 = vrot.lane.b32.xlu1 %v5028_v54, %s4499_s26  ;;  %v1672_v24 = vsel %vm1668_vm13, %v1639_v13, %v1368_v57  ;;  %1418 = vrot.lane.b32.xlu0 %v5005_v41, %s4499_s26  ;;  %v4388_v57 = vld [vmem:[#allocation2 + $0x98] ss:$0 sps:$4 sm:$0x11]   ;;  %v1353_v13 = vrot.slane %v5083_v58, 1 }
  0xb1   : > { %v1705_v59 = vsel %vm1701_vm14, %v1672_v24, %v1405_v39  ;;  %v1354_v23 = vrot.slane %v4388_v57, 1 }
  0xb2   : > { %v1571_v19 = vpop.permute.xlu1 %1570  ;;  %v1738_v31 = vsel %vm1734_vm15, %v1705_v59, %v1452_v34  ;;  %v1450_v32 = vpop.permute.xlu0 %1449 }
  0xb3   : > { %v1736_v35 = vsel %vm1734_vm15, %v1703_v30, %v1450_v32  ;;  %v1771_v38 = vsel %vm1767_vm1, %v1738_v31, %v1487_v9 }
  0xb4   : > { %1467 = vrot.lane.b32.xlu1 %v1223_v61, %s4503_s30  ;;  %v1769_v40 = vsel %vm1767_vm1, %v1736_v35, %v1485_v6  ;;  %1465 = vrot.lane.b32.xlu0 %v1211_v52, %s4503_s30  ;;  %v1804_v17 = vsel %vm1800_vm2, %v1771_v38, %v5030_v55  ;;  %v1235_v52 = vsel %vm1091_vm7, %v1230_v47, %v1234_v48  ;;  %v1249_v38 = vshrl.u32 %v5095_v20, 16 }
  0xb5   : > { %v1802_v44 = vsel %vm1800_vm2, %v1769_v40, %v1522_v60  ;;  %v1837_v50 = vsel %vm1833_vm8, %v1804_v17, %v1571_v19  ;;  %v1350_v60 = vrot.slane %v5042_v15, 1  ;;  %v4441_v19 = vld [vmem:[#allocation2 + $0x24] sm:$0xff]   ;;  %v1253_v40 = vrot.slane %v1251_v26, 1 }
  0xb6   : > { %v1289_v56 = vpop.permute.xlu1 %1288  ;;  %v1569_v45 = vpop.permute.xlu0 %1568 }
  0xb7   : > { %v1835_v29 = vsel %vm1833_vm8, %v1802_v44, %v1569_v45  ;;  %v1352_v16 = vsel %vm1316_vm6, %v1350_v60, %v1351_v62  ;;  %v1641_v24 = vsel %vm1635_vm12, %v4440_v28, %v1289_v56  ;;  %v5147_v28 = vld [vmem:[#allocation2 + $0xb4] sm:$0xff]  }
  0xb8   : > { %1502 = vrot.lane.b32.xlu1 %v1349_v14, %s4501_s28  ;;  %1500 = vrot.lane.b32.xlu0 %v1346_v4, %s4501_s28  ;;  %v1868_v46 = vsel %vm6343_vm4, %v1835_v29, %v1604_v10  ;;  %v1239_v4 = vshll.u32 %v5083_v58, 16  ;;  %v1244_v10 = vshll.u32 %v4388_v57, 16 }
  0xb9   : > { %4271 = vmatprep.mubr.msk.bf16.mxu0 %vm6342_vm11, %v1868_v46 }
  0xba   : > { %v1291_v49 = vpop.permute.xlu1 %1290  ;;  %v1606_v51 = vpop.permute.xlu0 %1605  ;;  %v1241_v9 = vrot.slane %v1239_v4, 1  ;;  %v1246_v18 = vrot.slane %v1244_v10, 1  ;;  %v1356_v4 = vrot.slane %v5095_v20, 1 }
  0xbb   : > { %v1870_v39 = vsel %vm6343_vm4, %v1837_v50, %v1606_v51  ;;  %v1643_v30 = vsel %vm1635_vm12, %v4441_v19, %v1291_v49  ;;  %v1254_v49 = vor.u32 %v1253_v40, %v1249_v38  ;;  %v1258_v50 = vrot.slane %v1256_v5, 1 }
  0xbc   : > { %1539 = vrot.lane.b32.xlu1 %v5042_v15, %s4500_s27  ;;  %1537 = vrot.lane.b32.xlu0 %v5028_v54, %s4500_s27  ;;  %v1242_v34 = vor.u32 %v1241_v9, %v1237_v8 }
  0xbd   : > { %4272 = vmatmul.mubr.msk.bf16.vlgmr.msra.gmra.mxu0 %vm6342_vm11, %v1870_v39 }
  0xbe   : > { %v1372_v53 = vpop.permute.xlu1 %1371  ;;  %v1370_v55 = vpop.permute.xlu0 %1369 }
  0xbf   : > { %v1674_v27 = vsel %vm1668_vm13, %v1641_v24, %v1370_v55  ;;  %v1676_v42 = vsel %vm1668_vm13, %v1643_v30, %v1372_v53  ;;  %v5156_v30 = vld [vmem:[#allocation2 + $0xbc] ss:$0 sps:$4 sm:$0x11]  }
  0xc0   : > { %1586 = vrot.lane.b32.xlu1 %v1235_v52, %s4504_s6  ;;  %1584 = vrot.lane.b32.xlu0 %v1223_v61, %s4504_s6 }
  0xc2   : > { %v1409_v37 = vpop.permute.xlu1 %1408  ;;  %v1407_v3 = vpop.permute.xlu0 %1406 }
  0xc3   : > { %v1707_v31 = vsel %vm1701_vm14, %v1674_v27, %v1407_v3  ;;  %v1709_v45 = vsel %vm1701_vm14, %v1676_v42, %v1409_v37  ;;  %v1259_v37 = vsel %vm1091_vm7, %v1254_v49, %v1258_v50  ;;  %v5135_v3 = vld [vmem:[#allocation2 + $0xa8] sm:$0xff]   ;;  %v4442_v27 = vld [vmem:[#allocation2 + $0x30] sm:$0xff]  }
  0xc4   : > { %1304 = vrot.lane.b32.xlu1 %v1223_v61, %s4498_s25  ;;  %1619 = vrot.lane.b32.xlu0 %v1349_v14, %s4502_s29  ;;  %v1247_v61 = vsel %vm1091_vm7, %v1242_v34, %v1246_v18  ;;  %v1263_v8 = vshll.u32 %v5135_v3, 16 }
  0xc6   : > { %v1456_v6 = vpop.permute.xlu1 %1455  ;;  %v1454_v7 = vpop.permute.xlu0 %1453  ;;  %v1265_v34 = vrot.slane %v1263_v8, 1 }
  0xc7   : > { %v1740_v35 = vsel %vm1734_vm15, %v1707_v31, %v1454_v7  ;;  %v1742_v46 = vsel %vm1734_vm15, %v1709_v45, %v1456_v6  ;;  %v1357_v6 = vrot.slane %v4390_v25, 1  ;;  %v4392_v7 = vld [vmem:[#allocation2 + $0xb0] ss:$0 sps:$4 sm:$0x11]   ;;  %v1359_v25 = vrot.slane %v5135_v3, 1 }
  0xc8   : > { %1306 = vrot.lane.b32.xlu1 %v1235_v52, %s4498_s25  ;;  %1621 = vrot.lane.b32.xlu0 %v1352_v16, %s4502_s29  ;;  %v1268_v18 = vshll.u32 %v4392_v7, 16  ;;  %v1360_v26 = vrot.slane %v4392_v7, 1  ;;  %v1275_v31 = vshll.u32 %v5147_v28, 16 }
  0xc9   : > { %v1358_v10 = vsel %vm1316_vm6, %v1356_v4, %v1357_v6  ;;  %v348_v6 = vld [vmem:[#allocation3 + $0x18] sm:$0x1] }
  0xca   : > { %v1491_v11 = vpop.permute.xlu1 %1490  ;;  %v1489_v12 = vpop.permute.xlu0 %1488  ;;  %v5165_v42 = vsel %vm1316_vm6, %v1359_v25, %v1360_v26  ;;  %v1277_v45 = vrot.slane %v1275_v31, 1  ;;  %v349_v7 = vsel %vm4548_vm3, 0, %v348_v6  ;;  %v4399_v6 = vld [vmem:[#allocation3] sm:$0xff]  }
  0xcb   : > { %v1773_v36 = vsel %vm1767_vm1, %v1740_v35, %v1489_v12  ;;  %v1775_v48 = vsel %vm1767_vm1, %v1742_v46, %v1491_v11  ;;  %v1261_v12 = vshrl.u32 %v5135_v3, 16  ;;  %350 = vst [vmem:[#allocation3 + $0x18] sm:$0x1] %v349_v7 }
  0xcc   : > { %1387 = vrot.lane.b32.xlu1 %v1352_v16, %s4497_s24  ;;  %1385 = vrot.lane.b32.xlu0 %v1349_v14, %s4497_s24  ;;  %v1355_v14 = vsel %vm1316_vm6, %v1353_v13, %v1354_v23  ;;  %v1270_v23 = vrot.slane %v1268_v18, 1  ;;  %v345_v18 = vld [vmem:[#allocation3 + $0xc] sm:$0x1] }
  0xcd   : > { %v1266_v13 = vor.u32 %v1265_v34, %v1261_v12  ;;  %v1362_v12 = vrot.slane %v5147_v28, 1  ;;  %v1363_v34 = vrot.slane %v5156_v30, 1 }
  0xce   : > { %v1528_v21 = vpop.permute.xlu1 %1527  ;;  %v1526_v22 = vpop.permute.xlu0 %1525 }
  0xcf   : > { %v1806_v56 = vsel %vm1800_vm2, %v1773_v36, %v1526_v22  ;;  %v1808_v51 = vsel %vm1800_vm2, %v1775_v48, %v1528_v21  ;;  %v1271_v19 = vsel %vm1091_vm7, %v1266_v13, %v1270_v23  ;;  %v396_v13 = vld [vmem:[#allocation3 + $0x20] sm:$0x1]  ;;  %v4396_v23 = vld [vmem:[#allocation2 + $0xc8] ss:$0 sps:$4 sm:$0x11]   ;;  %v1364_v26 = vsel %vm1316_vm6, %v1362_v12, %v1363_v34 }
  0xd0   : > { %1424 = vrot.lane.b32.xlu1 %v5083_v58, %s4499_s26  ;;  %1422 = vrot.lane.b32.xlu0 %v5042_v15, %s4499_s26 }
  0xd2   : > { %v1575_v59 = vpop.permute.xlu1 %1574  ;;  %v1573_v32 = vpop.permute.xlu0 %1572 }
  0xd3   : > { %v1839_v17 = vsel %vm1833_vm8, %v1806_v56, %v1573_v32 }
  0xd4   : > { %1471 = vrot.lane.b32.xlu1 %v1247_v61, %s4503_s30  ;;  %1469 = vrot.lane.b32.xlu0 %v1235_v52, %s4503_s30  ;;  %v1841_v52 = vsel %vm1833_vm8, %v1808_v51, %v1575_v59 }
  0xd6   : > { %v1293_v44 = vpop.permute.xlu1 %1292  ;;  %v1608_v29 = vpop.permute.xlu0 %1607 }
  0xd7   : > { %v1872_v47 = vsel %vm6343_vm4, %v1839_v17, %v1608_v29  ;;  %v1645_v59 = vsel %vm1635_vm12, %v4442_v27, %v1293_v44  ;;  %v1273_v44 = vshrl.u32 %v5147_v28, 16  ;;  %v1280_v17 = vshll.u32 %v5156_v30, 16 }
  0xd8   : > { %1506 = vrot.lane.b32.xlu1 %v1355_v14, %s4501_s28  ;;  %1504 = vrot.lane.b32.xlu0 %v1352_v16, %s4501_s28 }
  0xd9   : > { %4275 = vmatprep.mubr.msk.bf16.mxu0 %vm6342_vm11, %v1872_v47 }
  0xda   : > { %v1295_v39 = vpop.permute.xlu1 %1294  ;;  %v1610_v53 = vpop.permute.xlu0 %1609 }
  0xdb   : > { %v1874_v55 = vsel %vm6343_vm4, %v1841_v52, %v1610_v53  ;;  %v1278_v53 = vor.u32 %v1277_v45, %v1273_v44  ;;  %v1482_v45 = vrot.slane %v4396_v23, 1 }
  0xdc   : > { %1543 = vrot.lane.b32.xlu1 %v5095_v20, %s4500_s27  ;;  %1541 = vrot.lane.b32.xlu0 %v5083_v58, %s4500_s27 }
  0xdd   : > { %4276 = vmatmul.mubr.msk.bf16.gmra.mxu0 %vm6342_vm11, %v1874_v55  ;;  %v1282_v55 = vrot.slane %v1280_v17, 1  ;;  %v4444_v17 = vld [vmem:[#allocation2 + $0x48] sm:$0xff]  }
  0xde   : > { %v1376_v60 = vpop.permute.xlu1 %1375  ;;  %v1374_v62 = vpop.permute.xlu0 %1373 }
  0xdf   : > { %v1678_v32 = vsel %vm1668_vm13, %v1645_v59, %v1374_v62  ;;  %v393_v59 = vld [vmem:[#allocation3 + $0x14] sm:$0x1] }
  0xe0   : > { %1590 = vrot.lane.b32.xlu1 %v1259_v37, %s4504_s6  ;;  %1588 = vrot.lane.b32.xlu0 %v1247_v61, %s4504_s6 }
  0xe2   : > { %v1413_v57 = vpop.permute.xlu1 %1412  ;;  %v1411_v16 = vpop.permute.xlu0 %1410 }
  0xe3   : > { %v1711_v38 = vsel %vm1701_vm14, %v1678_v32, %v1411_v16  ;;  %v1283_v16 = vsel %vm1091_vm7, %v1278_v53, %v1282_v55  ;;  %v1445_v32 = vshll.u32 %v4396_v23, 16  ;;  %v2869_v23 = vshll.u32 %v4399_v6, 16 }
  0xe4   : > { %1308 = vrot.lane.b32.xlu1 %v1247_v61, %s4498_s25  ;;  %1623 = vrot.lane.b32.xlu0 %v1355_v14, %s4502_s29 }
  0xe6   : > { %v1460_v9 = vpop.permute.xlu1 %1459  ;;  %v1458_v11 = vpop.permute.xlu0 %1457 }
  0xe7   : > { %v1744_v5 = vsel %vm1734_vm15, %v1711_v38, %v1458_v11  ;;  %v1447_v38 = vrot.slane %v1445_v32, 1  ;;  %v2867_v32 = vshrl.u32 %v4399_v6, 16 }
  0xe8   : > { %1310 = vrot.lane.b32.xlu1 %v1259_v37, %s4498_s25  ;;  %1625 = vrot.lane.b32.xlu0 %v1358_v10, %s4502_s29 }
  0xea   : > { %v1495_v21 = vpop.permute.xlu1 %1494  ;;  %v1493_v22 = vpop.permute.xlu0 %1492 }
  0xeb   : > { %v1777_v56 = vsel %vm1767_vm1, %v1744_v5, %v1493_v22  ;;  %v346_v22 = vsel %vm4548_vm3, 0, %v345_v18 }
  0xec   : > { %1391 = vrot.lane.b32.xlu1 %v1358_v10, %s4497_s24  ;;  %1389 = vrot.lane.b32.xlu0 %v1355_v14, %s4497_s24  ;;  %v4443_v14 = vld [vmem:[#allocation2 + $0x3c] sm:$0xff]   ;;  %347 = vst [vmem:[#allocation3 + $0xc] sm:$0x1] %v346_v22 }
  0xed   : > { %v1647_v36 = vsel %vm1635_vm12, %v4443_v14, %v1295_v39 }
  0xee   : > { %v1532_v24 = vpop.permute.xlu1 %1531  ;;  %v1530_v61 = vpop.permute.xlu0 %1529  ;;  %v1680_v29 = vsel %vm1668_vm13, %v1647_v36, %v1376_v60 }
  0xef   : > { %v1810_v46 = vsel %vm1800_vm2, %v1777_v56, %v1530_v61  ;;  %v1713_v48 = vsel %vm1701_vm14, %v1680_v29, %v1413_v57  ;;  %v397_v61 = vsel %vm4563_vm5, 0, %v396_v13  ;;  %v4400_v13 = vld [vmem:[#allocation3 + $0x8] ss:$0 sps:$4 sm:$0x11]  }
  0xf0   : > { %1428 = vrot.lane.b32.xlu1 %v5135_v3, %s4499_s26  ;;  %1426 = vrot.lane.b32.xlu0 %v5095_v20, %s4499_s26  ;;  %v1746_v51 = vsel %vm1734_vm15, %v1713_v48, %v1460_v9  ;;  %398 = vst [vmem:[#allocation3 + $0x20] sm:$0x1] %v397_v61 }
  0xf1   : > { %v1779_v52 = vsel %vm1767_vm1, %v1746_v51, %v1495_v21 }
  0xf2   : > { %v1579_v35 = vpop.permute.xlu1 %1578  ;;  %v1577_v40 = vpop.permute.xlu0 %1576 }
  0xf3   : > { %v1843_v49 = vsel %vm1833_vm8, %v1810_v46, %v1577_v40  ;;  %v5220_v40 = vld [vmem:[#allocation2 + $0xcc] sm:$0xff]   ;;  %v4398_v46 = vld [vmem:[#allocation2 + $0xd4] ss:$0 sps:$4 sm:$0x11]  }
  0xf4   : > { %1475 = vrot.lane.b32.xlu1 %v1271_v19, %s4503_s30  ;;  %1473 = vrot.lane.b32.xlu0 %v1259_v37, %s4503_s30  ;;  %v1812_v37 = vsel %vm1800_vm2, %v1779_v52, %v1532_v24  ;;  %v1559_v48 = vshll.u32 %v5220_v40, 16 }
  0xf5   : > { %v1845_v62 = vsel %vm1833_vm8, %v1812_v37, %v1579_v35  ;;  %v1557_v37 = vshrl.u32 %v5220_v40, 16 }
  0xf6   : > { %v5173_v47 = vpop.permute.xlu1 %1296  ;;  %v1612_v50 = vpop.permute.xlu0 %1611 }
  0xf7   : > { %v1876_v39 = vsel %vm6343_vm4, %v1843_v49, %v1612_v50  ;;  %v1649_v29 = vsel %vm1635_vm12, %v4444_v17, %v5173_v47 }
  0xf8   : > { %1510 = vrot.lane.b32.xlu1 %v5165_v42, %s4501_s28  ;;  %1508 = vrot.lane.b32.xlu0 %v1358_v10, %s4501_s28  ;;  %v5199_v10 = vld [vmem:[#allocation2 + $0xc0] sm:$0xff]  }
  0xf9   : > { %4279 = vmatprep.mubr.msk.bf16.mxu0 %vm6342_vm11, %v1876_v39  ;;  %v1440_v24 = vshll.u32 %v5199_v10, 16  ;;  %v1438_v30 = vshrl.u32 %v5199_v10, 16  ;;  %v1481_v44 = vrot.slane %v5199_v10, 1 }
  0xfa   : > { %v1299_v60 = vpop.permute.xlu1 %1298  ;;  %v1614_v57 = vpop.permute.xlu0 %1613 }
  0xfb   : > { %v1878_v4 = vsel %vm6343_vm4, %v1845_v62, %v1614_v57  ;;  %v1442_v31 = vrot.slane %v1440_v24, 1  ;;  %v1651_v51 = vsel %vm1635_vm12, %v4904_v0, %v1299_v60  ;;  %v1483_v47 = vsel %vm1316_vm6, %v1481_v44, %v1482_v45  ;;  %v351_v44 = vld [vmem:[#allocation3 + $0x24] sm:$0x1] }
  0xfc   : > { %1547 = vrot.lane.b32.xlu1 %v5147_v28, %s4500_s27  ;;  %1545 = vrot.lane.b32.xlu0 %v5135_v3, %s4500_s27  ;;  %v1561_v62 = vrot.slane %v1559_v48, 1  ;;  %v1564_v57 = vshll.u32 %v4398_v46, 16  ;;  %v352_v45 = vsel %vm4548_vm3, 0, %v351_v44  ;;  %v402_v48 = vld [vmem:[#allocation3 + $0x38] sm:$0x1] }
  0xfd   : > { %4280 = vmatmul.mubr.msk.bf16.gmra.mxu0 %vm6342_vm11, %v1878_v4  ;;  %v1443_v36 = vor.u32 %v1442_v31, %v1438_v30  ;;  %353 = vst [vmem:[#allocation3 + $0x24] sm:$0x1] %v352_v45 }
  0xfe   : > { %v5195_v8 = vpop.permute.xlu1 %1379  ;;  %v1378_v9 = vpop.permute.xlu0 %1377 }
  0xff   : > { %v1682_v49 = vsel %vm1668_vm13, %v1649_v29, %v1378_v9  ;;  %v1684_v0 = vsel %vm1668_vm13, %v1651_v51, %v5195_v8  ;;  %v1562_v8 = vor.u32 %v1561_v62, %v1557_v37  ;;  %v399_v51 = vld [vmem:[#allocation3 + $0x2c] sm:$0x1] }
 0x100   : > { %1594 = vrot.lane.b32.xlu1 %v1283_v16, %s4504_s6  ;;  %1592 = vrot.lane.b32.xlu0 %v1271_v19, %s4504_s6 }
 0x102   : > { %v1417_v11 = vpop.permute.xlu1 %1416  ;;  %v1415_v21 = vpop.permute.xlu0 %1414 }
 0x103   : > { %v1715_v39 = vsel %vm1701_vm14, %v1682_v49, %v1415_v21  ;;  %v1717_v7 = vsel %vm1701_vm14, %v1684_v0, %v1417_v11  ;;  %v1566_v21 = vrot.slane %v1564_v57, 1 }
 0x104   : > { %1312 = vrot.lane.b32.xlu1 %v1271_v19, %s4498_s25  ;;  %1627 = vrot.lane.b32.xlu0 %v5165_v42, %s4502_s29  ;;  %v394_v19 = vsel %vm4563_vm5, 0, %v393_v59  ;;  %v1600_v59 = vrot.slane %v5220_v40, 1 }
 0x105   : > { %395 = vst [vmem:[#allocation3 + $0x14] sm:$0x1] %v394_v19  ;;  %v1601_v19 = vrot.slane %v4398_v46, 1  ;;  %v3090_v46 = vrot.slane %v4399_v6, 1 }
 0x106   : > { %v1464_v25 = vpop.permute.xlu1 %1463  ;;  %v1462_v27 = vpop.permute.xlu0 %1461 }
 0x107   : > { %v1748_v53 = vsel %vm1734_vm15, %v1715_v39, %v1462_v27  ;;  %v1750_v34 = vsel %vm1734_vm15, %v1717_v7, %v1464_v25  ;;  %v354_v27 = vld [vmem:[#allocation3 + $0x30] sm:$0x1]  ;;  %v400_v39 = vsel %vm4563_vm5, 0, %v399_v51 }
 0x108   : > { %1314 = vrot.lane.b32.xlu1 %v1283_v16, %s4498_s25  ;;  %1629 = vrot.lane.b32.xlu0 %v1364_v26, %s4502_s29  ;;  %v355_v30 = vsel %vm4548_vm3, 0, %v354_v27  ;;  %401 = vst [vmem:[#allocation3 + $0x2c] sm:$0x1] %v400_v39 }
 0x109   : > { %356 = vst [vmem:[#allocation3 + $0x30] sm:$0x1] %v355_v30 }
 0x10a   : > { %v1499_v35 = vpop.permute.xlu1 %1498  ;;  %v1497_v14 = vpop.permute.xlu0 %1496 }
 0x10b   : > { %v1781_v55 = vsel %vm1767_vm1, %v1748_v53, %v1497_v14  ;;  %v1783_v18 = vsel %vm1767_vm1, %v1750_v34, %v1499_v35  ;;  %v2871_v35 = vrot.slane %v2869_v23, 1  ;;  %v2874_v14 = vshll.u32 %v4400_v13, 16 }
 0x10c   : > { %1395 = vrot.lane.b32.xlu1 %v1364_v26, %s4497_s24  ;;  %1393 = vrot.lane.b32.xlu0 %v5165_v42, %s4497_s24  ;;  %v1448_v42 = vsel %vm1091_vm7, %v1443_v36, %v1447_v38 }
 0x10e   : > { %v1536_v5 = vpop.permute.xlu1 %1535  ;;  %v1534_v56 = vpop.permute.xlu0 %1533 }
 0x10f   : > { %v1814_v60 = vsel %vm1800_vm2, %v1781_v55, %v1534_v56  ;;  %v1816_v22 = vsel %vm1800_vm2, %v1783_v18, %v1536_v5  ;;  %v2872_v5 = vor.u32 %v2871_v35, %v2867_v32  ;;  %v2876_v56 = vrot.slane %v2874_v14, 1  ;;  %v408_v14 = vld [vmem:[#allocation3 + $0x50] sm:$0x1] }
 0x110   : > { %1432 = vrot.lane.b32.xlu1 %v5199_v10, %s4499_s26  ;;  %1430 = vrot.lane.b32.xlu0 %v5147_v28, %s4499_s26 }
 0x111   : > { %v2877_v29 = vsel %vm1091_vm7, %v2872_v5, %v2876_v56 }
 0x112   : > { %v1583_v50 = vpop.permute.xlu1 %1582  ;;  %v1581_v52 = vpop.permute.xlu0 %1580 }
 0x113   : > { %v1847_v9 = vsel %vm1833_vm8, %v1814_v60, %v1581_v52  ;;  %v1849_v24 = vsel %vm1833_vm8, %v1816_v22, %v1583_v50  ;;  %v403_v50 = vsel %vm4563_vm5, 0, %v402_v48 }
 0x114   : > { %1479 = vrot.lane.b32.xlu1 %v1448_v42, %s4503_s30  ;;  %1477 = vrot.lane.b32.xlu0 %v1283_v16, %s4503_s30  ;;  %404 = vst [vmem:[#allocation3 + $0x38] sm:$0x1] %v403_v50 }
 0x116   : > { %v5244_v4 = vpop.permute.xlu1 %1300  ;;  %v1616_v12 = vpop.permute.xlu0 %1615 }
 0x117   : > { %v1880_v16 = vsel %vm6343_vm4, %v1847_v9, %v1616_v12  ;;  %v1653_v62 = vsel %vm1635_vm12, %v4964_v63, %v5244_v4 }
 0x118   : > { %1514 = vrot.lane.b32.xlu1 %v1483_v47, %s4501_s28  ;;  %1512 = vrot.lane.b32.xlu0 %v1364_v26, %s4501_s28  ;;  %v1567_v26 = vsel %vm1091_vm7, %v1562_v8, %v1566_v21 }
 0x119   : > { %4283 = vmatprep.mubr.msk.bf16.mxu0 %vm6342_vm11, %v1880_v16 }
 0x11a   : > { %v1303_v11 = vpop.permute.xlu1 %1302  ;;  %v1618_v61 = vpop.permute.xlu0 %1617 }
 0x11b   : > { %v1882_v25 = vsel %vm6343_vm4, %v1849_v24, %v1618_v61  ;;  %v1655_v60 = vsel %vm1635_vm12, %v5005_v41, %v1303_v11 }
 0x11c   : > { %1551 = vrot.lane.b32.xlu1 %v5220_v40, %s4500_s27  ;;  %1549 = vrot.lane.b32.xlu0 %v5199_v10, %s4500_s27  ;;  %v1602_v10 = vsel %vm1316_vm6, %v1600_v59, %v1601_v19 }
 0x11d   : > { %4284 = vmatmul.mubr.msk.bf16.gmra.mxu0 %vm6342_vm11, %v1882_v25  ;;  %v360_v25 = vld [vmem:[#allocation3 + $0x48] sm:$0x1] }
 0x11e   : > { %v1384_v31 = vpop.permute.xlu1 %1383  ;;  %v1382_v36 = vpop.permute.xlu0 %1381  ;;  %v361_v27 = vsel %vm4548_vm3, 0, %v360_v25 }
 0x11f   : > { %v1686_v57 = vsel %vm1668_vm13, %v1653_v62, %v1382_v36  ;;  %v1688_v34 = vsel %vm1668_vm13, %v1655_v60, %v1384_v31  ;;  %362 = vst [vmem:[#allocation3 + $0x48] sm:$0x1] %v361_v27  ;;  %v357_v31 = vld [vmem:[#allocation3 + $0x3c] sm:$0x1] }
 0x120   : > { %1598 = vrot.lane.b32.xlu1 %v1567_v26, %s4504_s6  ;;  %1596 = vrot.lane.b32.xlu0 %v1448_v42, %s4504_s6  ;;  %v3091_v42 = vrot.slane %v4400_v13, 1  ;;  %v358_v32 = vsel %vm4548_vm3, 0, %v357_v31 }
 0x121   : > { %359 = vst [vmem:[#allocation3 + $0x3c] sm:$0x1] %v358_v32 }
 0x122   : > { %v1421_v38 = vpop.permute.xlu1 %1420  ;;  %v1419_v40 = vpop.permute.xlu0 %1418  ;;  %v3092_v53 = vsel %vm1316_vm6, %v3090_v46, %v3091_v42 }
 0x123   : > { %v1719_v6 = vsel %vm1701_vm14, %v1686_v57, %v1419_v40  ;;  %v1721_v63 = vsel %vm1701_vm14, %v1688_v34, %v1421_v38  ;;  %v405_v38 = vld [vmem:[#allocation3 + $0x44] sm:$0x1] }
 0x124   : > { %1633 = vrot.lane.b32.xlu1 %v1602_v10, %s4502_s29  ;;  %1631 = vrot.lane.b32.xlu0 %v1483_v47, %s4502_s29  ;;  %v409_v10 = vsel %vm4563_vm5, 0, %v408_v14  ;;  %v406_v5 = vsel %vm4563_vm5, 0, %v405_v38 }
 0x125   : > { %410 = vst [vmem:[#allocation3 + $0x50] sm:$0x1] %v409_v10  ;;  %407 = vst [vmem:[#allocation3 + $0x44] sm:$0x1] %v406_v5 }
 0x126   : > { %v1468_v17 = vpop.permute.xlu1 %1467  ;;  %v1466_v49 = vpop.permute.xlu0 %1465 }
 0x127   : > { %v1752_v9 = vsel %vm1734_vm15, %v1719_v6, %v1466_v49  ;;  %v1754_v21 = vsel %vm1734_vm15, %v1721_v63, %v1468_v17 }
 0x128   : > { %3058 = vrot.lane.b32.xlu0 %v2877_v29, %s4498_s25 }
 0x12a   : > { %v1503_v52 = vpop.permute.xlu1 %1502  ;;  %v1501_v47 = vpop.permute.xlu0 %1500 }
 0x12b   : > { %v1785_v12 = vsel %vm1767_vm1, %v1752_v9, %v1501_v47  ;;  %v1787_v22 = vsel %vm1767_vm1, %v1754_v21, %v1503_v52  ;;  %v366_v9 = vld [vmem:[#allocation3 + $0x60] sm:$0x1] }
 0x12c   : > { %3138 = vrot.lane.b32.xlu0 %v3092_v53, %s4497_s24 }
 0x12e   : > { %v1540_v55 = vpop.permute.xlu1 %1539  ;;  %v1538_v37 = vpop.permute.xlu0 %1537 }
 0x12f   : > { %v1818_v16 = vsel %vm1800_vm2, %v1785_v12, %v1538_v37  ;;  %v1820_v11 = vsel %vm1800_vm2, %v1787_v22, %v1540_v55  ;;  %v367_v12 = vsel %vm4548_vm3, 0, %v366_v9 }
 0x130   : > { %368 = vst [vmem:[#allocation3 + $0x60] sm:$0x1] %v367_v12 }
 0x132   : > { %v1587_v0 = vpop.permute.xlu1 %1586  ;;  %v1585_v7 = vpop.permute.xlu0 %1584 }
 0x133   : > { %v1851_v4 = vsel %vm1833_vm8, %v1818_v16, %v1585_v7  ;;  %v1853_v23 = vsel %vm1833_vm8, %v1820_v11, %v1587_v0 }
 0x136   : > { %v1305_v18 = vpop.permute.xlu1 %1304  ;;  %v1620_v8 = vpop.permute.xlu0 %1619 }
 0x137   : > { %v1884_v41 = vsel %vm6343_vm4, %v1851_v4, %v1620_v8  ;;  %v1657_v17 = vsel %vm1635_vm12, %v5028_v54, %v1305_v18  ;;  %v363_v4 = vld [vmem:[#allocation3 + $0x54] sm:$0x1] }
 0x138   : > { %4287 = vmatprep.mubr.msk.bf16.mxu0 %vm6342_vm11, %v1884_v41  ;;  %v364_v8 = vsel %vm4548_vm3, 0, %v363_v4  ;;  %v414_v41 = vld [vmem:[#allocation3 + $0x68] sm:$0x1] }
 0x139   : > { %365 = vst [vmem:[#allocation3 + $0x54] sm:$0x1] %v364_v8  ;;  %v415_v11 = vsel %vm4563_vm5, 0, %v414_v41 }
 0x13a   : > { %v1307_v13 = vpop.permute.xlu1 %1306  ;;  %v1622_v24 = vpop.permute.xlu0 %1621  ;;  %416 = vst [vmem:[#allocation3 + $0x68] sm:$0x1] %v415_v11  ;;  %v2579_v11 = vld [vmem:[#allocation3 + $0x18] sm:$0xf] }
 0x13b   : > { %v1886_v61 = vsel %vm6343_vm4, %v1853_v23, %v1622_v24  ;;  %v1659_v42 = vsel %vm1635_vm12, %v5042_v15, %v1307_v13  ;;  %v411_v13 = vld [vmem:[#allocation3 + $0x5c] sm:$0x1] }
 0x13c   : > { %4288 = vmatmul.mubr.msk.bf16.gmra.mxu0 %vm6342_vm11, %v1886_v61  ;;  %v412_v23 = vsel %vm4563_vm5, 0, %v411_v13 }
 0x13d   : > { %413 = vst [vmem:[#allocation3 + $0x5c] sm:$0x1] %v412_v23 }
 0x13e   : > { %v1388_v26 = vpop.permute.xlu1 %1387  ;;  %v1386_v59 = vpop.permute.xlu0 %1385 }
 0x13f   : > { %v1690_v29 = vsel %vm1668_vm13, %v1657_v17, %v1386_v59  ;;  %v1692_v39 = vsel %vm1668_vm13, %v1659_v42, %v1388_v26  ;;  %v5363_v42 = vld [vmem:[%s6337_s2] ss:$0 sm:$0xff] }
 0x142   : > { %v1425_v19 = vpop.permute.xlu1 %1424  ;;  %v1423_v30 = vpop.permute.xlu0 %1422 }
 0x143   : > { %v1723_v48 = vsel %vm1701_vm14, %v1690_v29, %v1423_v30  ;;  %v1725_v54 = vsel %vm1701_vm14, %v1692_v39, %v1425_v19 }
 0x146   : > { %v1472_v35 = vpop.permute.xlu1 %1471  ;;  %v1470_v36 = vpop.permute.xlu0 %1469 }
 0x147   : > { %v1756_v50 = vsel %vm1734_vm15, %v1723_v48, %v1470_v36  ;;  %v1758_v37 = vsel %vm1734_vm15, %v1725_v54, %v1472_v35 }
 0x14a   : > { %v1507_v56 = vpop.permute.xlu1 %1506  ;;  %v1505_v40 = vpop.permute.xlu0 %1504 }
 0x14b   : > { %v1789_v51 = vsel %vm1767_vm1, %v1756_v50, %v1505_v40  ;;  %v1791_v62 = vsel %vm1767_vm1, %v1758_v37, %v1507_v56 }
 0x14e   : > { %v1544_v44 = vpop.permute.xlu1 %1543  ;;  %v1542_v45 = vpop.permute.xlu0 %1541 }
 0x14f   : > { %v1822_v52 = vsel %vm1800_vm2, %v1789_v51, %v1542_v45  ;;  %v1824_v57 = vsel %vm1800_vm2, %v1791_v62, %v1544_v44 }
 0x152   : > { %v1591_v46 = vpop.permute.xlu1 %1590  ;;  %v1589_v49 = vpop.permute.xlu0 %1588 }
 0x153   : > { %v1855_v47 = vsel %vm1833_vm8, %v1822_v52, %v1589_v49  ;;  %v1857_v60 = vsel %vm1833_vm8, %v1824_v57, %v1591_v46  ;;  %v372_v49 = vld [vmem:[#allocation3 + $0x78] sm:$0x1] }
 0x154   : > { %v373_v51 = vsel %vm4548_vm3, 0, %v372_v49 }
 0x155   : > { %374 = vst [vmem:[#allocation3 + $0x78] sm:$0x1] %v373_v51  ;;  %v2576_v51 = vld [vmem:[#allocation3 + $0x14] sm:$0x1] }
 0x156   : > { %v1309_v53 = vpop.permute.xlu1 %1308  ;;  %v1624_v55 = vpop.permute.xlu0 %1623 }
 0x157   : > { %v1888_v15 = vsel %vm6343_vm4, %v1855_v47, %v1624_v55  ;;  %v1661_v26 = vsel %vm1635_vm12, %v5083_v58, %v1309_v53 }
 0x158   : > { %4291 = vmatprep.mubr.msk.bf16.mxu0 %vm6342_vm11, %v1888_v15 }
 0x15a   : > { %v1311_v0 = vpop.permute.xlu1 %1310  ;;  %v1626_v6 = vpop.permute.xlu0 %1625 }
 0x15b   : > { %v1890_v7 = vsel %vm6343_vm4, %v1857_v60, %v1626_v6  ;;  %v1663_v30 = vsel %vm1635_vm12, %v5095_v20, %v1311_v0 }
 0x15c   : > { %4292 = vmatmul.mubr.msk.bf16.gmra.mxu0 %vm6342_vm11, %v1890_v7 }
 0x15e   : > { %v1392_v34 = vpop.permute.xlu1 %1391  ;;  %v1390_v16 = vpop.permute.xlu0 %1389 }
 0x15f   : > { %v1694_v59 = vsel %vm1668_vm13, %v1661_v26, %v1390_v16  ;;  %v1696_v36 = vsel %vm1668_vm13, %v1663_v30, %v1392_v34  ;;  %v369_v34 = vld [vmem:[#allocation3 + $0x6c] sm:$0x1]  ;;  %v417_v30 = vld [vmem:[#allocation3 + $0x74] sm:$0x1] }
 0x162   : > { %v1429_v18 = vpop.permute.xlu1 %1428  ;;  %v1427_v63 = vpop.permute.xlu0 %1426 }
 0x163   : > { %v1727_v31 = vsel %vm1701_vm14, %v1694_v59, %v1427_v63  ;;  %v1729_v58 = vsel %vm1701_vm14, %v1696_v36, %v1429_v18  ;;  %v370_v18 = vsel %vm4548_vm3, 0, %v369_v34  ;;  %v2572_v59 = vld [vmem:[#allocation3 + $0xc] sm:$0xf] }
 0x164   : > { %371 = vst [vmem:[#allocation3 + $0x6c] sm:$0x1] %v370_v18 }
 0x166   : > { %v1476_v21 = vpop.permute.xlu1 %1475  ;;  %v1474_v22 = vpop.permute.xlu0 %1473 }
 0x167   : > { %v1760_v35 = vsel %vm1734_vm15, %v1727_v31, %v1474_v22  ;;  %v1762_v20 = vsel %vm1734_vm15, %v1729_v58, %v1476_v21  ;;  %v420_v22 = vld [vmem:[#allocation3 + $0x80] sm:$0x1] }
 0x16a   : > { %v1511_v24 = vpop.permute.xlu1 %1510  ;;  %v1509_v61 = vpop.permute.xlu0 %1508 }
 0x16b   : > { %v1793_v14 = vsel %vm1767_vm1, %v1760_v35, %v1509_v61  ;;  %v1795_v44 = vsel %vm1767_vm1, %v1762_v20, %v1511_v24  ;;  %v421_v24 = vsel %vm4563_vm5, 0, %v420_v22 }
 0x16c   : > { %422 = vst [vmem:[#allocation3 + $0x80] sm:$0x1] %v421_v24 }
 0x16e   : > { %v1548_v25 = vpop.permute.xlu1 %1547  ;;  %v1546_v27 = vpop.permute.xlu0 %1545 }
 0x16f   : > { %v1826_v10 = vsel %vm1800_vm2, %v1793_v14, %v1546_v27  ;;  %v1828_v45 = vsel %vm1800_vm2, %v1795_v44, %v1548_v25 }
 0x172   : > { %v1595_v19 = vpop.permute.xlu1 %1594  ;;  %v1593_v32 = vpop.permute.xlu0 %1592 }
 0x173   : > { %v1859_v5 = vsel %vm1833_vm8, %v1826_v10, %v1593_v32  ;;  %v1861_v29 = vsel %vm1833_vm8, %v1828_v45, %v1595_v19  ;;  %v2583_v10 = vld [vmem:[#allocation3 + $0x20] sm:$0x1] }
 0x176   : > { %v5348_v38 = vpop.permute.xlu1 %1312  ;;  %v1628_v56 = vpop.permute.xlu0 %1627 }
 0x177   : > { %v1892_v40 = vsel %vm6343_vm4, %v1859_v5, %v1628_v56  ;;  %v418_v56 = vsel %vm4563_vm5, 0, %v417_v30 }
 0x178   : > { %4295 = vmatprep.mubr.msk.bf16.mxu0 %vm6342_vm11, %v1892_v40  ;;  %419 = vst [vmem:[#allocation3 + $0x74] sm:$0x1] %v418_v56 }
 0x17a   : > { %v5357_v17 = vpop.permute.xlu1 %1314  ;;  %v1630_v46 = vpop.permute.xlu0 %1629 }
 0x17b   : > { %v1894_v48 = vsel %vm6343_vm4, %v1861_v29, %v1630_v46 }
 0x17c   : > { %4296 = vmatmul.mubr.msk.bf16.gmra.mxu0 %vm6342_vm11, %v1894_v48  ;;  %v1667_v48 = vsel %vm1635_vm12, %v5147_v28, %v5357_v17 }
 0x17d   : > { %v4273_v50 = vpop.f32.mrf.mxu0 }
 0x17e   : > { %v2006_v39 = vadd.f32 %v4273_v50, %v5363_v42  ;;  %v5370_v52 = vpop.permute.xlu1 %1395  ;;  %v5372_v54 = vpop.permute.xlu0 %1393 }
 0x17f   : > { %v1997_v53 = vpop.f32.mrf.mxu0  ;;  %v1700_v28 = vsel %vm1668_vm13, %v1667_v48, %v5370_v52 }
 0x180   : > { %v2126_v47 = vmax.f32 %v2006_v39, 0.0  ;;  %v1998_v55 = vadd.f32 %v5363_v42, %v1997_v53 }
 0x181   : > { %v4274_v37 = vpop.f32.mrf.mxu0 }
 0x182   : > { %v4197_v15 = vpack.c.bf16 %v2126_v47, %v2126_v47  ;;  %v2124_v62 = vmax.f32 %v1998_v55, 0.0  ;;  %v2009_v57 = vadd.f32 %v4274_v37, %v5363_v42  ;;  %v5376_v0 = vpop.permute.xlu1 %1432  ;;  %v5378_v6 = vpop.permute.xlu0 %1430 }
 0x183   : > { %v2000_v60 = vpop.f32.mrf.mxu0 }
 0x184   : > { %v2270_v7 = vshrl.u32 %v4197_v15, 16  ;;  %v4195_v9 = vpack.c.bf16 %v2124_v62, %v2124_v62  ;;  %v2127_v12 = vmax.f32 %v2009_v57, 0.0  ;;  %v2001_v16 = vadd.f32 %v5363_v42, %v2000_v60 }
 0x185   : > { %v2273_v4 = vshll.u32 %v4197_v15, 16  ;;  %v1665_v15 = vsel %vm1635_vm12, %v5135_v3, %v5348_v38  ;;  %v1733_v60 = vsel %vm1701_vm14, %v1700_v28, %v5376_v0  ;;  %v426_v28 = vld [vmem:[#allocation3 + $0x98] sm:$0x1] }
 0x186   : > { %v2272_v63 = vrot.slane %v2270_v7, 7  ;;  %v2253_v8 = vshrl.u32 %v4195_v9, 16  ;;  %v4198_v21 = vpack.c.bf16 %v2127_v12, %v2127_v12  ;;  %v1480_v41 = vpop.permute.xlu1 %1479  ;;  %v2125_v13 = vmax.f32 %v2001_v16, 0.0  ;;  %v1478_v23 = vpop.permute.xlu0 %1477 }
 0x187   : > { %v2256_v27 = vshll.u32 %v4195_v9, 16  ;;  %v1698_v57 = vsel %vm1668_vm13, %v1665_v15, %v5372_v54  ;;  %v1766_v38 = vsel %vm1734_vm15, %v1733_v60, %v1480_v41 }
 0x188   : > { %v2275_v61 = vor.u32 %v2273_v4, %v2272_v63  ;;  %v2255_v25 = vrot.slane %v2253_v8, 7  ;;  %v2278_v26 = vshrl.u32 %v4198_v21, 16  ;;  %v4196_v19 = vpack.c.bf16 %v2125_v13, %v2125_v13 }
 0x189   : > { %v2281_v14 = vshll.u32 %v4198_v21, 16  ;;  %v2276_v20 = vrot.slane %v2272_v63, 4  ;;  %v1731_v3 = vsel %vm1701_vm14, %v1698_v57, %v5378_v6  ;;  %v427_v57 = vsel %vm4563_vm5, 0, %v426_v28 }
 0x18a   : > { %v2580_v31 = vsel %vm4594_vm9, %v2275_v61, %v2579_v11  ;;  %v2258_v32 = vor.u32 %v2256_v27, %v2255_v25  ;;  %v2280_v35 = vrot.slane %v2278_v26, 7  ;;  %v1515_v36 = vpop.permute.xlu1 %1514  ;;  %v2261_v58 = vshrl.u32 %v4196_v19, 16  ;;  %v1513_v5 = vpop.permute.xlu0 %1512  ;;  %428 = vst [vmem:[#allocation3 + $0x98] sm:$0x1] %v427_v57 }
 0x18b   : > { %2581 = vst [vmem:[#allocation3 + $0x18] sm:$0xf] %v2580_v31  ;;  %v2264_v46 = vshll.u32 %v4196_v19, 16  ;;  %v2259_v53 = vrot.slane %v2255_v25, 4  ;;  %v1764_v9 = vsel %vm1734_vm15, %v1731_v3, %v1478_v23  ;;  %v1799_v12 = vsel %vm1767_vm1, %v1766_v38, %v1515_v36 }
 0x18c   : > { %v2573_v40 = vsel %vm4594_vm9, %v2258_v32, %v2572_v59  ;;  %v2283_v44 = vor.u32 %v2281_v14, %v2280_v35  ;;  %v2285_v45 = vrot.slane %v2280_v35, 4  ;;  %v2263_v29 = vrot.slane %v2261_v58, 7  ;;  %v378_v59 = vld [vmem:[#allocation3 + $0x90] sm:$0x1] }
 0x18d   : > { %2574 = vst [vmem:[#allocation3 + $0xc] sm:$0xf] %v2573_v40  ;;  %v1797_v34 = vsel %vm1767_vm1, %v1764_v9, %v1513_v5  ;;  %v379_v32 = vsel %vm4548_vm3, 0, %v378_v59 }
 0x18e   : > { %v2284_v49 = vsel %vm4602_vm10, %v2276_v20, %v2283_v44  ;;  %v2584_v50 = vsel %vm4548_vm3, %v2285_v45, %v2583_v10  ;;  %v1552_v39 = vpop.permute.xlu1 %1551  ;;  %v2266_v47 = vor.u32 %v2264_v46, %v2263_v29  ;;  %v2268_v55 = vrot.slane %v2263_v29, 4  ;;  %v1550_v37 = vpop.permute.xlu0 %1549  ;;  %380 = vst [vmem:[#allocation3 + $0x90] sm:$0x1] %v379_v32 }
 0x18f   : > { %2582 = vst.msk [vmem:[#allocation3 + $0x1c] sm:$0xf] %vm226_vm0, %v2284_v49  ;;  %2585 = vst [vmem:[#allocation3 + $0x20] sm:$0x1] %v2584_v50  ;;  %v1832_v54 = vsel %vm1800_vm2, %v1799_v12, %v1552_v39  ;;  %v1830_v0 = vsel %vm1800_vm2, %v1797_v34, %v1550_v37  ;;  %v423_v12 = vld [vmem:[#allocation3 + $0x8c] sm:$0x1] }
 0x190   : > { %v2267_v17 = vsel %vm4602_vm10, %v2259_v53, %v2266_v47  ;;  %v2577_v62 = vsel %vm4548_vm3, %v2268_v55, %v2576_v51  ;;  %v375_v51 = vld [vmem:[#allocation3 + $0x84] sm:$0x1] }
 0x191   : > { %2575 = vst.msk [vmem:[#allocation3 + $0x10] sm:$0xf] %vm226_vm0, %v2267_v17  ;;  %2578 = vst [vmem:[#allocation3 + $0x14] sm:$0x1] %v2577_v62  ;;  %v376_v53 = vsel %vm4548_vm3, 0, %v375_v51 }
 0x192   : > { %v1599_v7 = vpop.permute.xlu1 %1598  ;;  %v1597_v52 = vpop.permute.xlu0 %1596  ;;  %377 = vst [vmem:[#allocation3 + $0x84] sm:$0x1] %v376_v53  ;;  %v2593_v17 = vld [vmem:[#allocation3 + $0x30] sm:$0xf] }
 0x193   : > { %v1865_v16 = vsel %vm1833_vm8, %v1832_v54, %v1599_v7  ;;  %v1863_v4 = vsel %vm1833_vm8, %v1830_v0, %v1597_v52  ;;  %v2586_v52 = vld [vmem:[#allocation3 + $0x24] sm:$0xf] }
 0x196   : > { %v1634_v18 = vpop.permute.xlu1 %1633  ;;  %v4401_v63 = vld [vmem:[#allocation3 + $0x18] sm:$0xff]   ;;  %v1632_v8 = vpop.permute.xlu0 %1631  ;;  %v4402_v21 = vld [vmem:[#allocation3 + $0x20] ss:$0 sps:$4 sm:$0x11]  }
 0x197   : > { %v1898_v6 = vsel %vm6343_vm4, %v1865_v16, %v1634_v18  ;;  %v1896_v41 = vsel %vm6343_vm4, %v1863_v4, %v1632_v8  ;;  %3177 = vrot.lane.b32.xlu1 %v4401_v63, %s4499_s26  ;;  %3294 = vrot.lane.b32.xlu0 %v4401_v63, %s4500_s27  ;;  %v3096_v22 = vrot.slane %v4401_v63, 1  ;;  %v2893_v11 = vshll.u32 %v4401_v63, 16  ;;  %v2597_v18 = vld [vmem:[#allocation3 + $0x38] sm:$0x1] }
 0x198   : > { %4299 = vmatprep.mubr.msk.bf16.mxu0 %vm6342_vm11, %v1896_v41  ;;  %v3097_v13 = vrot.slane %v4402_v21, 1  ;;  %v5428_v23 = vld [vmem:[#allocation3 + $0xc] sm:$0xff]   ;;  %v5431_v24 = vld [vmem:[#allocation3 + $0x14] ss:$0 sps:$4 sm:$0x11]   ;;  %v2891_v30 = vshrl.u32 %v4401_v63, 16 }
 0x199   : > { %4300 = vmatmul.mubr.msk.bf16.gmra.mxu0 %vm6342_vm11, %v1898_v6  ;;  %v3093_v25 = vrot.slane %v5428_v23, 1  ;;  %v2895_v27 = vrot.slane %v2893_v11, 1  ;;  %v3094_v26 = vrot.slane %v5431_v24, 1  ;;  %v2898_v31 = vshll.u32 %v4402_v21, 16 }
 0x19a   : > { %v3098_v61 = vsel %vm1316_vm6, %v3096_v22, %v3097_v13  ;;  %v424_v4 = vsel %vm4563_vm5, 0, %v423_v12  ;;  %vm6352_vm11 = vcmask 1041408  }
 0x19b   : > { %3259 = vrot.lane.b32.xlu1 %v3098_v61, %s4501_s28  ;;  %3175 = vrot.lane.b32.xlu0 %v5428_v23, %s4499_s26  ;;  %v3095_v36 = vsel %vm1316_vm6, %v3093_v25, %v3094_v26  ;;  %v2896_v10 = vor.u32 %v2895_v27, %v2891_v30  ;;  %v2900_v20 = vrot.slane %v2898_v31, 1  ;;  %425 = vst [vmem:[#allocation3 + $0x8c] sm:$0x1] %v424_v4  ;;  %v2590_v25 = vld [vmem:[#allocation3 + $0x2c] sm:$0x1]  ;;  %vm6353_vm4 = vmmov %vm6352_vm11 }
 0x19d   : > { %v4277_v19 = vpop.f32.mrf.mxu0  ;;  %v2901_v46 = vsel %vm1091_vm7, %v2896_v10, %v2900_v20  ;;  %v384_v20 = vld [vmem:[#allocation3 + $0xa8] sm:$0x1] }
 0x19e   : > { %v2022_v35 = vadd.f32 %v4277_v19, %v5363_v42  ;;  %v2881_v19 = vshll.u32 %v5428_v23, 16 }
 0x19f   : > { %v2013_v14 = vpop.f32.mrf.mxu0  ;;  %3140 = vrot.lane.b32.xlu1 %v3095_v36, %s4497_s24  ;;  %3376 = vrot.lane.b32.xlu0 %v3098_v61, %s4502_s29 }
 0x1a0   : > { %v2130_v58 = vmax.f32 %v2022_v35, 0.0  ;;  %v2014_v5 = vadd.f32 %v5363_v42, %v2013_v14  ;;  %v2883_v32 = vrot.slane %v2881_v19, 1  ;;  %v2879_v35 = vshrl.u32 %v5428_v23, 16 }
 0x1a1   : > { %v4278_v56 = vpop.f32.mrf.mxu0  ;;  %v2886_v14 = vshll.u32 %v5431_v24, 16  ;;  %v385_v23 = vsel %vm4548_vm3, 0, %v384_v20 }
 0x1a2   : > { %v4201_v40 = vpack.c.bf16 %v2130_v58, %v2130_v58  ;;  %v2128_v44 = vmax.f32 %v2014_v5, 0.0  ;;  %v2025_v45 = vadd.f32 %v4278_v56, %v5363_v42  ;;  %v2884_v10 = vor.u32 %v2883_v32, %v2879_v35  ;;  %386 = vst [vmem:[#allocation3 + $0xa8] sm:$0x1] %v385_v23 }
 0x1a3   : > { %v2016_v29 = vpop.f32.mrf.mxu0  ;;  %3224 = vrot.lane.b32.xlu1 %v2901_v46, %s4503_s30  ;;  %3142 = vrot.lane.b32.xlu0 %v3098_v61, %s4497_s24  ;;  %v2888_v58 = vrot.slane %v2886_v14, 1  ;;  %v4424_v14 = vld [vmem:[%s6338_s3 + $0x8] sm:$0xff]  }
 0x1a4   : > { %v2304_v48 = vshrl.u32 %v4201_v40, 16  ;;  %v4199_v49 = vpack.c.bf16 %v2128_v44, %v2128_v44  ;;  %v2131_v50 = vmax.f32 %v2025_v45, 0.0  ;;  %v2017_v39 = vadd.f32 %v5363_v42, %v2016_v29 }
 0x1a5   : > { %v2307_v55 = vshll.u32 %v4201_v40, 16  ;;  %v2889_v5 = vsel %vm1091_vm7, %v2884_v10, %v2888_v58 }
 0x1a6   : > { %v2306_v47 = vrot.slane %v2304_v48, 7  ;;  %v2287_v37 = vshrl.u32 %v4199_v49, 16  ;;  %v4202_v15 = vpack.c.bf16 %v2131_v50, %v2131_v50  ;;  %v2129_v62 = vmax.f32 %v2017_v39, 0.0 }
 0x1a7   : > { %v2290_v3 = vshll.u32 %v4199_v49, 16  ;;  %3062 = vrot.lane.b32.xlu1 %v2901_v46, %s4498_s25  ;;  %3257 = vrot.lane.b32.xlu0 %v3095_v36, %s4501_s28 }
 0x1a8   : > { %v2309_v60 = vor.u32 %v2307_v55, %v2306_v47  ;;  %v2289_v7 = vrot.slane %v2287_v37, 7  ;;  %v2312_v38 = vshrl.u32 %v4202_v15, 16  ;;  %v4200_v9 = vpack.c.bf16 %v2129_v62, %v2129_v62 }
 0x1a9   : > { %v2315_v16 = vshll.u32 %v4202_v15, 16  ;;  %v2310_v6 = vrot.slane %v2306_v47, 4 }
 0x1aa   : > { %v2594_v34 = vsel %vm4594_vm9, %v2309_v60, %v2593_v17  ;;  %v2292_v54 = vor.u32 %v2290_v3, %v2289_v7  ;;  %v2314_v0 = vrot.slane %v2312_v38, 7  ;;  %v2295_v63 = vshrl.u32 %v4200_v9, 16 }
 0x1ab   : > { %2595 = vst [vmem:[#allocation3 + $0x30] sm:$0xf] %v2594_v34  ;;  %3341 = vrot.lane.b32.xlu0 %v2901_v46, %s4504_s6  ;;  %v2298_v11 = vshll.u32 %v4200_v9, 16  ;;  %v2293_v27 = vrot.slane %v2289_v7, 4  ;;  %v381_v9 = vld [vmem:[#allocation3 + $0x9c] sm:$0x1] }
 0x1ac   : > { %v2587_v8 = vsel %vm4594_vm9, %v2292_v54, %v2586_v52  ;;  %v2317_v21 = vor.u32 %v2315_v16, %v2314_v0  ;;  %v2319_v41 = vrot.slane %v2314_v0, 4  ;;  %v2297_v22 = vrot.slane %v2295_v63, 7  ;;  %v4423_v16 = vld [vmem:[%s6338_s3 + $0x10] ss:$0 sps:$4 sm:$0x33]  }
 0x1ad   : > { %2588 = vst [vmem:[#allocation3 + $0x24] sm:$0xf] %v2587_v8  ;;  %v382_v8 = vsel %vm4548_vm3, 0, %v381_v9  ;;  %4342 = vmatprep.subr.msk.bf16.mxu1 %vm6352_vm11, %v4423_v16  ;;  %v3724_v19 = vsel %vm6353_vm4, %v4423_v16, 0  ;;  %vm6355_vm11 = vcmask 293888  }
 0x1ae   : > { %v2318_v13 = vsel %vm4602_vm10, %v2310_v6, %v2317_v21  ;;  %v2598_v61 = vsel %vm4548_vm3, %v2319_v41, %v2597_v18  ;;  %v2300_v26 = vor.u32 %v2298_v11, %v2297_v22  ;;  %v2302_v59 = vrot.slane %v2297_v22, 4  ;;  %v2607_v18 = vld [vmem:[#allocation3 + $0x48] sm:$0xf]  ;;  %v432_v21 = vld [vmem:[#allocation3 + $0xb0] sm:$0x1]  ;;  %4304 = vmatpush3.bf16.msra.mxu1 %v3724_v19 }
 0x1af   : > { %2596 = vst.msk [vmem:[#allocation3 + $0x34] sm:$0xf] %vm226_vm0, %v2318_v13  ;;  %2599 = vst [vmem:[#allocation3 + $0x38] sm:$0x1] %v2598_v61  ;;  %v2600_v13 = vld [vmem:[#allocation3 + $0x3c] sm:$0xf]  ;;  %4305 = vmatprep.subr.bf16.mxu1 %v4424_v14 }
 0x1b0   : > { %v2301_v30 = vsel %vm4602_vm10, %v2293_v27, %v2300_v26  ;;  %v2591_v31 = vsel %vm4548_vm3, %v2302_v59, %v2590_v25  ;;  %383 = vst [vmem:[#allocation3 + $0x9c] sm:$0x1] %v382_v8  ;;  %v433_v26 = vsel %vm4563_vm5, 0, %v432_v21  ;;  %v429_v59 = vld [vmem:[#allocation3 + $0xa4] sm:$0x1] }
 0x1b1   : > { %2589 = vst.msk [vmem:[#allocation3 + $0x28] sm:$0xf] %vm226_vm0, %v2301_v30  ;;  %2592 = vst [vmem:[#allocation3 + $0x2c] sm:$0x1] %v2591_v31  ;;  %v387_v21 = vld [vmem:[#allocation3 + $0xb4] sm:$0x1] }
 0x1b2   : > { %434 = vst [vmem:[#allocation3 + $0xb0] sm:$0x1] %v433_v26  ;;  %4306 = vmatpush3.bf16.msra.mxu1 %v4424_v14  ;;  %v438_v26 = vld [vmem:[#allocation3 + $0xc8] sm:$0x1] }
 0x1b6   : > { %v4405_v36 = vld [vmem:[#allocation3 + $0x30] sm:$0xff]   ;;  %v4407_v56 = vld [vmem:[#allocation3 + $0x38] ss:$0 sps:$4 sm:$0x11]  }
 0x1b7   : > { %3181 = vrot.lane.b32.xlu1 %v4405_v36, %s4499_s26  ;;  %3298 = vrot.lane.b32.xlu0 %v4405_v36, %s4500_s27  ;;  %v3102_v29 = vrot.slane %v4405_v36, 1  ;;  %v3103_v46 = vrot.slane %v4407_v56, 1  ;;  %v2917_v49 = vshll.u32 %v4405_v36, 16  ;;  %v2915_v38 = vshrl.u32 %v4405_v36, 16  ;;  %v2611_v36 = vld [vmem:[#allocation3 + $0x50] sm:$0x1] }
 0x1b8   : > { %v5485_v44 = vld [vmem:[#allocation3 + $0x24] sm:$0xff]   ;;  %v5487_v48 = vld [vmem:[#allocation3 + $0x2c] ss:$0 sps:$4 sm:$0x11]   ;;  %v2922_v52 = vshll.u32 %v4407_v56, 16 }
 0x1b9   : > { %v3104_v15 = vsel %vm1316_vm6, %v3102_v29, %v3103_v46  ;;  %v3099_v28 = vrot.slane %v5485_v44, 1  ;;  %v3100_v17 = vrot.slane %v5487_v48, 1  ;;  %v2919_v62 = vrot.slane %v2917_v49, 1  ;;  %v2604_v49 = vld [vmem:[#allocation3 + $0x44] sm:$0x1] }
 0x1ba   : > { %v2924_v27 = vrot.slane %v2922_v52, 1 }
 0x1bb   : > { %3060 = vrot.lane.b32.xlu1 %v2889_v5, %s4498_s25  ;;  %3222 = vrot.lane.b32.xlu0 %v2889_v5, %s4503_s30  ;;  %v3101_v4 = vsel %vm1316_vm6, %v3099_v28, %v3100_v17  ;;  %v2920_v6 = vor.u32 %v2919_v62, %v2915_v38  ;;  %v430_v5 = vsel %vm4563_vm5, 0, %v429_v59  ;;  %v2903_v28 = vshrl.u32 %v5485_v44, 16  ;;  %v390_v38 = vld [vmem:[#allocation3 + $0xc0] sm:$0x1] }
 0x1bc   : > { %431 = vst [vmem:[#allocation3 + $0xa4] sm:$0x1] %v430_v5  ;;  %v2910_v17 = vshll.u32 %v5487_v48, 16  ;;  %v391_v48 = vsel %vm4548_vm3, 0, %v390_v38 }
 0x1bd   : > { %v4281_v40 = vpop.f32.mrf.mxu0  ;;  %v2925_v58 = vsel %vm1091_vm7, %v2920_v6, %v2924_v27  ;;  %392 = vst [vmem:[#allocation3 + $0xc0] sm:$0x1] %v391_v48  ;;  %v2618_v48 = vld [vmem:[#allocation3 + $0x5c] sm:$0x1] }
 0x1be   : > { %v2038_v24 = vadd.f32 %v4281_v40, %v5363_v42 }
 0x1bf   : > { %v2029_v45 = vpop.f32.mrf.mxu0  ;;  %3296 = vrot.lane.b32.xlu1 %v5485_v44, %s4500_s27  ;;  %3179 = vrot.lane.b32.xlu0 %v5485_v44, %s4499_s26 }
 0x1c0   : > { %v2134_v50 = vmax.f32 %v2038_v24, 0.0  ;;  %v2030_v51 = vadd.f32 %v5363_v42, %v2029_v45 }
 0x1c1   : > { %v4282_v39 = vpop.f32.mrf.mxu0 }
 0x1c2   : > { %v4205_v53 = vpack.c.bf16 %v2134_v50, %v2134_v50  ;;  %v2132_v47 = vmax.f32 %v2030_v51, 0.0  ;;  %v2041_v55 = vadd.f32 %v4282_v39, %v5363_v42  ;;  %v4425_v50 = vld [vmem:[%s6338_s3] sm:$0xff]  }
 0x1c3   : > { %v2032_v37 = vpop.f32.mrf.mxu0  ;;  %3263 = vrot.lane.b32.xlu1 %v3104_v15, %s4501_s28  ;;  %3380 = vrot.lane.b32.xlu0 %v3104_v15, %s4502_s29 }
 0x1c4   : > { %v2338_v57 = vshrl.u32 %v4205_v53, 16  ;;  %v4203_v60 = vpack.c.bf16 %v2132_v47, %v2132_v47  ;;  %v2135_v7 = vmax.f32 %v2041_v55, 0.0  ;;  %v2033_v3 = vadd.f32 %v5363_v42, %v2032_v37  ;;  %4307 = vmatprep.subr.bf16.mxu1 %v4425_v50 }
 0x1c5   : > { %v2341_v34 = vshll.u32 %v4205_v53, 16  ;;  %v2905_v47 = vshll.u32 %v5485_v44, 16  ;;  %4308 = vmatpush3.bf16.msra.mxu1 %v4425_v50 }
 0x1c6   : > { %v2340_v12 = vrot.slane %v2338_v57, 7  ;;  %v2321_v54 = vshrl.u32 %v4203_v60, 16  ;;  %v4206_v0 = vpack.c.bf16 %v2135_v7, %v2135_v7  ;;  %v2133_v63 = vmax.f32 %v2033_v3, 0.0 }
 0x1c7   : > { %v2324_v11 = vshll.u32 %v4203_v60, 16  ;;  %3144 = vrot.lane.b32.xlu1 %v3101_v4, %s4497_s24  ;;  %3146 = vrot.lane.b32.xlu0 %v3104_v15, %s4497_s24  ;;  %v2907_v15 = vrot.slane %v2905_v47, 1  ;;  %v2912_v60 = vrot.slane %v2910_v17, 1  ;;  %v2625_v47 = vld [vmem:[#allocation3 + $0x68] sm:$0x1] }
 0x1c8   : > { %v2343_v41 = vor.u32 %v2341_v34, %v2340_v12  ;;  %v2323_v22 = vrot.slane %v2321_v54, 7  ;;  %v2346_v61 = vshrl.u32 %v4206_v0, 16  ;;  %v4204_v25 = vpack.c.bf16 %v2133_v63, %v2133_v63 }
 0x1c9   : > { %v2349_v35 = vshll.u32 %v4206_v0, 16  ;;  %v2344_v56 = vrot.slane %v2340_v12, 4  ;;  %v2908_v57 = vor.u32 %v2907_v15, %v2903_v28 }
 0x1ca   : > { %v2608_v30 = vsel %vm4594_vm9, %v2343_v41, %v2607_v18  ;;  %v2326_v31 = vor.u32 %v2324_v11, %v2323_v22  ;;  %v2348_v32 = vrot.slane %v2346_v61, 7  ;;  %v2329_v10 = vshrl.u32 %v4204_v25, 16 }
 0x1cb   : > { %2609 = vst [vmem:[#allocation3 + $0x48] sm:$0xf] %v2608_v30  ;;  %3228 = vrot.lane.b32.xlu1 %v2925_v58, %s4503_s30  ;;  %3378 = vrot.lane.b32.xlu0 %v3101_v4, %s4502_s29  ;;  %v2332_v45 = vshll.u32 %v4204_v25, 16  ;;  %v2327_v51 = vrot.slane %v2323_v22, 4  ;;  %v2913_v7 = vsel %vm1091_vm7, %v2908_v57, %v2912_v60  ;;  %v439_v30 = vsel %vm4563_vm5, 0, %v438_v26 }
 0x1cc   : > { %v2601_v20 = vsel %vm4594_vm9, %v2326_v31, %v2600_v13  ;;  %v2351_v40 = vor.u32 %v2349_v35, %v2348_v32  ;;  %v2353_v23 = vrot.slane %v2348_v32, 4  ;;  %v2331_v24 = vrot.slane %v2329_v10, 7  ;;  %440 = vst [vmem:[#allocation3 + $0xc8] sm:$0x1] %v439_v30  ;;  %v2621_v10 = vld [vmem:[#allocation3 + $0x60] sm:$0xf] }
 0x1cd   : > { %2602 = vst [vmem:[#allocation3 + $0x3c] sm:$0xf] %v2601_v20  ;;  %v388_v13 = vsel %vm4548_vm3, 0, %v387_v21 }
 0x1ce   : > { %v2352_v29 = vsel %vm4602_vm10, %v2344_v56, %v2351_v40  ;;  %v2612_v46 = vsel %vm4548_vm3, %v2353_v23, %v2611_v36  ;;  %v2334_v39 = vor.u32 %v2332_v45, %v2331_v24  ;;  %v2336_v53 = vrot.slane %v2331_v24, 4  ;;  %389 = vst [vmem:[#allocation3 + $0xb4] sm:$0x1] %v388_v13  ;;  %v435_v36 = vld [vmem:[#allocation3 + $0xbc] sm:$0x1] }
 0x1cf   : > { %2610 = vst.msk [vmem:[#allocation3 + $0x4c] sm:$0xf] %vm226_vm0, %v2352_v29  ;;  %2613 = vst [vmem:[#allocation3 + $0x50] sm:$0x1] %v2612_v46  ;;  %3066 = vrot.lane.b32.xlu1 %v2925_v58, %s4498_s25  ;;  %3261 = vrot.lane.b32.xlu0 %v3101_v4, %s4501_s28  ;;  %v436_v20 = vsel %vm4563_vm5, 0, %v435_v36  ;;  %vm6354_vm5 = vcmask 261120  }
 0x1d0   : > { %v2335_v55 = vsel %vm4602_vm10, %v2327_v51, %v2334_v39  ;;  %v2605_v37 = vsel %vm4548_vm3, %v2336_v53, %v2604_v49  ;;  %437 = vst [vmem:[#allocation3 + $0xbc] sm:$0x1] %v436_v20  ;;  %v2614_v29 = vld [vmem:[#allocation3 + $0x54] sm:$0xf]  ;;  %vm6356_vm4 = vmmov %vm6354_vm5 }
 0x1d1   : > { %2603 = vst.msk [vmem:[#allocation3 + $0x40] sm:$0xf] %vm226_vm0, %v2335_v55  ;;  %2606 = vst [vmem:[#allocation3 + $0x44] sm:$0x1] %v2605_v37 }
 0x1d3   : > { %3345 = vrot.lane.b32.xlu0 %v2925_v58, %s4504_s6 }
 0x1d6   : > { %v5544_v62 = vld [vmem:[#allocation3 + $0x48] sm:$0xff]   ;;  %v5551_v3 = vld [vmem:[#allocation3 + $0x50] ss:$0 sps:$4 sm:$0x11]  }
 0x1d7   : > { %3185 = vrot.lane.b32.xlu1 %v5544_v62, %s4499_s26  ;;  %3302 = vrot.lane.b32.xlu0 %v5544_v62, %s4500_s27  ;;  %v3108_v34 = vrot.slane %v5544_v62, 1  ;;  %v3109_v54 = vrot.slane %v5551_v3, 1  ;;  %v2941_v63 = vshll.u32 %v5544_v62, 16  ;;  %v2939_v49 = vshrl.u32 %v5544_v62, 16 }
 0x1d8   : > { %v5558_v9 = vld [vmem:[#allocation3 + $0x3c] sm:$0xff]   ;;  %v5569_v11 = vld [vmem:[#allocation3 + $0x44] ss:$0 sps:$4 sm:$0x11]   ;;  %v2946_v50 = vshll.u32 %v5551_v3, 16 }
 0x1d9   : > { %v3110_v22 = vsel %vm1316_vm6, %v3108_v34, %v3109_v54  ;;  %v2943_v19 = vrot.slane %v2941_v63, 1  ;;  %v3105_v5 = vrot.slane %v5558_v9, 1  ;;  %v3106_v56 = vrot.slane %v5569_v11, 1 }
 0x1da   : > { %v2948_v3 = vrot.slane %v2946_v50, 1  ;;  %v2635_v50 = vld [vmem:[#allocation3 + $0x78] sm:$0xf] }
 0x1db   : > { %3343 = vrot.lane.b32.xlu1 %v2913_v7, %s4504_s6  ;;  %3226 = vrot.lane.b32.xlu0 %v2913_v7, %s4503_s30  ;;  %v3107_v37 = vsel %vm1316_vm6, %v3105_v5, %v3106_v56  ;;  %v2944_v15 = vor.u32 %v2943_v19, %v2939_v49 }
 0x1dd   : > { %v4285_v44 = vpop.f32.mrf.mxu0 }
 0x1de   : > { %v2054_v52 = vadd.f32 %v4285_v44, %v5363_v42 }
 0x1df   : > { %v2045_v12 = vpop.f32.mrf.mxu0  ;;  %3064 = vrot.lane.b32.xlu1 %v2913_v7, %s4498_s25  ;;  %3183 = vrot.lane.b32.xlu0 %v5558_v9, %s4499_s26 }
 0x1e0   : > { %v2138_v0 = vmax.f32 %v2054_v52, 0.0  ;;  %v2046_v16 = vadd.f32 %v5363_v42, %v2045_v12  ;;  %v2929_v52 = vshll.u32 %v5558_v9, 16 }
 0x1e1   : > { %v4286_v18 = vpop.f32.mrf.mxu0 }
 0x1e2   : > { %v4209_v4 = vpack.c.bf16 %v2138_v0, %v2138_v0  ;;  %v2136_v6 = vmax.f32 %v2046_v16, 0.0  ;;  %v2057_v8 = vadd.f32 %v4286_v18, %v5363_v42  ;;  %v2949_v0 = vsel %vm1091_vm7, %v2944_v15, %v2948_v3 }
 0x1e3   : > { %v2048_v41 = vpop.f32.mrf.mxu0  ;;  %3300 = vrot.lane.b32.xlu1 %v5558_v9, %s4500_s27  ;;  %3384 = vrot.lane.b32.xlu0 %v3110_v22, %s4502_s29  ;;  %v2931_v63 = vrot.slane %v2929_v52, 1 }
 0x1e4   : > { %v2372_v61 = vshrl.u32 %v4209_v4, 16  ;;  %v4207_v25 = vpack.c.bf16 %v2136_v6, %v2136_v6  ;;  %v2139_v27 = vmax.f32 %v2057_v8, 0.0  ;;  %v2049_v59 = vadd.f32 %v5363_v42, %v2048_v41 }
 0x1e5   : > { %v2375_v32 = vshll.u32 %v4209_v4, 16  ;;  %v2927_v4 = vshrl.u32 %v5558_v9, 16  ;;  %v2934_v6 = vshll.u32 %v5569_v11, 16 }
 0x1e6   : > { %v2374_v31 = vrot.slane %v2372_v61, 7  ;;  %v2355_v35 = vshrl.u32 %v4207_v25, 16  ;;  %v4210_v14 = vpack.c.bf16 %v2139_v27, %v2139_v27  ;;  %v2137_v58 = vmax.f32 %v2049_v59, 0.0 }
 0x1e7   : > { %v2358_v24 = vshll.u32 %v4207_v25, 16  ;;  %3267 = vrot.lane.b32.xlu1 %v3110_v22, %s4501_s28  ;;  %3150 = vrot.lane.b32.xlu0 %v3110_v22, %s4497_s24  ;;  %v2932_v21 = vor.u32 %v2931_v63, %v2927_v4  ;;  %v2936_v41 = vrot.slane %v2934_v6, 1  ;;  %v5626_v25 = vpop.permute.xlu0 %3058 }
 0x1e8   : > { %v2377_v40 = vor.u32 %v2375_v32, %v2374_v31  ;;  %v2357_v23 = vrot.slane %v2355_v35, 7  ;;  %v2380_v45 = vshrl.u32 %v4210_v14, 16  ;;  %v4208_v46 = vpack.c.bf16 %v2137_v58, %v2137_v58 }
 0x1e9   : > { %v2383_v53 = vshll.u32 %v4210_v14, 16  ;;  %v2378_v28 = vrot.slane %v2374_v31, 4  ;;  %v2937_v22 = vsel %vm1091_vm7, %v2932_v21, %v2936_v41  ;;  %v2632_v21 = vld [vmem:[#allocation3 + $0x74] sm:$0x1] }
 0x1ea   : > { %v2622_v51 = vsel %vm4594_vm9, %v2377_v40, %v2621_v10  ;;  %v2360_v2 = vor.u32 %v2358_v24, %v2357_v23  ;;  %v2382_v39 = vrot.slane %v2380_v45, 7  ;;  %v2363_v55 = vshrl.u32 %v4208_v46, 16 }
 0x1eb   : > { %2623 = vst [vmem:[#allocation3 + $0x60] sm:$0xf] %v2622_v51  ;;  %3148 = vrot.lane.b32.xlu1 %v3107_v37, %s4497_s24  ;;  %3382 = vrot.lane.b32.xlu0 %v3107_v37, %s4502_s29  ;;  %v2366_v7 = vshll.u32 %v4208_v46, 16  ;;  %v2361_v12 = vrot.slane %v2357_v23, 4  ;;  %v5642_v23 = vpop.permute.xlu0 %3138 }
 0x1ec   : > { %v2615_v17 = vsel %vm4594_vm9, %v2360_v2, %v2614_v29  ;;  %v2385_v57 = vor.u32 %v2383_v53, %v2382_v39  ;;  %v2387_v62 = vrot.slane %v2382_v39, 4  ;;  %v2365_v60 = vrot.slane %v2363_v55, 7 }
 0x1ed   : > { %2616 = vst [vmem:[#allocation3 + $0x54] sm:$0xf] %v2615_v17 }
 0x1ee   : > { %v2386_v38 = vsel %vm4602_vm10, %v2378_v28, %v2385_v57  ;;  %v2626_v44 = vsel %vm4548_vm3, %v2387_v62, %v2625_v47  ;;  %v2368_v34 = vor.u32 %v2366_v7, %v2365_v60  ;;  %v2370_v54 = vrot.slane %v2365_v60, 4 }
 0x1ef   : > { %2624 = vst.msk [vmem:[#allocation3 + $0x64] sm:$0xf] %vm226_vm0, %v2386_v38  ;;  %2627 = vst [vmem:[#allocation3 + $0x68] sm:$0x1] %v2626_v44  ;;  %3232 = vrot.lane.b32.xlu1 %v2949_v0, %s4503_s30  ;;  %3265 = vrot.lane.b32.xlu0 %v3107_v37, %s4501_s28  ;;  %v2639_v44 = vld [vmem:[#allocation3 + $0x80] sm:$0x1] }
 0x1f0   : > { %v2369_v16 = vsel %vm4602_vm10, %v2361_v12, %v2368_v34  ;;  %v2619_v18 = vsel %vm4548_vm3, %v2370_v54, %v2618_v48 }
 0x1f1   : > { %2617 = vst.msk [vmem:[#allocation3 + $0x58] sm:$0xf] %vm226_vm0, %v2369_v16  ;;  %2620 = vst [vmem:[#allocation3 + $0x5c] sm:$0x1] %v2619_v18 }
 0x1f3   : > { %3070 = vrot.lane.b32.xlu1 %v2949_v0, %s4498_s25  ;;  %3349 = vrot.lane.b32.xlu0 %v2949_v0, %s4504_s6 }
 0x1f6   : > { %v5612_v8 = vld [vmem:[#allocation3 + $0x60] sm:$0xff]   ;;  %v5619_v13 = vld [vmem:[#allocation3 + $0x68] ss:$0 sps:$4 sm:$0x11]  }
 0x1f7   : > { %3189 = vrot.lane.b32.xlu1 %v5612_v8, %s4499_s26  ;;  %3306 = vrot.lane.b32.xlu0 %v5612_v8, %s4500_s27  ;;  %v3114_v26 = vrot.slane %v5612_v8, 1  ;;  %v3115_v59 = vrot.slane %v5619_v13, 1  ;;  %v2965_v5 = vshll.u32 %v5612_v8, 16  ;;  %v2963_v17 = vshrl.u32 %v5612_v8, 16 }
 0x1f8   : > { %v5624_v61 = vld [vmem:[#allocation3 + $0x54] sm:$0xff]   ;;  %v5636_v58 = vld [vmem:[#allocation3 + $0x5c] ss:$0 sps:$4 sm:$0x11]   ;;  %v2970_v57 = vshll.u32 %v5619_v13, 16 }
 0x1f9   : > { %v3116_v10 = vsel %vm1316_vm6, %v3114_v26, %v3115_v59  ;;  %v3111_v2 = vrot.slane %v5624_v61, 1  ;;  %v3112_v39 = vrot.slane %v5636_v58, 1  ;;  %v2967_v53 = vrot.slane %v2965_v5, 1 }
 0x1fa   : > { %v2972_v4 = vrot.slane %v2970_v57, 1  ;;  %v2953_v13 = vshll.u32 %v5624_v61, 16 }
 0x1fb   : > { %3347 = vrot.lane.b32.xlu1 %v2937_v22, %s4504_s6  ;;  %3230 = vrot.lane.b32.xlu0 %v2937_v22, %s4503_s30  ;;  %v3113_v52 = vsel %vm1316_vm6, %v3111_v2, %v3112_v39  ;;  %v2968_v12 = vor.u32 %v2967_v53, %v2963_v17 }
 0x1fc   : > { %v4289_v9 = vpop.f32.mrf.mxu0 }
 0x1fd   : > { %v2070_v11 = vadd.f32 %v4289_v9, %v5363_v42  ;;  %v2973_v26 = vsel %vm1091_vm7, %v2968_v12, %v2972_v4 }
 0x1fe   : > { %v2061_v27 = vpop.f32.mrf.mxu0 }
 0x1ff   : > { %v2142_v19 = vmax.f32 %v2070_v11, 0.0  ;;  %v2062_v30 = vadd.f32 %v5363_v42, %v2061_v27  ;;  %3068 = vrot.lane.b32.xlu1 %v2937_v22, %s4498_s25  ;;  %3187 = vrot.lane.b32.xlu0 %v5624_v61, %s4499_s26 }
 0x200   : > { %v4290_v31 = vpop.f32.mrf.mxu0 }
 0x201   : > { %v4213_v32 = vpack.c.bf16 %v2142_v19, %v2142_v19  ;;  %v2140_v35 = vmax.f32 %v2062_v30, 0.0  ;;  %v2073_v14 = vadd.f32 %v4290_v31, %v5363_v42  ;;  %v2955_v30 = vrot.slane %v2953_v13, 1 }
 0x202   : > { %v2064_v36 = vpop.f32.mrf.mxu0 }
 0x203   : > { %v2406_v56 = vshrl.u32 %v4213_v32, 16  ;;  %v4211_v20 = vpack.c.bf16 %v2140_v35, %v2140_v35  ;;  %v2143_v40 = vmax.f32 %v2073_v14, 0.0  ;;  %3304 = vrot.lane.b32.xlu1 %v5624_v61, %s4500_s27  ;;  %3388 = vrot.lane.b32.xlu0 %v3116_v10, %s4502_s29  ;;  %v2065_v24 = vadd.f32 %v5363_v42, %v2064_v36  ;;  %v2628_v42 = vld [vmem:[#allocation3 + $0x6c] sm:$0xf] }
 0x204   : > { %v2409_v29 = vshll.u32 %v4213_v32, 16  ;;  %v2951_v35 = vshrl.u32 %v5624_v61, 16  ;;  %v2958_v14 = vshll.u32 %v5636_v58, 16  ;;  %v5704_v58 = vld [vmem:[%s6337_s2] ss:$0 sm:$0xff] }
 0x205   : > { %v2408_v45 = vrot.slane %v2406_v56, 7  ;;  %v2389_v46 = vshrl.u32 %v4211_v20, 16  ;;  %v4214_v49 = vpack.c.bf16 %v2143_v40, %v2143_v40  ;;  %v2141_v51 = vmax.f32 %v2065_v24, 0.0 }
 0x206   : > { %v2392_v37 = vshll.u32 %v4211_v20, 16  ;;  %v2960_v5 = vrot.slane %v2958_v14, 1 }
 0x207   : > { %v2411_v47 = vor.u32 %v2409_v29, %v2408_v45  ;;  %v2391_v55 = vrot.slane %v2389_v46, 7  ;;  %v2414_v15 = vshrl.u32 %v4214_v49, 16  ;;  %3271 = vrot.lane.b32.xlu1 %v3116_v10, %s4501_s28  ;;  %3154 = vrot.lane.b32.xlu0 %v3116_v10, %s4497_s24  ;;  %v4212_v28 = vpack.c.bf16 %v2141_v51, %v2141_v51 }
 0x208   : > { %v2417_v3 = vshll.u32 %v4214_v49, 16  ;;  %v2412_v34 = vrot.slane %v2408_v45, 4  ;;  %v2956_v10 = vor.u32 %v2955_v30, %v2951_v35  ;;  %v2642_v30 = vld [vmem:[#allocation3 + $0x84] sm:$0xf] }
 0x209   : > { %v2636_v62 = vsel %vm4594_vm9, %v2411_v47, %v2635_v50  ;;  %v2394_v60 = vor.u32 %v2392_v37, %v2391_v55  ;;  %v2416_v7 = vrot.slane %v2414_v15, 7  ;;  %v5653_v38 = vpop.permute.xlu0 %3294  ;;  %v2397_v48 = vshrl.u32 %v4212_v28, 16  ;;  %v5664_v41 = vpop.permute.xlu1 %3177 }
 0x20a   : > { %2637 = vst [vmem:[#allocation3 + $0x78] sm:$0xf] %v2636_v62  ;;  %v2400_v63 = vshll.u32 %v4212_v28, 16  ;;  %v2395_v9 = vrot.slane %v2391_v55, 4  ;;  %v2961_v40 = vsel %vm1091_vm7, %v2956_v10, %v2960_v5 }
 0x20b   : > { %v2629_v54 = vsel %vm4594_vm9, %v2394_v60, %v2628_v42  ;;  %v2419_v0 = vor.u32 %v2417_v3, %v2416_v7  ;;  %v2421_v16 = vrot.slane %v2416_v7, 4  ;;  %3152 = vrot.lane.b32.xlu1 %v3113_v52, %s4497_s24  ;;  %3386 = vrot.lane.b32.xlu0 %v3113_v52, %s4502_s29  ;;  %v2399_v18 = vrot.slane %v2397_v48, 7  ;;  %v4446_v48 = vld [vmem:[#allocation3] sm:$0xff]  }
 0x20c   : > { %2630 = vst [vmem:[#allocation3 + $0x6c] sm:$0xf] %v2629_v54 }
 0x20d   : > { %v2420_v6 = vsel %vm4602_vm10, %v2412_v34, %v2419_v0  ;;  %v2640_v8 = vsel %vm4548_vm3, %v2421_v16, %v2639_v44  ;;  %v5666_v22 = vpop.permute.xlu0 %3175  ;;  %v2402_v11 = vor.u32 %v2400_v63, %v2399_v18  ;;  %v2404_v27 = vrot.slane %v2399_v18, 4  ;;  %v5678_v31 = vpop.permute.xlu1 %3259 }
 0x20e   : > { %2638 = vst.msk [vmem:[#allocation3 + $0x7c] sm:$0xf] %vm226_vm0, %v2420_v6  ;;  %2641 = vst [vmem:[#allocation3 + $0x80] sm:$0x1] %v2640_v8  ;;  %v2649_v8 = vld [vmem:[#allocation3 + $0x90] sm:$0xf] }
 0x20f   : > { %3236 = vrot.lane.b32.xlu1 %v2973_v26, %s4503_s30  ;;  %3269 = vrot.lane.b32.xlu0 %v3113_v52, %s4501_s28  ;;  %v2403_v59 = vsel %vm4602_vm10, %v2395_v9, %v2402_v11  ;;  %v2633_v19 = vsel %vm4548_vm3, %v2404_v27, %v2632_v21  ;;  %v3409_v52 = vsel %vm1635_vm12, %v4446_v48, %v5626_v25 }
 0x210   : > { %2631 = vst.msk [vmem:[#allocation3 + $0x70] sm:$0xf] %vm226_vm0, %v2403_v59  ;;  %2634 = vst [vmem:[#allocation3 + $0x74] sm:$0x1] %v2633_v19  ;;  %v3441_v19 = vsel %vm1668_vm13, %v3409_v52, %v5642_v23 }
 0x211   : > { %v5680_v32 = vpop.permute.xlu0 %3376  ;;  %v5692_v56 = vpop.permute.xlu1 %3140 }
 0x213   : > { %3074 = vrot.lane.b32.xlu1 %v2973_v26, %s4498_s25  ;;  %3353 = vrot.lane.b32.xlu0 %v2973_v26, %s4504_s6 }
 0x215   : > { %v5686_v36 = vld [vmem:[#allocation3 + $0x78] sm:$0xff]   ;;  %v5694_v20 = vpop.permute.xlu0 %3142  ;;  %v5697_v24 = vld [vmem:[#allocation3 + $0x80] ss:$0 sps:$4 sm:$0x11]   ;;  %v5713_v2 = vpop.permute.xlu1 %3224 }
 0x216   : > { %v3120_v49 = vrot.slane %v5686_v36, 1  ;;  %v3121_v50 = vrot.slane %v5697_v24, 1  ;;  %v2989_v37 = vshll.u32 %v5686_v36, 16  ;;  %v2987_v9 = vshrl.u32 %v5686_v36, 16 }
 0x217   : > { %3193 = vrot.lane.b32.xlu1 %v5686_v36, %s4499_s26  ;;  %3310 = vrot.lane.b32.xlu0 %v5686_v36, %s4500_s27  ;;  %v5707_v29 = vld [vmem:[#allocation3 + $0x6c] sm:$0xff]   ;;  %v5711_v51 = vld [vmem:[#allocation3 + $0x74] ss:$0 sps:$4 sm:$0x11]   ;;  %v2994_v25 = vshll.u32 %v5697_v24, 16 }
 0x218   : > { %v5724_v57 = vsel %vm1316_vm6, %v3120_v49, %v3121_v50  ;;  %v3117_v62 = vrot.slane %v5707_v29, 1  ;;  %v3118_v60 = vrot.slane %v5711_v51, 1  ;;  %v2991_v34 = vrot.slane %v2989_v37, 1 }
 0x219   : > { %v5715_v39 = vpop.permute.xlu0 %3257  ;;  %v2977_v54 = vshll.u32 %v5707_v29, 16  ;;  %v5736_v0 = vpop.permute.xlu1 %3062  ;;  %v2996_v50 = vrot.slane %v2994_v25, 1  ;;  %v2975_v23 = vshrl.u32 %v5707_v29, 16 }
 0x21a   : > { %v3119_v13 = vsel %vm1316_vm6, %v3117_v62, %v3118_v60  ;;  %v2992_v14 = vor.u32 %v2991_v34, %v2987_v9 }
 0x21b   : > { %3351 = vrot.lane.b32.xlu1 %v2961_v40, %s4504_s6  ;;  %3234 = vrot.lane.b32.xlu0 %v2961_v40, %s4503_s30  ;;  %v2979_v10 = vrot.slane %v2977_v54, 1 }
 0x21c   : > { %v4293_v61 = vpop.f32.mrf.mxu0  ;;  %v2997_v48 = vsel %vm1091_vm7, %v2992_v14, %v2996_v50 }
 0x21d   : > { %v2086_v45 = vadd.f32 %v5704_v58, %v4293_v61  ;;  %v5738_v4 = vpop.permute.xlu0 %3341  ;;  %v2980_v52 = vor.u32 %v2979_v10, %v2975_v23 }
 0x21e   : > { %v2077_v46 = vpop.f32.mrf.mxu0 }
 0x21f   : > { %v2146_v53 = vmax.f32 %v2086_v45, 0.0  ;;  %v2078_v47 = vadd.f32 %v5704_v58, %v2077_v46  ;;  %3072 = vrot.lane.b32.xlu1 %v2961_v40, %s4498_s25  ;;  %3191 = vrot.lane.b32.xlu0 %v5707_v29, %s4499_s26  ;;  %v2653_v46 = vld [vmem:[#allocation3 + $0x98] sm:$0x1] }
 0x220   : > { %v4294_v55 = vpop.f32.mrf.mxu0 }
 0x221   : > { %v4217_v15 = vpack.c.bf16 %v2146_v53, %v2146_v53  ;;  %v2144_v42 = vmax.f32 %v2078_v47, 0.0  ;;  %v2089_v28 = vadd.f32 %v5704_v58, %v4294_v55 }
 0x222   : > { %v2080_v17 = vpop.f32.mrf.mxu0 }
 0x223   : > { %v2440_v7 = vshrl.u32 %v4217_v15, 16  ;;  %v4215_v3 = vpack.c.bf16 %v2144_v42, %v2144_v42  ;;  %v2147_v44 = vmax.f32 %v2089_v28, 0.0  ;;  %3308 = vrot.lane.b32.xlu1 %v5707_v29, %s4500_s27  ;;  %3392 = vrot.lane.b32.xlu0 %v5724_v57, %s4502_s29  ;;  %v2081_v12 = vadd.f32 %v5704_v58, %v2080_v17 }
 0x224   : > { %v2443_v18 = vshll.u32 %v4217_v15, 16  ;;  %v3473_v15 = vsel %vm1701_vm14, %v3441_v19, %v5666_v22  ;;  %v2982_v17 = vshll.u32 %v5711_v51, 16  ;;  %v4447_v19 = vld [vmem:[#allocation3 + $0xc] sm:$0xff]  }
 0x225   : > { %v2442_v16 = vrot.slane %v2440_v7, 7  ;;  %v2423_v63 = vshrl.u32 %v4215_v3, 16  ;;  %v4218_v6 = vpack.c.bf16 %v2147_v44, %v2147_v44  ;;  %v2145_v21 = vmax.f32 %v2081_v12, 0.0  ;;  %v2646_v7 = vld [vmem:[#allocation3 + $0x8c] sm:$0x1] }
 0x226   : > { %v2426_v26 = vshll.u32 %v4215_v3, 16 }
 0x227   : > { %v2445_v11 = vor.u32 %v2443_v18, %v2442_v16  ;;  %v2425_v27 = vrot.slane %v2423_v63, 7  ;;  %v2448_v59 = vshrl.u32 %v4218_v6, 16  ;;  %3275 = vrot.lane.b32.xlu1 %v5724_v57, %s4501_s28  ;;  %3390 = vrot.lane.b32.xlu0 %v3119_v13, %s4502_s29  ;;  %v4216_v35 = vpack.c.bf16 %v2145_v21, %v2145_v21 }
 0x228   : > { %v2451_v24 = vshll.u32 %v4218_v6, 16  ;;  %v2446_v53 = vrot.slane %v2442_v16, 4  ;;  %v2984_v63 = vrot.slane %v2982_v17, 1 }
 0x229   : > { %v2650_v36 = vsel %vm4594_vm9, %v2445_v11, %v2649_v8  ;;  %v2428_v5 = vor.u32 %v2426_v26, %v2425_v27  ;;  %v2450_v40 = vrot.slane %v2448_v59, 7  ;;  %v5750_v61 = vpop.permute.xlu1 %3181  ;;  %v5752_v45 = vpop.permute.xlu0 %3298  ;;  %v2431_v49 = vshrl.u32 %v4216_v35, 16 }
 0x22a   : > { %2651 = vst [vmem:[#allocation3 + $0x90] sm:$0xf] %v2650_v36  ;;  %v2434_v28 = vshll.u32 %v4216_v35, 16  ;;  %v2429_v12 = vrot.slane %v2425_v27, 4 }
 0x22b   : > { %v2643_v47 = vsel %vm4594_vm9, %v2428_v5, %v2642_v30  ;;  %v2453_v55 = vor.u32 %v2451_v24, %v2450_v40  ;;  %v2455_v37 = vrot.slane %v2450_v40, 4  ;;  %3156 = vrot.lane.b32.xlu1 %v3119_v13, %s4497_s24  ;;  %3273 = vrot.lane.b32.xlu0 %v3119_v13, %s4501_s28  ;;  %v2433_v42 = vrot.slane %v2431_v49, 7 }
 0x22c   : > { %2644 = vst [vmem:[#allocation3 + $0x84] sm:$0xf] %v2643_v47  ;;  %v2985_v13 = vsel %vm1091_vm7, %v2980_v52, %v2984_v63  ;;  %v2663_v63 = vld [vmem:[#allocation3 + $0xa8] sm:$0xf] }
 0x22d   : > { %v2454_v62 = vsel %vm4602_vm10, %v2446_v53, %v2453_v55  ;;  %v2654_v60 = vsel %vm4548_vm3, %v2455_v37, %v2653_v46  ;;  %v3061_v3 = vpop.permute.xlu1 %3060  ;;  %v3223_v44 = vpop.permute.xlu0 %3222  ;;  %v2436_v22 = vor.u32 %v2434_v28, %v2433_v42  ;;  %v2438_v34 = vrot.slane %v2433_v42, 4 }
 0x22e   : > { %2652 = vst.msk [vmem:[#allocation3 + $0x94] sm:$0xf] %vm226_vm0, %v2454_v62  ;;  %2655 = vst [vmem:[#allocation3 + $0x98] sm:$0x1] %v2654_v60  ;;  %v3505_v51 = vsel %vm1734_vm15, %v3473_v15, %v3223_v44  ;;  %v3411_v30 = vsel %vm1635_vm12, %v4447_v19, %v3061_v3  ;;  %v2656_v19 = vld [vmem:[#allocation3 + $0x9c] sm:$0xf] }
 0x22f   : > { %v3537_v54 = vsel %vm1767_vm1, %v3505_v51, %v5715_v39  ;;  %3240 = vrot.lane.b32.xlu1 %v2997_v48, %s4503_s30  ;;  %3357 = vrot.lane.b32.xlu0 %v2997_v48, %s4504_s6  ;;  %v2437_v16 = vsel %vm4602_vm10, %v2429_v12, %v2436_v22  ;;  %v2647_v18 = vsel %vm4548_vm3, %v2438_v34, %v2646_v7  ;;  %v4448_v7 = vld [vmem:[#allocation3 + $0x18] sm:$0xff]  }
 0x230   : > { %v3569_v6 = vsel %vm1800_vm2, %v3537_v54, %v5653_v38  ;;  %2645 = vst.msk [vmem:[#allocation3 + $0x88] sm:$0xf] %vm226_vm0, %v2437_v16  ;;  %2648 = vst [vmem:[#allocation3 + $0x8c] sm:$0x1] %v2647_v18  ;;  %v3443_v40 = vsel %vm1668_vm13, %v3411_v30, %v5692_v56  ;;  %v3413_v3 = vsel %vm1635_vm12, %v4448_v7, %v5736_v0 }
 0x231   : > { %v5780_v8 = vpop.permute.xlu1 %3296  ;;  %v5782_v39 = vpop.permute.xlu0 %3179  ;;  %v3601_v21 = vsel %vm1833_vm8, %v3569_v6, %v5738_v4  ;;  %v3475_v56 = vsel %vm1701_vm14, %v3443_v40, %v5664_v41 }
 0x232   : > { %v3633_v9 = vsel %vm6354_vm5, %v3601_v21, %v5680_v32  ;;  %v3507_v41 = vsel %vm1734_vm15, %v3475_v56, %v5713_v2  ;;  %vm6357_vm5 = vmmov %vm6355_vm11 }
 0x233   : > { %3078 = vrot.lane.b32.xlu1 %v2997_v48, %s4498_s25  ;;  %3238 = vrot.lane.b32.xlu0 %v2985_v13, %s4503_s30 }
 0x234   : > { %4309 = vmatprep.mubr.msk.bf16.mxu1 %vm6355_vm11, %v3633_v9  ;;  %vm6358_vm11 = vmmov %vm6356_vm4 }
 0x235   : > { %v5792_v38 = vpop.permute.xlu1 %3263  ;;  %v5794_v25 = vpop.permute.xlu0 %3380  ;;  %v5823_v37 = vld [vmem:[#allocation3 + $0x90] sm:$0xff]  }
 0x237   : > { %3355 = vrot.lane.b32.xlu1 %v2985_v13, %s4504_s6  ;;  %v5797_v11 = vld [vmem:[#allocation3 + $0x84] sm:$0xff]   ;;  %v4422_v26 = vld [vmem:[#allocation3 + $0x8c] ss:$0 sps:$4 sm:$0x11]  }
 0x238   : > { %v3123_v32 = vrot.slane %v5797_v11, 1  ;;  %v3001_v59 = vshll.u32 %v5797_v11, 16  ;;  %v3124_v35 = vrot.slane %v4422_v26, 1  ;;  %v2999_v47 = vshrl.u32 %v5797_v11, 16 }
 0x239   : > { %v5799_v4 = vpop.permute.xlu1 %3144  ;;  %v5801_v27 = vpop.permute.xlu0 %3146  ;;  %v3006_v55 = vshll.u32 %v4422_v26, 16 }
 0x23a   : > { %v5809_v36 = vsel %vm1316_vm6, %v3123_v32, %v3124_v35  ;;  %v3003_v46 = vrot.slane %v3001_v59, 1  ;;  %v3539_v32 = vsel %vm1767_vm1, %v3507_v41, %v5678_v31  ;;  %v3445_v59 = vsel %vm1668_vm13, %v3413_v3, %v5694_v20  ;;  %v5852_v35 = vld [vmem:[#allocation3 + $0x98] ss:$0 sps:$4 sm:$0x11]   ;;  %v2667_v20 = vld [vmem:[#allocation3 + $0xb0] sm:$0x1] }
 0x23b   : > { %3076 = vrot.lane.b32.xlu1 %v2985_v13, %s4498_s25  ;;  %3394 = vrot.lane.b32.xlu0 %v5809_v36, %s4502_s29  ;;  %v3008_v22 = vrot.slane %v3006_v55, 1  ;;  %v3477_v31 = vsel %vm1701_vm14, %v3445_v59, %v5782_v39 }
 0x23c   : > { %v4297_v14 = vpop.f32.mrf.mxu0  ;;  %v3004_v60 = vor.u32 %v3003_v46, %v2999_v47  ;;  %v3011_v47 = vshrl.u32 %v5823_v37, 16 }
 0x23d   : > { %v2102_v10 = vadd.f32 %v5704_v58, %v4297_v14  ;;  %v5811_v5 = vpop.permute.xlu0 %3378  ;;  %v5817_v50 = vpop.permute.xlu1 %3228 }
 0x23e   : > { %v2093_v24 = vpop.f32.mrf.mxu0  ;;  %v3009_v2 = vsel %vm1091_vm7, %v3004_v60, %v3008_v22  ;;  %v3018_v60 = vshll.u32 %v5852_v35, 16 }
 0x23f   : > { %v2150_v49 = vmax.f32 %v2102_v10, 0.0  ;;  %v2094_v23 = vadd.f32 %v5704_v58, %v2093_v24  ;;  %3312 = vrot.lane.b32.xlu1 %v5797_v11, %s4500_s27  ;;  %3158 = vrot.lane.b32.xlu0 %v5724_v57, %s4497_s24  ;;  %v3013_v57 = vshll.u32 %v5823_v37, 16 }
 0x240   : > { %v4298_v53 = vpop.f32.mrf.mxu0 }
 0x241   : > { %v4221_v15 = vpack.c.bf16 %v2150_v49, %v2150_v49  ;;  %v2148_v42 = vmax.f32 %v2094_v23, 0.0  ;;  %v2105_v28 = vadd.f32 %v5704_v58, %v4298_v53  ;;  %v5828_v17 = vpop.permute.xlu0 %3261  ;;  %v5840_v18 = vpop.permute.xlu1 %3066  ;;  %v3015_v14 = vrot.slane %v3013_v57, 1 }
 0x242   : > { %v2096_v62 = vpop.f32.mrf.mxu0 }
 0x243   : > { %v2474_v44 = vshrl.u32 %v4221_v15, 16  ;;  %v4219_v48 = vpack.c.bf16 %v2148_v42, %v2148_v42  ;;  %v2151_v52 = vmax.f32 %v2105_v28, 0.0  ;;  %3160 = vrot.lane.b32.xlu1 %v5809_v36, %s4497_s24  ;;  %v2097_v12 = vadd.f32 %v5704_v58, %v2096_v62  ;;  %3195 = vrot.lane.b32.xlu0 %v5797_v11, %s4499_s26 }
 0x244   : > { %v2477_v51 = vshll.u32 %v4221_v15, 16  ;;  %v3571_v28 = vsel %vm1800_vm2, %v3539_v32, %v5780_v8 }
 0x245   : > { %v2476_v34 = vrot.slane %v2474_v44, 7  ;;  %v2457_v54 = vshrl.u32 %v4219_v48, 16  ;;  %v4222_v16 = vpack.c.bf16 %v2151_v52, %v2151_v52  ;;  %v5842_v0 = vpop.permute.xlu0 %3345  ;;  %v2149_v6 = vmax.f32 %v2097_v12, 0.0 }
 0x246   : > { %v2460_v9 = vshll.u32 %v4219_v48, 16  ;;  %v2660_v48 = vld [vmem:[#allocation3 + $0xa4] sm:$0x1]  ;;  %v3016_v12 = vor.u32 %v3015_v14, %v3011_v47 }
 0x247   : > { %v2479_v21 = vor.u32 %v2477_v51, %v2476_v34  ;;  %v2459_v13 = vrot.slane %v2457_v54, 7  ;;  %v2482_v26 = vshrl.u32 %v4222_v16, 16  ;;  %3359 = vrot.lane.b32.xlu1 %v3009_v2, %s4504_s6  ;;  %v4220_v30 = vpack.c.bf16 %v2149_v6, %v2149_v6  ;;  %3242 = vrot.lane.b32.xlu0 %v3009_v2, %s4503_s30 }
 0x248   : > { %v2485_v46 = vshll.u32 %v4222_v16, 16  ;;  %v2480_v55 = vrot.slane %v2476_v34, 4  ;;  %v3020_v6 = vrot.slane %v3018_v60, 1 }
 0x249   : > { %v2664_v10 = vsel %vm4594_vm9, %v2479_v21, %v2663_v63  ;;  %v2462_v40 = vor.u32 %v2460_v9, %v2459_v13  ;;  %v2484_v24 = vrot.slane %v2482_v26, 7  ;;  %v5856_v49 = vpop.permute.xlu1 %3185  ;;  %v5858_v23 = vpop.permute.xlu0 %3302  ;;  %v2465_v53 = vshrl.u32 %v4220_v30, 16 }
 0x24a   : > { %2665 = vst [vmem:[#allocation3 + $0xa8] sm:$0xf] %v2664_v10  ;;  %v2468_v62 = vshll.u32 %v4220_v30, 16  ;;  %v2463_v7 = vrot.slane %v2459_v13, 4  ;;  %v5900_v21 = vsel %vm1091_vm7, %v3016_v12, %v3020_v6  ;;  %v3126_v13 = vrot.slane %v5823_v37, 1 }
 0x24b   : > { %v2657_v56 = vsel %vm4594_vm9, %v2462_v40, %v2656_v19  ;;  %v2487_v15 = vor.u32 %v2485_v46, %v2484_v24  ;;  %v2489_v42 = vrot.slane %v2484_v24, 4  ;;  %3080 = vrot.lane.b32.xlu1 %v3009_v2, %s4498_s25  ;;  %v2467_v39 = vrot.slane %v2465_v53, 7  ;;  %3277 = vrot.lane.b32.xlu0 %v5809_v36, %s4501_s28 }
 0x24c   : > { %2658 = vst [vmem:[#allocation3 + $0x9c] sm:$0xf] %v2657_v56  ;;  %v3127_v9 = vrot.slane %v5852_v35, 1  ;;  %v4449_v56 = vld [vmem:[#allocation3 + $0x24] sm:$0xff]  }
 0x24d   : > { %v2488_v3 = vsel %vm4602_vm10, %v2480_v55, %v2487_v15  ;;  %v2668_v44 = vsel %vm4548_vm3, %v2489_v42, %v2667_v20  ;;  %v3344_v52 = vpop.permute.xlu1 %3343  ;;  %v3227_v41 = vpop.permute.xlu0 %3226  ;;  %v2470_v8 = vor.u32 %v2468_v62, %v2467_v39  ;;  %v2472_v22 = vrot.slane %v2467_v39, 4 }
 0x24e   : > { %2666 = vst.msk [vmem:[#allocation3 + $0xac] sm:$0xf] %vm226_vm0, %v2488_v3  ;;  %2669 = vst [vmem:[#allocation3 + $0xb0] sm:$0x1] %v2668_v44  ;;  %v3603_v57 = vsel %vm1833_vm8, %v3571_v28, %v3344_v52  ;;  %v3509_v34 = vsel %vm1734_vm15, %v3477_v31, %v3227_v41  ;;  %v3128_v32 = vsel %vm1316_vm6, %v3126_v13, %v3127_v9 }
 0x24f   : > { %v3541_v51 = vsel %vm1767_vm1, %v3509_v34, %v5828_v17  ;;  %3197 = vrot.lane.b32.xlu1 %v5823_v37, %s4499_s26  ;;  %v3635_v54 = vsel %vm6356_vm4, %v3603_v57, %v5811_v5  ;;  %v2471_v16 = vsel %vm4602_vm10, %v2463_v7, %v2470_v8  ;;  %v2661_v63 = vsel %vm4548_vm3, %v2472_v22, %v2660_v48  ;;  %vm6359_vm4 = vmmov %vm6357_vm5 }
 0x250   : > { %v3573_v36 = vsel %vm1800_vm2, %v3541_v51, %v5752_v45  ;;  %4310 = vmatmul.mubr.msk.bf16.vlgmr.msra.gmra.mxu1 %vm6357_vm5, %v3635_v54  ;;  %2659 = vst.msk [vmem:[#allocation3 + $0xa0] sm:$0xf] %vm226_vm0, %v2471_v16  ;;  %2662 = vst [vmem:[#allocation3 + $0xa4] sm:$0x1] %v2661_v63  ;;  %3314 = vrot.lane.b32.xlu0 %v5823_v37, %s4500_s27 }
 0x251   : > { %v3065_v17 = vpop.permute.xlu1 %3064  ;;  %v5893_v2 = vpop.permute.xlu0 %3183  ;;  %v3605_v5 = vsel %vm1833_vm8, %v3573_v36, %v5842_v0 }
 0x252   : > { %v3637_v45 = vsel %vm6358_vm11, %v3605_v5, %v5794_v25  ;;  %v3415_v15 = vsel %vm1635_vm12, %v4449_v56, %v3065_v17  ;;  %v2677_v17 = vld [vmem:[#allocation3 + $0xc0] sm:$0xf] }
 0x253   : > { %3244 = vrot.lane.b32.xlu1 %v5900_v21, %s4503_s30  ;;  %4313 = vmatprep.mubr.msk.bf16.mxu1 %vm6359_vm4, %v3637_v45  ;;  %v3447_v41 = vsel %vm1668_vm13, %v3415_v15, %v5799_v4 }
 0x254   : > { %3361 = vrot.lane.b32.xlu0 %v5900_v21, %s4504_s6  ;;  %v3479_v4 = vsel %vm1701_vm14, %v3447_v41, %v5750_v61 }
 0x255   : > { %v5909_v26 = vpop.permute.xlu1 %3300  ;;  %v5911_v0 = vpop.permute.xlu0 %3384 }
 0x257   : > { %3279 = vrot.lane.b32.xlu1 %v3128_v32, %s4501_s28  ;;  %v5917_v25 = vld [vmem:[#allocation3 + $0x9c] sm:$0xff]   ;;  %v4429_v30 = vld [vmem:[#allocation3 + $0xa4] ss:$0 sps:$4 sm:$0x11]  }
 0x258   : > { %3396 = vrot.lane.b32.xlu0 %v3128_v32, %s4502_s29  ;;  %v3129_v10 = vrot.slane %v5917_v25, 1  ;;  %v3025_v40 = vshll.u32 %v5917_v25, 16  ;;  %v3130_v46 = vrot.slane %v4429_v30, 1  ;;  %v3030_v31 = vshll.u32 %v4429_v30, 16 }
 0x259   : > { %v4301_v59 = vpop.f32.mrf.mxu0  ;;  %v5919_v19 = vpop.permute.xlu1 %3267  ;;  %v3023_v47 = vshrl.u32 %v5917_v25, 16 }
 0x25a   : > { %v2118_v35 = vadd.f32 %v5704_v58, %v4301_v59  ;;  %v5923_v14 = vpop.permute.xlu0 %3150  ;;  %v3027_v55 = vrot.slane %v3025_v40, 1  ;;  %v5933_v28 = vsel %vm1316_vm6, %v3129_v10, %v3130_v46  ;;  %v3032_v52 = vrot.slane %v3030_v31, 1  ;;  %v2670_v59 = vld [vmem:[#allocation3 + $0xb4] sm:$0xf]  ;;  %v5956_v10 = vld [vmem:[#allocation3 + $0xa8] sm:$0xff]  }
 0x25b   : > { %v2109_v24 = vpop.f32.mrf.mxu0  ;;  %3316 = vrot.lane.b32.xlu1 %v5917_v25, %s4500_s27  ;;  %v3511_v31 = vsel %vm1734_vm15, %v3479_v4, %v5817_v50  ;;  %v3037_v50 = vshll.u32 %v5956_v10, 16  ;;  %v3035_v4 = vshrl.u32 %v5956_v10, 16 }
 0x25c   : > { %v2154_v20 = vmax.f32 %v2118_v35, 0.0  ;;  %v2110_v53 = vadd.f32 %v5704_v58, %v2109_v24  ;;  %3398 = vrot.lane.b32.xlu0 %v5933_v28, %s4502_s29  ;;  %v3028_v44 = vor.u32 %v3027_v55, %v3023_v47 }
 0x25d   : > { %v4302_v42 = vpop.f32.mrf.mxu0  ;;  %v5935_v39 = vpop.permute.xlu1 %3148 }
 0x25e   : > { %v4225_v62 = vpack.c.bf16 %v2154_v20, %v2154_v20  ;;  %v2152_v60 = vmax.f32 %v2110_v53, 0.0  ;;  %v2121_v7 = vadd.f32 %v5704_v58, %v4302_v42  ;;  %v5940_v3 = vpop.permute.xlu0 %3382  ;;  %v3033_v34 = vsel %vm1091_vm7, %v3028_v44, %v3032_v52  ;;  %v2681_v20 = vld [vmem:[#allocation3 + $0xc8] sm:$0x1]  ;;  %v4450_v42 = vld [vmem:[#allocation3 + $0x30] sm:$0xff]   ;;  %v2674_v52 = vld [vmem:[#allocation3 + $0xbc] sm:$0x1] }
 0x25f   : > { %v2112_v48 = vpop.f32.mrf.mxu0  ;;  %3363 = vrot.lane.b32.xlu1 %v3033_v34, %s4504_s6  ;;  %v3543_v44 = vsel %vm1767_vm1, %v3511_v31, %v5792_v38  ;;  %v4431_v38 = vld [vmem:[#allocation3 + $0xb0] ss:$0 sps:$4 sm:$0x11]  }
 0x260   : > { %v2508_v12 = vshrl.u32 %v4225_v62, 16  ;;  %v4223_v8 = vpack.c.bf16 %v2152_v60, %v2152_v60  ;;  %v2155_v22 = vmax.f32 %v2121_v7, 0.0  ;;  %v2113_v57 = vadd.f32 %v5704_v58, %v2112_v48  ;;  %3162 = vrot.lane.b32.xlu0 %v3128_v32, %s4497_s24 }
 0x261   : > { %v5946_v51 = vpop.permute.xlu1 %3232  ;;  %v2511_v16 = vshll.u32 %v4225_v62, 16 }
 0x262   : > { %v2510_v54 = vrot.slane %v2508_v12, 7  ;;  %v2491_v63 = vshrl.u32 %v4223_v8, 16  ;;  %v4226_v36 = vpack.c.bf16 %v2155_v22, %v2155_v22  ;;  %v5950_v6 = vpop.permute.xlu0 %3265  ;;  %v2153_v5 = vmax.f32 %v2113_v57, 0.0 }
 0x263   : > { %v2494_v13 = vshll.u32 %v4223_v8, 16  ;;  %3082 = vrot.lane.b32.xlu1 %v5900_v21, %s4498_s25  ;;  %v3417_v21 = vsel %vm1635_vm12, %v4450_v42, %v5840_v18  ;;  %v3575_v57 = vsel %vm1800_vm2, %v3543_v44, %v5909_v26 }
 0x264   : > { %v2513_v58 = vor.u32 %v2511_v16, %v2510_v54  ;;  %v2493_v45 = vrot.slane %v2491_v63, 7  ;;  %v2516_v9 = vshrl.u32 %v4226_v36, 16  ;;  %v4224_v30 = vpack.c.bf16 %v2153_v5, %v2153_v5  ;;  %3199 = vrot.lane.b32.xlu0 %v5917_v25, %s4499_s26 }
 0x265   : > { %v5954_v35 = vpop.permute.xlu1 %3070  ;;  %v2519_v46 = vshll.u32 %v4226_v36, 16  ;;  %v2514_v47 = vrot.slane %v2510_v54, 4  ;;  %v3449_v22 = vsel %vm1668_vm13, %v3417_v21, %v5801_v27  ;;  %v3039_v63 = vrot.slane %v3037_v50, 1 }
 0x266   : > { %v2678_v32 = vsel %vm4594_vm9, %v2513_v58, %v2677_v17  ;;  %v2496_v40 = vor.u32 %v2494_v13, %v2493_v45  ;;  %v2518_v24 = vrot.slane %v2516_v9, 7  ;;  %v3350_v61 = vpop.permute.xlu0 %3349  ;;  %v2499_v53 = vshrl.u32 %v4224_v30, 16 }
 0x267   : > { %2679 = vst [vmem:[#allocation3 + $0xc0] sm:$0xf] %v2678_v32  ;;  %v2502_v60 = vshll.u32 %v4224_v30, 16  ;;  %3084 = vrot.lane.b32.xlu1 %v3033_v34, %s4498_s25  ;;  %v2497_v41 = vrot.slane %v2493_v45, 4  ;;  %v3481_v36 = vsel %vm1701_vm14, %v3449_v22, %v5893_v2  ;;  %v3042_v2 = vshll.u32 %v4431_v38, 16 }
 0x268   : > { %v2671_v55 = vsel %vm4594_vm9, %v2496_v40, %v2670_v59  ;;  %v2521_v56 = vor.u32 %v2519_v46, %v2518_v24  ;;  %v2523_v15 = vrot.slane %v2518_v24, 4  ;;  %v2501_v62 = vrot.slane %v2499_v53, 7  ;;  %3246 = vrot.lane.b32.xlu0 %v3033_v34, %s4503_s30 }
 0x269   : > { %2672 = vst [vmem:[#allocation3 + $0xb4] sm:$0xf] %v2671_v55  ;;  %v5970_v7 = vpop.permute.xlu1 %3189  ;;  %v3040_v58 = vor.u32 %v3039_v63, %v3035_v4  ;;  %v3132_v9 = vrot.slane %v5956_v10, 1  ;;  %v3133_v30 = vrot.slane %v4431_v38, 1 }
 0x26a   : > { %v2522_v33 = vsel %vm4602_vm10, %v2514_v47, %v2521_v56  ;;  %v2682_v48 = vsel %vm4548_vm3, %v2523_v15, %v2681_v20  ;;  %v5981_v18 = vpop.permute.xlu0 %3306  ;;  %v2504_v12 = vor.u32 %v2502_v60, %v2501_v62  ;;  %v2506_v8 = vrot.slane %v2501_v62, 4  ;;  %v4451_v62 = vld [vmem:[#allocation3 + $0x3c] sm:$0xff]  }
 0x26b   : > { %2680 = vst.msk [vmem:[#allocation3 + $0xc4] sm:$0xf] %vm226_vm0, %v2522_v33  ;;  %2683 = vst [vmem:[#allocation3 + $0xc8] sm:$0x1] %v2682_v48  ;;  %3164 = vrot.lane.b32.xlu1 %v5933_v28, %s4497_s24  ;;  %v3134_v46 = vsel %vm1316_vm6, %v3132_v9, %v3133_v30 }
 0x26c   : > { %v2505_v54 = vsel %vm4602_vm10, %v2497_v41, %v2504_v12  ;;  %v2675_v34 = vsel %vm4548_vm3, %v2506_v8, %v2674_v52  ;;  %3281 = vrot.lane.b32.xlu0 %v5933_v28, %s4501_s28  ;;  %vm6360_vm3 = vmmov %vm6358_vm11 }
 0x26d   : > { %v3348_v16 = vpop.permute.xlu1 %3347  ;;  %2673 = vst.msk [vmem:[#allocation3 + $0xb8] sm:$0xf] %vm226_vm0, %v2505_v54  ;;  %2676 = vst [vmem:[#allocation3 + $0xbc] sm:$0x1] %v2675_v34  ;;  %v4452_v34 = vld [vmem:[#allocation3 + $0x48] sm:$0xff]  }
 0x26e   : > { %v3607_v43 = vsel %vm1833_vm8, %v3575_v57, %v3348_v16  ;;  %v3231_v27 = vpop.permute.xlu0 %3230  ;;  %vm6361_vm0 = vmmov %vm6359_vm4  ;;  %v3421_v16 = vsel %vm1635_vm12, %v4452_v34, %v5954_v35 }
 0x26f   : > { %v3513_v1 = vsel %vm1734_vm15, %v3481_v36, %v3231_v27  ;;  %v3639_v26 = vsel %vm6360_vm3, %v3607_v43, %v5940_v3  ;;  %3201 = vrot.lane.b32.xlu1 %v5956_v10, %s4499_s26  ;;  %vm6362_vm9 = vmmov %vm6360_vm3 }
 0x270   : > { %v3545_v17 = vsel %vm1767_vm1, %v3513_v1, %v5950_v6  ;;  %4314 = vmatmul.mubr.msk.bf16.gmra.mxu1 %vm6361_vm0, %v3639_v26  ;;  %3318 = vrot.lane.b32.xlu0 %v5956_v10, %s4500_s27  ;;  %v3044_v6 = vrot.slane %v3042_v2, 1  ;;  %vm6363_vm10 = vmmov %vm6361_vm0 }
 0x271   : > { %v3577_v5 = vsel %vm1800_vm2, %v3545_v17, %v5858_v23  ;;  %v3069_v28 = vpop.permute.xlu1 %3068  ;;  %vm6364_vm5 = vmmov %vm6360_vm3 }
 0x272   : > { %v3188_v3 = vpop.permute.xlu0 %3187  ;;  %v3609_v45 = vsel %vm1833_vm8, %v3577_v5, %v3350_v61  ;;  %v3045_v23 = vsel %vm1091_vm7, %v3040_v58, %v3044_v6  ;;  %v3419_v60 = vsel %vm1635_vm12, %v4451_v62, %v3069_v28  ;;  %v4434_v38 = vld [vmem:[#allocation3 + $0xc0] sm:$0xff]   ;;  %v4435_v36 = vld [vmem:[#allocation3 + $0xc8] ss:$0 sps:$4 sm:$0x11]   ;;  %vm6365_vm11 = vmmov %vm6361_vm0 }
 0x273   : > { %v3641_v13 = vsel %vm6362_vm9, %v3609_v45, %v5911_v0  ;;  %3248 = vrot.lane.b32.xlu1 %v3045_v23, %s4503_s30  ;;  %v3451_v33 = vsel %vm1668_vm13, %v3419_v60, %v5935_v39  ;;  %v3213_v54 = vshll.u32 %v4434_v38, 16  ;;  %v3211_v17 = vshrl.u32 %v4434_v38, 16  ;;  %vm6366_vm4 = vmmov %vm6360_vm3 }
 0x274   : > { %4317 = vmatprep.mubr.msk.bf16.mxu1 %vm6363_vm10, %v3641_v13  ;;  %v6019_v32 = vld [vmem:[#allocation3 + $0xb4] sm:$0xff]   ;;  %3365 = vrot.lane.b32.xlu0 %v3045_v23, %s4504_s6  ;;  %v4433_v24 = vld [vmem:[#allocation3 + $0xbc] ss:$0 sps:$4 sm:$0x11]   ;;  %v3483_v12 = vsel %vm1701_vm14, %v3451_v33, %v5856_v49  ;;  %v3218_v5 = vshll.u32 %v4435_v36, 16  ;;  %vm6367_vm3 = vmmov %vm6361_vm0 }
 0x275   : > { %v3305_v59 = vpop.permute.xlu1 %3304  ;;  %v3049_v0 = vshll.u32 %v6019_v32, 16  ;;  %v3135_v31 = vrot.slane %v6019_v32, 1  ;;  %v3136_v20 = vrot.slane %v4433_v24, 1  ;;  %v3047_v55 = vshrl.u32 %v6019_v32, 16  ;;  %vm6371_vm9 = vmmov %vm6367_vm3 }
 0x276   : > { %v6023_v40 = vpop.permute.xlu0 %3388  ;;  %v3054_v56 = vshll.u32 %v4433_v24, 16  ;;  %v3515_v22 = vsel %vm1734_vm15, %v3483_v12, %v5946_v51  ;;  %v3453_v51 = vsel %vm1668_vm13, %v3421_v16, %v5923_v14  ;;  %v3215_v1 = vrot.slane %v3213_v54, 1  ;;  %v4436_v14 = vld [vmem:[#allocation3 + $0xcc] sm:$0xff]   ;;  %v4454_v54 = vld [vmem:[#allocation3 + $0x60] sm:$0xff]  }
 0x277   : > { %v3051_v53 = vrot.slane %v3049_v0, 1  ;;  %3283 = vrot.lane.b32.xlu1 %v3134_v46, %s4501_s28  ;;  %v3137_v15 = vsel %vm1316_vm6, %v3135_v31, %v3136_v20  ;;  %v3547_v49 = vsel %vm1767_vm1, %v3515_v22, %v5919_v19  ;;  %v3485_v26 = vsel %vm1701_vm14, %v3453_v51, %v3188_v3 }
 0x278   : > { %3400 = vrot.lane.b32.xlu0 %v3134_v46, %s4502_s29  ;;  %v3056_v44 = vrot.slane %v3054_v56, 1  ;;  %v3579_v43 = vsel %vm1800_vm2, %v3547_v49, %v3305_v59  ;;  %v3216_v45 = vor.u32 %v3215_v1, %v3211_v17  ;;  %v4437_v59 = vld [vmem:[#allocation3 + $0xd4] ss:$0 sps:$4 sm:$0x11]   ;;  %v3332_v30 = vshll.u32 %v4436_v14, 16 }
 0x279   : > { %v6027_v61 = vpop.permute.xlu1 %3271  ;;  %v3052_v21 = vor.u32 %v3051_v53, %v3047_v55  ;;  %v3254_v0 = vrot.slane %v4434_v38, 1  ;;  %v3330_v20 = vshrl.u32 %v4436_v14, 16  ;;  %v3337_v55 = vshll.u32 %v4437_v59, 16 }
 0x27a   : > { %v6032_v47 = vpop.permute.xlu0 %3154  ;;  %v3334_v53 = vrot.slane %v3332_v30, 1  ;;  %v3373_v12 = vrot.slane %v4436_v14, 1 }
 0x27b   : > { %3320 = vrot.lane.b32.xlu1 %v6019_v32, %s4500_s27  ;;  %v3057_v48 = vsel %vm1091_vm7, %v3052_v21, %v3056_v44 }
 0x27c   : > { %3402 = vrot.lane.b32.xlu0 %v3137_v15, %s4502_s29  ;;  %v3335_v60 = vor.u32 %v3334_v53, %v3330_v20 }
 0x27d   : > { %v6036_v42 = vpop.permute.xlu1 %3152 }
 0x27e   : > { %v3387_v50 = vpop.permute.xlu0 %3386 }
 0x27f   : > { %3367 = vrot.lane.b32.xlu1 %v3057_v48, %s4504_s6 }
 0x280   : > { %3166 = vrot.lane.b32.xlu0 %v3134_v46, %s4497_s24  ;;  %v3255_v46 = vrot.slane %v4435_v36, 1 }
 0x281   : > { %v6045_v52 = vpop.permute.xlu1 %3236 }
 0x282   : > { %v3270_v41 = vpop.permute.xlu0 %3269 }
 0x283   : > { %3086 = vrot.lane.b32.xlu1 %v3045_v23, %s4498_s25  ;;  %v3220_v23 = vrot.slane %v3218_v5, 1 }
 0x284   : > { %3203 = vrot.lane.b32.xlu0 %v6019_v32, %s4499_s26 }
 0x285   : > { %v6051_v8 = vpop.permute.xlu1 %3074  ;;  %v3221_v24 = vsel %vm1091_vm7, %v3216_v45, %v3220_v23 }
 0x286   : > { %v3354_v39 = vpop.permute.xlu0 %3353  ;;  %v3425_v34 = vsel %vm1635_vm12, %v4454_v54, %v6051_v8 }
 0x287   : > { %3088 = vrot.lane.b32.xlu1 %v3057_v48, %s4498_s25  ;;  %v3457_v36 = vsel %vm1668_vm13, %v3425_v34, %v6032_v47 }
 0x288   : > { %3250 = vrot.lane.b32.xlu0 %v3057_v48, %s4503_s30 }
 0x289   : > { %v6058_v57 = vpop.permute.xlu1 %3193 }
 0x28a   : > { %v6066_v63 = vpop.permute.xlu0 %3310 }
 0x28b   : > { %3168 = vrot.lane.b32.xlu1 %v3137_v15, %s4497_s24 }
 0x28c   : > { %3285 = vrot.lane.b32.xlu0 %v3137_v15, %s4501_s28  ;;  %v4453_v15 = vld [vmem:[#allocation3 + $0x54] sm:$0xff]  }
 0x28d   : > { %v3352_v27 = vpop.permute.xlu1 %3351 }
 0x28e   : > { %v3611_v19 = vsel %vm1833_vm8, %v3579_v43, %v3352_v27  ;;  %v3235_v35 = vpop.permute.xlu0 %3234 }
 0x28f   : > { %v3517_v4 = vsel %vm1734_vm15, %v3485_v26, %v3235_v35  ;;  %v3643_v2 = vsel %vm6364_vm5, %v3611_v19, %v3387_v50  ;;  %3205 = vrot.lane.b32.xlu1 %v4434_v38, %s4499_s26  ;;  %v3339_v50 = vrot.slane %v3337_v55, 1  ;;  %vm6373_vm5 = vmmov %vm6367_vm3  ;;  %s4194_s26 = sshll.u32 %s6387_s19, 8 }
 0x290   : > { %v3549_v28 = vsel %vm1767_vm1, %v3517_v4, %v3270_v41  ;;  %4318 = vmatmul.mubr.msk.bf16.gmra.mxu1 %vm6365_vm11, %v3643_v2  ;;  %3322 = vrot.lane.b32.xlu0 %v4434_v38, %s4500_s27  ;;  %v3374_v38 = vrot.slane %v4437_v59, 1 }
 0x291   : > { %v3581_v58 = vsel %vm1800_vm2, %v3549_v28, %v5981_v18  ;;  %v3073_v3 = vpop.permute.xlu1 %3072  ;;  %v3340_v41 = vsel %vm1091_vm7, %v3335_v60, %v3339_v50  ;;  %vm6369_vm7 = vmmov %vm6361_vm0 }
 0x292   : > { %v3192_v13 = vpop.permute.xlu0 %3191  ;;  %v3613_v6 = vsel %vm1833_vm8, %v3581_v58, %v3354_v39  ;;  %v3423_v21 = vsel %vm1635_vm12, %v4453_v15, %v3073_v3  ;;  %v3375_v49 = vsel %vm1316_vm6, %v3373_v12, %v3374_v38  ;;  %vm6370_vm0 = vmmov %vm6366_vm4 }
 0x293   : > { %v3645_v9 = vsel %vm6366_vm4, %v3613_v6, %v6023_v40  ;;  %3252 = vrot.lane.b32.xlu1 %v3221_v24, %s4503_s30  ;;  %v3256_v40 = vsel %vm1316_vm6, %v3254_v0, %v3255_v46  ;;  %v3455_v44 = vsel %vm1668_vm13, %v3423_v21, %v6036_v42  ;;  %v3489_v43 = vsel %vm1701_vm14, %v3457_v36, %v3192_v13  ;;  %vm6368_vm6 = vmmov %vm6366_vm4 }
 0x294   : > { %4321 = vmatprep.mubr.msk.bf16.mxu1 %vm6367_vm3, %v3645_v9  ;;  %3369 = vrot.lane.b32.xlu0 %v3221_v24, %s4504_s6  ;;  %v3487_v39 = vsel %vm1701_vm14, %v3455_v44, %v5970_v7  ;;  %vm6372_vm10 = vmmov %vm6370_vm0 }
 0x295   : > { %v3309_v18 = vpop.permute.xlu1 %3308  ;;  %v3519_v42 = vsel %vm1734_vm15, %v3487_v39, %v6045_v52  ;;  %vm6374_vm11 = vmmov %vm6370_vm0 }
 0x296   : > { %v3393_v31 = vpop.permute.xlu0 %3392  ;;  %v3551_v7 = vsel %vm1767_vm1, %v3519_v42, %v6027_v61  ;;  %vm6375_vm4 = vmmov %vm6367_vm3 }
 0x297   : > { %3287 = vrot.lane.b32.xlu1 %v3256_v40, %s4501_s28  ;;  %v3583_v52 = vsel %vm1800_vm2, %v3551_v7, %v3309_v18  ;;  %vm6376_vm3 = vmmov %vm6370_vm0 }
 0x298   : > { %3404 = vrot.lane.b32.xlu0 %v3256_v40, %s4502_s29 }
 0x299   : > { %v3276_v56 = vpop.permute.xlu1 %3275 }
 0x29a   : > { %v3391_v62 = vpop.permute.xlu0 %3390 }
 0x29b   : > { %3324 = vrot.lane.b32.xlu1 %v4436_v14, %s4500_s27 }
 0x29d   : > { %v3157_v33 = vpop.permute.xlu1 %3156 }
 0x29e   : > { %v3274_v48 = vpop.permute.xlu0 %3273 }
 0x29f   : > { %3371 = vrot.lane.b32.xlu1 %v3340_v41, %s4504_s6 }
 0x2a1   : > { %v3241_v22 = vpop.permute.xlu1 %3240 }
 0x2a2   : > { %v3358_v16 = vpop.permute.xlu0 %3357 }
 0x2a3   : > { %3406 = vrot.lane.b32.xlu1 %v3375_v49, %s4502_s29  ;;  %s6197_s29 = scalar_lea.vmem %s6340_s5, %s4194_s26 }
 0x2a5   : > { %v3079_v51 = vpop.permute.xlu1 %3078 }
 0x2a6   : > { %v3239_v8 = vpop.permute.xlu0 %3238 }
 0x2a7   : > { %v3521_v27 = vsel %vm1734_vm15, %v3489_v43, %v3239_v8 }
 0x2a8   : > { %v3553_v1 = vsel %vm1767_vm1, %v3521_v27, %v3274_v48 }
 0x2a9   : > { %v3585_v26 = vsel %vm1800_vm2, %v3553_v1, %v6066_v63  ;;  %v3356_v19 = vpop.permute.xlu1 %3355 }
 0x2aa   : > { %v3615_v47 = vsel %vm1833_vm8, %v3583_v52, %v3356_v19  ;;  %v3617_v35 = vsel %vm1833_vm8, %v3585_v26, %v3358_v16 }
 0x2ab   : > { %v3647_v4 = vsel %vm6368_vm6, %v3615_v47, %v3391_v62  ;;  %v3649_v61 = vsel %vm6370_vm0, %v3617_v35, %v3393_v31  ;;  %v4455_v31 = vld [vmem:[#allocation3 + $0x78] sm:$0xff]   ;;  %vm6377_vm6 = vmmov %vm6375_vm4 }
 0x2ac   : > { %4322 = vmatmul.mubr.msk.bf16.gmra.mxu1 %vm6369_vm7, %v3647_v4  ;;  %v3429_v20 = vsel %vm1635_vm12, %v4455_v31, %v3079_v51  ;;  %vm6378_vm7 = vmmov %vm6370_vm0 }
 0x2ad   : > { %v3077_v2 = vpop.permute.xlu1 %3076  ;;  %4325 = vmatprep.mubr.msk.bf16.mxu1 %vm6371_vm9, %v3649_v61  ;;  %v3395_v14 = vpop.permute.xlu0 %3394  ;;  %vm6379_vm0 = vmmov %vm6375_vm4 }
 0x2ae   : > { %v3427_v17 = vsel %vm1635_vm12, %v5707_v29, %v3077_v2  ;;  %vm6380_vm9 = vmmov %vm6376_vm3 }
 0x2af   : > { %v3459_v5 = vsel %vm1668_vm13, %v3427_v17, %v3157_v33 }
 0x2b0   : > { %v3491_v63 = vsel %vm1701_vm14, %v3459_v5, %v6058_v57 }
 0x2b1   : > { %v3313_v28 = vpop.permute.xlu1 %3312  ;;  %v3523_v58 = vsel %vm1734_vm15, %v3491_v63, %v3241_v22  ;;  %v3159_v3 = vpop.permute.xlu0 %3158 }
 0x2b2   : > { %v3555_v13 = vsel %vm1767_vm1, %v3523_v58, %v3276_v56  ;;  %v3461_v53 = vsel %vm1668_vm13, %v3429_v20, %v3159_v3 }
 0x2b3   : > { %v3587_v9 = vsel %vm1800_vm2, %v3555_v13, %v3313_v28 }
 0x2b5   : > { %v3161_v45 = vpop.permute.xlu1 %3160  ;;  %v3196_v6 = vpop.permute.xlu0 %3195 }
 0x2b6   : > { %v3493_v55 = vsel %vm1701_vm14, %v3461_v53, %v3196_v6 }
 0x2b9   : > { %v3360_v23 = vpop.permute.xlu1 %3359  ;;  %v3243_v30 = vpop.permute.xlu0 %3242 }
 0x2ba   : > { %v3619_v59 = vsel %vm1833_vm8, %v3587_v9, %v3360_v23  ;;  %v3525_v56 = vsel %vm1734_vm15, %v3493_v55, %v3243_v30 }
 0x2bb   : > { %v3651_v29 = vsel %vm6372_vm10, %v3619_v59, %v3395_v14  ;;  %vm6381_vm10 = vmmov %vm6379_vm0 }
 0x2bc   : > { %4326 = vmatmul.mubr.msk.bf16.gmra.mxu1 %vm6373_vm5, %v3651_v29  ;;  %vm6382_vm5 = vmmov %vm6376_vm3 }
 0x2bd   : > { %v3081_v57 = vpop.permute.xlu1 %3080  ;;  %v3278_v24 = vpop.permute.xlu0 %3277 }
 0x2be   : > { %v3557_v21 = vsel %vm1767_vm1, %v3525_v56, %v3278_v24  ;;  %v3431_v44 = vsel %vm1635_vm12, %v5797_v11, %v3081_v57 }
 0x2bf   : > { %v3463_v41 = vsel %vm1668_vm13, %v3431_v44, %v3161_v45 }
 0x2c1   : > { %v3198_v18 = vpop.permute.xlu1 %3197 }
 0x2c2   : > { %v3315_v0 = vpop.permute.xlu0 %3314  ;;  %v3495_v38 = vsel %vm1701_vm14, %v3463_v41, %v3198_v18  ;;  %v4456_v41 = vld [vmem:[%s4583_s23 + $0x8] sm:$0xf] }
 0x2c3   : > { %v3589_v62 = vsel %vm1800_vm2, %v3557_v21, %v3315_v0 }
 0x2c5   : > { %v3245_v46 = vpop.permute.xlu1 %3244 }
 0x2c6   : > { %v3362_v40 = vpop.permute.xlu0 %3361  ;;  %v3527_v39 = vsel %vm1734_vm15, %v3495_v38, %v3245_v46 }
 0x2c7   : > { %v3621_v60 = vsel %vm1833_vm8, %v3589_v62, %v3362_v40 }
 0x2c9   : > { %v3280_v15 = vpop.permute.xlu1 %3279 }
 0x2ca   : > { %v3397_v50 = vpop.permute.xlu0 %3396  ;;  %v3559_v22 = vsel %vm1767_vm1, %v3527_v39, %v3280_v15 }
 0x2cb   : > { %v3653_v33 = vsel %vm6374_vm11, %v3621_v60, %v3397_v50  ;;  %vm6383_vm11 = vmmov %vm6379_vm0 }
 0x2cc   : > { %4329 = vmatprep.mubr.msk.bf16.mxu1 %vm6375_vm4, %v3653_v33 }
 0x2cd   : > { %v3317_v48 = vpop.permute.xlu1 %3316 }
 0x2ce   : > { %v3399_v12 = vpop.permute.xlu0 %3398  ;;  %v3591_v54 = vsel %vm1800_vm2, %v3559_v22, %v3317_v48  ;;  %v6186_v48 = vld [vmem:[%s6339_s4] ss:$0 sm:$0xff] }
 0x2d1   : > { %v3364_v34 = vpop.permute.xlu1 %3363 }
 0x2d2   : > { %v3163_v16 = vpop.permute.xlu0 %3162  ;;  %v3623_v11 = vsel %vm1833_vm8, %v3591_v54, %v3364_v34  ;;  %v4457_v54 = vld [vmem:[%s4583_s23] sm:$0xf] }
 0x2d3   : > { %v3655_v42 = vsel %vm6376_vm3, %v3623_v11, %v3399_v12  ;;  %v3889_v12 = vunpack.c.l.bf16 %v4456_v41  ;;  %v3887_v34 = vunpack.c.l.bf16 %v4457_v54 }
 0x2d4   : > { %4330 = vmatmul.mubr.msk.bf16.gmra.mxu1 %vm6377_vm6, %v3655_v42 }
 0x2d5   : > { %v3083_v49 = vpop.permute.xlu1 %3082 }
 0x2d6   : > { %v3200_v36 = vpop.permute.xlu0 %3199  ;;  %v3433_v7 = vsel %vm1635_vm12, %v5823_v37, %v3083_v49 }
 0x2d7   : > { %v3465_v1 = vsel %vm1668_vm13, %v3433_v7, %v3163_v16 }
 0x2d8   : > { %v3497_v19 = vsel %vm1701_vm14, %v3465_v1, %v3200_v36 }
 0x2d9   : > { %v3085_v51 = vpop.permute.xlu1 %3084 }
 0x2da   : > { %v3247_v43 = vpop.permute.xlu0 %3246  ;;  %v3435_v14 = vsel %vm1635_vm12, %v5917_v25, %v3085_v51  ;;  %v4458_v51 = vld [vmem:[%s4583_s23 + $0xc] sm:$0xf] }
 0x2db   : > { %v3529_v4 = vsel %vm1734_vm15, %v3497_v19, %v3247_v43  ;;  %v3890_v43 = vunpack.c.l.bf16 %v4458_v51  ;;  %v4469_v51 = vld [vmem:[%s4583_s23 + $0x30] sm:$0xf] }
 0x2dd   : > { %v3165_v8 = vpop.permute.xlu1 %3164 }
 0x2de   : > { %v3282_v27 = vpop.permute.xlu0 %3281  ;;  %v3467_v28 = vsel %vm1668_vm13, %v3435_v14, %v3165_v8  ;;  %v4460_v14 = vld [vmem:[%s4583_s23 + $0x18] sm:$0xf] }
 0x2df   : > { %v3561_v61 = vsel %vm1767_vm1, %v3529_v4, %v3282_v27 }
 0x2e1   : > { %v3202_v52 = vpop.permute.xlu1 %3201 }
 0x2e2   : > { %v3319_v26 = vpop.permute.xlu0 %3318  ;;  %v3499_v45 = vsel %vm1701_vm14, %v3467_v28, %v3202_v52  ;;  %v3893_v28 = vunpack.c.l.bf16 %v4460_v14 }
 0x2e3   : > { %v3593_v2 = vsel %vm1800_vm2, %v3561_v61, %v3319_v26  ;;  %v4459_v26 = vld [vmem:[%s4583_s23 + $0x4] sm:$0xf] }
 0x2e4   : > { %v3888_v19 = vunpack.c.l.bf16 %v4459_v26 }
 0x2e5   : > { %v3249_v47 = vpop.permute.xlu1 %3248 }
 0x2e6   : > { %v3366_v35 = vpop.permute.xlu0 %3365  ;;  %v3531_v13 = vsel %vm1734_vm15, %v3499_v45, %v3249_v47  ;;  %v4461_v45 = vld [vmem:[%s4583_s23 + $0x10] sm:$0xf] }
 0x2e7   : > { %v3625_v17 = vsel %vm1833_vm8, %v3593_v2, %v3366_v35 }
 0x2e9   : > { %v3284_v5 = vpop.permute.xlu1 %3283 }
 0x2ea   : > { %v3401_v37 = vpop.permute.xlu0 %3400  ;;  %v3563_v6 = vsel %vm1767_vm1, %v3531_v13, %v3284_v5  ;;  %v3891_v13 = vunpack.c.l.bf16 %v4461_v45 }
 0x2eb   : > { %v3657_v63 = vsel %vm6378_vm7, %v3625_v17, %v3401_v37 }
 0x2ec   : > { %4333 = vmatprep.mubr.msk.bf16.mxu1 %vm6379_vm0, %v3657_v63 }
 0x2ed   : > { %v3321_v58 = vpop.permute.xlu1 %3320 }
 0x2ee   : > { %v3403_v3 = vpop.permute.xlu0 %3402  ;;  %v3595_v9 = vsel %vm1800_vm2, %v3563_v6, %v3321_v58 }
 0x2f1   : > { %v3368_v23 = vpop.permute.xlu1 %3367 }
 0x2f2   : > { %v3167_v59 = vpop.permute.xlu0 %3166  ;;  %v3627_v29 = vsel %vm1833_vm8, %v3595_v9, %v3368_v23 }
 0x2f3   : > { %v3659_v30 = vsel %vm6380_vm9, %v3627_v29, %v3403_v3 }
 0x2f4   : > { %4334 = vmatmul.mubr.msk.bf16.gmra.mxu1 %vm6381_vm10, %v3659_v30 }
 0x2f5   : > { %v3087_v25 = vpop.permute.xlu1 %3086 }
 0x2f6   : > { %v3204_v57 = vpop.permute.xlu0 %3203  ;;  %v3437_v0 = vsel %vm1635_vm12, %v5956_v10, %v3087_v25 }
 0x2f7   : > { %v3469_v20 = vsel %vm1668_vm13, %v3437_v0, %v3167_v59  ;;  %v4462_v59 = vld [vmem:[%s4583_s23 + $0x1c] sm:$0xf] }
 0x2f8   : > { %v3501_v40 = vsel %vm1701_vm14, %v3469_v20, %v3204_v57  ;;  %v3894_v29 = vunpack.c.l.bf16 %v4462_v59 }
 0x2f9   : > { %v3089_v24 = vpop.permute.xlu1 %3088 }
 0x2fa   : > { %v3251_v18 = vpop.permute.xlu0 %3250  ;;  %v3439_v16 = vsel %vm1635_vm12, %v6019_v32, %v3089_v24  ;;  %v4463_v24 = vld [vmem:[%s4583_s23 + $0x14] sm:$0xf] }
 0x2fb   : > { %v3533_v21 = vsel %vm1734_vm15, %v3501_v40, %v3251_v18  ;;  %v3892_v18 = vunpack.c.l.bf16 %v4463_v24 }
 0x2fd   : > { %v3169_v46 = vpop.permute.xlu1 %3168 }
 0x2fe   : > { %v3286_v31 = vpop.permute.xlu0 %3285  ;;  %v3471_v42 = vsel %vm1668_vm13, %v3439_v16, %v3169_v46  ;;  %vm6384_vm13 = vmmov %vm6376_vm3 }
 0x2ff   : > { %v3565_v62 = vsel %vm1767_vm1, %v3533_v21, %v3286_v31 }
 0x301   : > { %v3206_v53 = vpop.permute.xlu1 %3205 }
 0x302   : > { %v3323_v55 = vpop.permute.xlu0 %3322  ;;  %v3503_v7 = vsel %vm1701_vm14, %v3471_v42, %v3206_v53  ;;  %vm6385_vm14 = vmmov %vm6379_vm0  ;;  %v4464_v53 = vld [vmem:[%s4583_s23 + $0x28] sm:$0xf] }
 0x303   : > { %v3597_v60 = vsel %vm1800_vm2, %v3565_v62, %v3323_v55  ;;  %v3897_v55 = vunpack.c.l.bf16 %v4464_v53 }
 0x305   : > { %v3253_v56 = vpop.permute.xlu1 %3252 }
 0x306   : > { %v3370_v15 = vpop.permute.xlu0 %3369  ;;  %v3535_v27 = vsel %vm1734_vm15, %v3503_v7, %v3253_v56 }
 0x307   : > { %v3629_v10 = vsel %vm1833_vm8, %v3597_v60, %v3370_v15  ;;  %v4465_v15 = vld [vmem:[%s4583_s23 + $0x20] sm:$0xf] }
 0x308   : > { %v3895_v21 = vunpack.c.l.bf16 %v4465_v15 }
 0x309   : > { %v3288_v50 = vpop.permute.xlu1 %3287 }
 0x30a   : > { %v3405_v44 = vpop.permute.xlu0 %3404  ;;  %v3567_v47 = vsel %vm1767_vm1, %v3535_v27, %v3288_v50  ;;  %v4466_v50 = vld [vmem:[%s4583_s23 + $0x2c] sm:$0xf]  ;;  %v4470_v27 = vld [vmem:[%s4583_s23 + $0x3c] sm:$0xf] }
 0x30b   : > { %v3661_v33 = vsel %vm6382_vm5, %v3629_v10, %v3405_v44  ;;  %v3898_v44 = vunpack.c.l.bf16 %v4466_v50 }
 0x30c   : > { %4337 = vmatprep.mubr.msk.bf16.mxu1 %vm6383_vm11, %v3661_v33 }
 0x30d   : > { %v3325_v38 = vpop.permute.xlu1 %3324 }
 0x30e   : > { %v3599_v4 = vsel %vm1800_vm2, %v3567_v47, %v3325_v38  ;;  %v4467_v38 = vld [vmem:[%s4583_s23 + $0x24] sm:$0xf]  ;;  %v4471_v47 = vld [vmem:[%s4583_s23 + $0x34] sm:$0xf] }
 0x310   : > { %v4311_v39 = vpop.f32.mrf.mxu1 }
 0x311   : > { %v3769_v22 = vadd.f32 %v4311_v39, %v6186_v48  ;;  %v3372_v8 = vpop.permute.xlu1 %3371  ;;  %v3896_v39 = vunpack.c.l.bf16 %v4467_v38 }
 0x312   : > { %v3760_v11 = vpop.f32.mrf.mxu1  ;;  %v3631_v17 = vsel %vm1833_vm8, %v3599_v4, %v3372_v8 }
 0x313   : > { %v3921_v49 = vadd.f32 %v3889_v12, %v3769_v22  ;;  %v3761_v36 = vadd.f32 %v6186_v48, %v3760_v11  ;;  %v4468_v11 = vld [vmem:[%s4583_s23 + $0x38] sm:$0xf] }
 0x314   : > { %v4312_v32 = vpop.f32.mrf.mxu1  ;;  %v3901_v42 = vunpack.c.l.bf16 %v4468_v11 }
 0x315   : > { %3953 = vst.msk [vmem:[%s6197_s29 + $0x10] sm:$0xff] %vm1635_vm12, %v3921_v49  ;;  %v3919_v1 = vadd.f32 %v3887_v34, %v3761_v36  ;;  %v3772_v52 = vadd.f32 %v4312_v32, %v6186_v48  ;;  %v3407_v5 = vpop.permute.xlu1 %3406 }
 0x316   : > { %v3763_v35 = vpop.f32.mrf.mxu1  ;;  %v3663_v37 = vsel %vm6384_vm13, %v3631_v17, %v3407_v5  ;;  %v4472_v5 = vld [vmem:[%s4583_s23 + $0x48] sm:$0xf] }
 0x317   : > { %3951 = vst.msk [vmem:[%s6197_s29] sm:$0xff] %vm1635_vm12, %v3919_v1  ;;  %v3922_v61 = vadd.f32 %v3890_v43, %v3772_v52  ;;  %v3764_v2 = vadd.f32 %v6186_v48, %v3763_v35  ;;  %4338 = vmatmul.mubr.msk.bf16.gmra.mxu1 %vm6385_vm14, %v3663_v37  ;;  %v3899_v43 = vunpack.c.l.bf16 %v4469_v51  ;;  %v3902_v1 = vunpack.c.l.bf16 %v4470_v27 }
 0x318   : > { %v3900_v35 = vunpack.c.l.bf16 %v4471_v47  ;;  %v3905_v37 = vunpack.c.l.bf16 %v4472_v5 }
 0x319   : > { %3954 = vst.msk [vmem:[%s6197_s29 + $0x18] sm:$0xff] %vm1635_vm12, %v3922_v61  ;;  %v3920_v63 = vadd.f32 %v3888_v19, %v3764_v2 }
 0x31b   : > { %3952 = vst.msk [vmem:[%s6197_s29 + $0x8] sm:$0xff] %vm1635_vm12, %v3920_v63 }
 0x330   : > { %v4315_v58 = vpop.f32.mrf.mxu1 }
 0x331   : > { %v3785_v3 = vadd.f32 %v4315_v58, %v6186_v48 }
 0x332   : > { %v3776_v6 = vpop.f32.mrf.mxu1 }
 0x333   : > { %v3925_v9 = vadd.f32 %v3893_v28, %v3785_v3  ;;  %v3777_v23 = vadd.f32 %v6186_v48, %v3776_v6  ;;  %v4473_v28 = vld [vmem:[%s4583_s23 + $0x40] sm:$0xf]  ;;  %v4474_v6 = vld [vmem:[%s4583_s23 + $0x4c] sm:$0xf] }
 0x334   : > { %v4316_v30 = vpop.f32.mrf.mxu1  ;;  %v3903_v58 = vunpack.c.l.bf16 %v4473_v28 }
 0x335   : > { %3957 = vst.msk [vmem:[%s6197_s29 + $0x30] sm:$0xff] %vm1635_vm12, %v3925_v9  ;;  %v3923_v25 = vadd.f32 %v3891_v13, %v3777_v23  ;;  %v3788_v57 = vadd.f32 %v4316_v30, %v6186_v48  ;;  %v3906_v9 = vunpack.c.l.bf16 %v4474_v6  ;;  %v4475_v30 = vld [vmem:[%s4583_s23 + $0x44] sm:$0xf] }
 0x336   : > { %v3779_v0 = vpop.f32.mrf.mxu1 }
 0x337   : > { %3955 = vst.msk [vmem:[%s6197_s29 + $0x20] sm:$0xff] %vm1635_vm12, %v3923_v25  ;;  %v3926_v46 = vadd.f32 %v3894_v29, %v3788_v57  ;;  %v3780_v31 = vadd.f32 %v6186_v48, %v3779_v0  ;;  %v3904_v25 = vunpack.c.l.bf16 %v4475_v30 }
 0x339   : > { %3958 = vst.msk [vmem:[%s6197_s29 + $0x38] sm:$0xff] %vm1635_vm12, %v3926_v46  ;;  %v3924_v20 = vadd.f32 %v3892_v18, %v3780_v31  ;;  %v4476_v46 = vld [vmem:[%s4583_s23 + $0x58] sm:$0xf] }
 0x33a   : > { %v3909_v31 = vunpack.c.l.bf16 %v4476_v46 }
 0x33b   : > { %3956 = vst.msk [vmem:[%s6197_s29 + $0x28] sm:$0xff] %vm1635_vm12, %v3924_v20 }
 0x350   : > { %v4319_v40 = vpop.f32.mrf.mxu1 }
 0x351   : > { %v3801_v56 = vadd.f32 %v4319_v40, %v6186_v48 }
 0x352   : > { %v3792_v62 = vpop.f32.mrf.mxu1 }
 0x353   : > { %v3929_v60 = vadd.f32 %v3897_v55, %v3801_v56  ;;  %v3793_v10 = vadd.f32 %v6186_v48, %v3792_v62  ;;  %v4477_v55 = vld [vmem:[%s4583_s23 + $0x50] sm:$0xf]  ;;  %v4478_v62 = vld [vmem:[%s4583_s23 + $0x5c] sm:$0xf] }
 0x354   : > { %v4320_v33 = vpop.f32.mrf.mxu1  ;;  %v3907_v40 = vunpack.c.l.bf16 %v4477_v55 }
 0x355   : > { %3961 = vst.msk [vmem:[%s6197_s29 + $0x50] sm:$0xff] %vm1635_vm12, %v3929_v60  ;;  %v3927_v41 = vadd.f32 %v3895_v21, %v3793_v10  ;;  %v3804_v12 = vadd.f32 %v4320_v33, %v6186_v48  ;;  %v3910_v60 = vunpack.c.l.bf16 %v4478_v62  ;;  %v4479_v33 = vld [vmem:[%s4583_s23 + $0x54] sm:$0xf] }
 0x356   : > { %v3795_v22 = vpop.f32.mrf.mxu1 }
 0x357   : > { %3959 = vst.msk [vmem:[%s6197_s29 + $0x40] sm:$0xff] %vm1635_vm12, %v3927_v41  ;;  %v3930_v54 = vadd.f32 %v3898_v44, %v3804_v12  ;;  %v3796_v34 = vadd.f32 %v6186_v48, %v3795_v22  ;;  %v3908_v41 = vunpack.c.l.bf16 %v4479_v33 }
 0x359   : > { %3962 = vst.msk [vmem:[%s6197_s29 + $0x58] sm:$0xff] %vm1635_vm12, %v3930_v54  ;;  %v3928_v16 = vadd.f32 %v3896_v39, %v3796_v34  ;;  %v4480_v54 = vld [vmem:[%s4583_s23 + $0x68] sm:$0xf] }
 0x35a   : > { %v3913_v34 = vunpack.c.l.bf16 %v4480_v54 }
 0x35b   : > { %3960 = vst.msk [vmem:[%s6197_s29 + $0x48] sm:$0xff] %vm1635_vm12, %v3928_v16 }
 0x36c   : > { %v4323_v49 = vpop.f32.mrf.mxu1 }
 0x36d   : > { %v3817_v36 = vadd.f32 %v4323_v49, %v6186_v48 }
 0x36e   : > { %v3808_v7 = vpop.f32.mrf.mxu1 }
 0x36f   : > { %v3933_v8 = vadd.f32 %v3901_v42, %v3817_v36  ;;  %v3809_v32 = vadd.f32 %v6186_v48, %v3808_v7  ;;  %v4481_v42 = vld [vmem:[%s4583_s23 + $0x60] sm:$0xf]  ;;  %v4482_v7 = vld [vmem:[%s4583_s23 + $0x6c] sm:$0xf] }
 0x370   : > { %v4324_v52 = vpop.f32.mrf.mxu1  ;;  %v3911_v49 = vunpack.c.l.bf16 %v4481_v42 }
 0x371   : > { %3965 = vst.msk [vmem:[%s6197_s29 + $0x70] sm:$0xff] %vm1635_vm12, %v3933_v8  ;;  %v3931_v26 = vadd.f32 %v3899_v43, %v3809_v32  ;;  %v3820_v19 = vadd.f32 %v4324_v52, %v6186_v48  ;;  %v3914_v8 = vunpack.c.l.bf16 %v4482_v7  ;;  %v4483_v52 = vld [vmem:[%s4583_s23 + $0x64] sm:$0xf] }
 0x372   : > { %v3811_v4 = vpop.f32.mrf.mxu1 }
 0x373   : > { %3963 = vst.msk [vmem:[%s6197_s29 + $0x60] sm:$0xff] %vm1635_vm12, %v3931_v26  ;;  %v3934_v61 = vadd.f32 %v3902_v1, %v3820_v19  ;;  %v3812_v2 = vadd.f32 %v6186_v48, %v3811_v4  ;;  %v3912_v26 = vunpack.c.l.bf16 %v4483_v52 }
 0x375   : > { %3966 = vst.msk [vmem:[%s6197_s29 + $0x78] sm:$0xff] %vm1635_vm12, %v3934_v61  ;;  %v3932_v17 = vadd.f32 %v3900_v35, %v3812_v2  ;;  %v4484_v61 = vld [vmem:[%s4583_s23 + $0x78] sm:$0xf] }
 0x376   : > { %v3917_v2 = vunpack.c.l.bf16 %v4484_v61 }
 0x377   : > { %3964 = vst.msk [vmem:[%s6197_s29 + $0x68] sm:$0xff] %vm1635_vm12, %v3932_v17 }
 0x37c   : > { %v4327_v63 = vpop.f32.mrf.mxu1 }
 0x37d   : > { %v3833_v14 = vadd.f32 %v4327_v63, %v6186_v48 }
 0x37e   : > { %v3824_v3 = vpop.f32.mrf.mxu1 }
 0x37f   : > { %v3937_v45 = vadd.f32 %v3905_v37, %v3833_v14  ;;  %v3825_v13 = vadd.f32 %v6186_v48, %v3824_v3  ;;  %v4485_v37 = vld [vmem:[%s4583_s23 + $0x70] sm:$0xf]  ;;  %v4486_v3 = vld [vmem:[%s4583_s23 + $0x7c] sm:$0xf] }
 0x380   : > { %v4328_v23 = vpop.f32.mrf.mxu1  ;;  %v3915_v63 = vunpack.c.l.bf16 %v4485_v37 }
 0x381   : > { %3969 = vst.msk [vmem:[%s6197_s29 + $0x90] sm:$0xff] %vm1635_vm12, %v3937_v45  ;;  %v3935_v59 = vadd.f32 %v3903_v58, %v3825_v13  ;;  %v3836_v29 = vadd.f32 %v4328_v23, %v6186_v48  ;;  %v3918_v45 = vunpack.c.l.bf16 %v4486_v3  ;;  %v4487_v23 = vld [vmem:[%s4583_s23 + $0x74] sm:$0xf] }
 0x382   : > { %v3827_v57 = vpop.f32.mrf.mxu1 }
 0x383   : > { %3967 = vst.msk [vmem:[%s6197_s29 + $0x80] sm:$0xff] %vm1635_vm12, %v3935_v59  ;;  %v3938_v24 = vadd.f32 %v3906_v9, %v3836_v29  ;;  %v3828_v18 = vadd.f32 %v6186_v48, %v3827_v57  ;;  %v3916_v59 = vunpack.c.l.bf16 %v4487_v23 }
 0x385   : > { %3970 = vst.msk [vmem:[%s6197_s29 + $0x98] sm:$0xff] %vm1635_vm12, %v3938_v24  ;;  %v3936_v0 = vadd.f32 %v3904_v25, %v3828_v18 }
 0x387   : > { %3968 = vst.msk [vmem:[%s6197_s29 + $0x88] sm:$0xff] %vm1635_vm12, %v3936_v0 }
 0x394   : > { %v4331_v20 = vpop.f32.mrf.mxu1 }
 0x395   : > { %v3849_v53 = vadd.f32 %v4331_v20, %v6186_v48 }
 0x396   : > { %v3840_v56 = vpop.f32.mrf.mxu1 }
 0x397   : > { %v3941_v15 = vadd.f32 %v3909_v31, %v3849_v53  ;;  %v3841_v21 = vadd.f32 %v6186_v48, %v3840_v56 }
 0x398   : > { %v4332_v10 = vpop.f32.mrf.mxu1 }
 0x399   : > { %3973 = vst.msk [vmem:[%s6197_s29 + $0xb0] sm:$0xff] %vm1635_vm12, %v3941_v15  ;;  %v3939_v50 = vadd.f32 %v3907_v40, %v3841_v21  ;;  %v3852_v44 = vadd.f32 %v4332_v10, %v6186_v48 }
 0x39a   : > { %v3843_v12 = vpop.f32.mrf.mxu1 }
 0x39b   : > { %3971 = vst.msk [vmem:[%s6197_s29 + $0xa0] sm:$0xff] %vm1635_vm12, %v3939_v50  ;;  %v3942_v38 = vadd.f32 %v3910_v60, %v3852_v44  ;;  %v3844_v39 = vadd.f32 %v6186_v48, %v3843_v12 }
 0x39d   : > { %3974 = vst.msk [vmem:[%s6197_s29 + $0xb8] sm:$0xff] %vm1635_vm12, %v3942_v38  ;;  %v3940_v22 = vadd.f32 %v3908_v41, %v3844_v39 }
 0x39f   : > { %3972 = vst.msk [vmem:[%s6197_s29 + $0xa8] sm:$0xff] %vm1635_vm12, %v3940_v22 }
 0x3b4   : > { %v4335_v16 = vpop.f32.mrf.mxu1 }
 0x3b5   : > { %v3865_v11 = vadd.f32 %v4335_v16, %v6186_v48 }
 0x3b6   : > { %v3856_v36 = vpop.f32.mrf.mxu1 }
 0x3b7   : > { %v3945_v51 = vadd.f32 %v3913_v34, %v3865_v11  ;;  %v3857_v43 = vadd.f32 %v6186_v48, %v3856_v36 }
 0x3b8   : > { %v4336_v32 = vpop.f32.mrf.mxu1 }
 0x3b9   : > { %3977 = vst.msk [vmem:[%s6197_s29 + $0xd0] sm:$0xff] %vm1635_vm12, %v3945_v51  ;;  %v3943_v27 = vadd.f32 %v3911_v49, %v3857_v43  ;;  %v3868_v1 = vadd.f32 %v4336_v32, %v6186_v48 }
 0x3ba   : > { %v3859_v19 = vpop.f32.mrf.mxu1 }
 0x3bb   : > { %3975 = vst.msk [vmem:[%s6197_s29 + $0xc0] sm:$0xff] %vm1635_vm12, %v3943_v27  ;;  %v3946_v47 = vadd.f32 %v3914_v8, %v3868_v1  ;;  %v3860_v35 = vadd.f32 %v6186_v48, %v3859_v19 }
 0x3bd   : > { %3978 = vst.msk [vmem:[%s6197_s29 + $0xd8] sm:$0xff] %vm1635_vm12, %v3946_v47  ;;  %v3944_v4 = vadd.f32 %v3912_v26, %v3860_v35 }
 0x3bf   : > { %3976 = vst.msk [vmem:[%s6197_s29 + $0xc8] sm:$0xff] %vm1635_vm12, %v3944_v4 }
 0x3d7   : > { %v4339_v17 = vpop.f32.mrf.mxu1 }
 0x3d8   : > { %v3881_v5 = vadd.f32 %v4339_v17, %v6186_v48 }
 0x3d9   : > { %v3872_v14 = vpop.f32.mrf.mxu1 }
 0x3da   : > { %v3949_v28 = vadd.f32 %v3917_v2, %v3881_v5  ;;  %v3873_v58 = vadd.f32 %v6186_v48, %v3872_v14 }
 0x3db   : > { %v4340_v13 = vpop.f32.mrf.mxu1 }
 0x3dc   : > { %3981 = vst.msk [vmem:[%s6197_s29 + $0xf0] sm:$0xff] %vm1635_vm12, %v3949_v28  ;;  %v3947_v6 = vadd.f32 %v3915_v63, %v3873_v58  ;;  %v3884_v9 = vadd.f32 %v4340_v13, %v6186_v48 }
 0x3dd   : > { %v3875_v29 = vpop.f32.mrf.mxu1 }
 0x3de   : > { %3979 = vst.msk [vmem:[%s6197_s29 + $0xe0] sm:$0xff] %vm1635_vm12, %v3947_v6  ;;  %v3950_v30 = vadd.f32 %v3918_v45, %v3884_v9  ;;  %v3876_v25 = vadd.f32 %v6186_v48, %v3875_v29 }
 0x3e0   : > { %3982 = vst.msk [vmem:[%s6197_s29 + $0xf8] sm:$0xff] %vm1635_vm12, %v3950_v30  ;;  %v3948_v57 = vadd.f32 %v3916_v59, %v3876_v25 }
 0x3e2   : > { %3980 = vst.msk [vmem:[%s6197_s29 + $0xe8] sm:$0xff] %vm1635_vm12, %v3948_v57 }
 0x3e3 PF: > { %s15_s18 = sadd.s32 1, %s4494_s18  }
 0x3e4   : > { %p12_p4 = scmp.ge.s32.totalorder %s15_s18, 4  }
 0x3e6   :  { %14 = sbr.rel (!%p12_p4) target bundleno = 1 (0x1), region = 74 }

</bundles_post_ra>
